<compile_context>
chip_gen: v7x
topology: tpu7x:2x2x1
jax: 0.10.0
libtpu: 0.0.40
codegen_flags: <defaults>
</compile_context>

<pallas_src>
import functools

import jax
import jax.numpy as jnp
from jax import lax
from jax.experimental import pallas as pl
from jax.experimental.pallas import tpu as pltpu


# ----------------------------------------------------------------------------
# Fused Pallas kernel: LeakyReLU -> Conv(4,2,1) -> ReLU -> ConvT(4,2,1) + BN stats
# ----------------------------------------------------------------------------
def _unet_inner_kernel(xs_ref, wd_ref, wu_ref,        # inputs
                       t_ref, stats_ref,              # outputs
                       xa_ref, dp_ref,                # VMEM scratch
                       *, Ho, Wo, Ci, Cm, Co, neg_slope):
    # ---- LeakyReLU(0.2) on the parity-split padded input (once per element) --
    for p in range(2):
        for q in range(2):
            xv = xs_ref[0, p, q]                           # (Ho+1, Wo+1, Ci) f32
            xv = jnp.where(xv >= 0, xv, xv * neg_slope)    # f32 VPU (v5e-safe)
            xa_ref[p, q] = xv.astype(jnp.bfloat16)

    # ---- down: Conv2d(k=4, s=2, p=1, bias=False) as 16 tap matmuls -----------
    # out[i,j,:] = sum_{kh,kw} act_pad[2i+kh, 2j+kw, :] @ Wd[kh,kw]
    dacc = jnp.zeros((Ho * Wo, Cm), jnp.float32)
    for kh in range(4):
        for kw in range(4):
            tap = xa_ref[kh % 2, kw % 2,
                         kh // 2: kh // 2 + Ho,
                         kw // 2: kw // 2 + Wo, :]         # (Ho, Wo, Ci) bf16
            dacc += jnp.dot(tap.reshape(Ho * Wo, Ci), wd_ref[4 * kh + kw],
                            preferred_element_type=jnp.float32)

    # ---- ReLU (f32) -> bf16, spatially zero-padded by 1, kept in VMEM --------
    dp_ref[...] = jnp.zeros_like(dp_ref)
    dp_ref[1:1 + Ho, 1:1 + Wo, :] = (
        jnp.maximum(dacc, 0.0).astype(jnp.bfloat16).reshape(Ho, Wo, Cm))

    # ---- up: ConvTranspose2d(k=4, s=2, p=1) via 4-phase sub-pixel taps -------
    # out[2i+a, 2j+b, :] = sum_{u,v} d_pad[i+a+u, j+b+v, :] @ Wu[a,b,u,v]
    # with Wu[a,b,u,v] = w_up[:, :, 3-a-2u, 3-b-2v]   (prepared in the wrapper)
    s1 = jnp.zeros((1, Co), jnp.float32)
    s2 = jnp.zeros((1, Co), jnp.float32)
    for a in range(2):
        for b in range(2):
            acc = jnp.zeros((Ho * Wo, Co), jnp.float32)
            for u in range(2):
                for v in range(2):
                    tap = dp_ref[a + u: a + u + Ho,
                                 b + v: b + v + Wo, :]     # (Ho, Wo, Cm) bf16
                    acc += jnp.dot(tap.reshape(Ho * Wo, Cm), wu_ref[a, b, u, v],
                                   preferred_element_type=jnp.float32)
            t_ref[0, a, b] = acc.reshape(Ho, Wo, Co)
            # BatchNorm batch statistics (partial sums, finished in the wrapper)
            s1 += jnp.sum(acc, axis=0, keepdims=True)
            s2 += jnp.sum(acc * acc, axis=0, keepdims=True)
    stats_ref[0, 0:1, :] = s1
    stats_ref[0, 1:2, :] = s2


# ----------------------------------------------------------------------------
# Wrapper: UnetSkipConnectionBlock (innermost) forward
# ----------------------------------------------------------------------------
def unet_innermost_forward(x, w_down, w_up, gamma, beta):
    """x: (N, Ci, H, W) f32 NCHW
    w_down: (Cm, Ci, 4, 4)  Conv2d weight (bias=False)
    w_up:   (Cm, Co, 4, 4)  ConvTranspose2d weight (bias=False)
    gamma, beta: (Co,)      BatchNorm2d affine
    returns (N, Ci + Co, H, W)."""
    N, Ci, H, W = x.shape
    Cm = w_down.shape[0]
    Co = w_up.shape[1]
    assert H % 2 == 0 and W % 2 == 0
    Ho, Wo = H // 2, W // 2

    # --- XLA head: NCHW->NHWC, pad 1, stride-2 parity split (one fused copy) --
    x_pad = jnp.pad(x.transpose(0, 2, 3, 1), ((0, 0), (1, 1), (1, 1), (0, 0)))
    xs = (x_pad.reshape(N, Ho + 1, 2, Wo + 1, 2, Ci)
          .transpose(0, 2, 4, 1, 3, 5))             # (N, 2, 2, Ho+1, Wo+1, Ci)

    # --- weight layout prep (bf16 for the MXU) --------------------------------
    wd_taps = (w_down.transpose(2, 3, 1, 0)         # (kh, kw, Ci, Cm)
               .reshape(16, Ci, Cm).astype(jnp.bfloat16))
    wu_taps = jnp.stack(
        [jnp.stack(
            [jnp.stack(
                [jnp.stack([w_up[:, :, 3 - a - 2 * u, 3 - b - 2 * v]
                            for v in range(2)], axis=0)
                 for u in range(2)], axis=0)
             for b in range(2)], axis=0)
         for a in range(2)], axis=0).astype(jnp.bfloat16)   # (2,2,2,2,Cm,Co)

    kernel = functools.partial(_unet_inner_kernel, Ho=Ho, Wo=Wo, Ci=Ci,
                               Cm=Cm, Co=Co, neg_slope=0.2)
    t_par, stats = pl.pallas_call(
        kernel,
        out_shape=(jax.ShapeDtypeStruct((N, 2, 2, Ho, Wo, Co), jnp.float32),
                   jax.ShapeDtypeStruct((N, 2, Co), jnp.float32)),
        grid_spec=pltpu.PrefetchScalarGridSpec(
            num_scalar_prefetch=0,
            grid=(N,),
            in_specs=[
                pl.BlockSpec((1, 2, 2, Ho + 1, Wo + 1, Ci),
                             lambda n: (n, 0, 0, 0, 0, 0)),
                pl.BlockSpec((16, Ci, Cm), lambda n: (0, 0, 0)),
                pl.BlockSpec((2, 2, 2, 2, Cm, Co),
                             lambda n: (0, 0, 0, 0, 0, 0)),
            ],
            out_specs=[
                pl.BlockSpec((1, 2, 2, Ho, Wo, Co),
                             lambda n: (n, 0, 0, 0, 0, 0)),
                pl.BlockSpec((1, 2, Co), lambda n: (n, 0, 0)),
            ],
            scratch_shapes=[
                pltpu.VMEM((2, 2, Ho + 1, Wo + 1, Ci), jnp.bfloat16),  # act(x)
                pltpu.VMEM((Ho + 2, Wo + 2, Cm), jnp.bfloat16),        # relu(d) pad1
            ],
        ),
        compiler_params=pltpu.CompilerParams(
            dimension_semantics=("parallel",)),
    )(xs, wd_taps, wu_taps)
    # TODO(synk): for large spatial sizes, add an Ho-tile grid axis with halo
    # DMA (manual make_async_copy) so per-step VMEM stays bounded on v7x.

    # --- BatchNorm2d: train-mode batch stats, biased var, affine, eps=1e-5 ----
    cnt = jnp.float32(N * H * W)
    s1 = jnp.sum(stats[:, 0, :], axis=0)
    s2 = jnp.sum(stats[:, 1, :], axis=0)
    mean = s1 / cnt
    var = s2 / cnt - mean * mean
    scale = gamma * lax.rsqrt(var + 1e-5)
    shift = beta - mean * scale
    # TODO(synk): running_mean/running_var tracking is a training-only side
    # effect with no bearing on the forward output; not reproduced.

    # --- XLA tail: normalize folded into the phase-interleave / NCHW transpose
    bn = (t_par * scale.reshape(1, 1, 1, 1, 1, Co)
          + shift.reshape(1, 1, 1, 1, 1, Co))
    bn = bn.transpose(0, 5, 3, 1, 4, 2).reshape(N, Co, H, W)   # h=2i+a, w=2j+b
    # TODO(synk): the skip concat is still one XLA copy; writing BN and x
    # straight into channel slices of an aliased NCHW buffer would remove it.
    return jnp.concatenate([x, bn], axis=1)


# ----------------------------------------------------------------------------
# Pure-JAX f32 reference (for correctness check)
# ----------------------------------------------------------------------------
def reference_forward(x, w_down, w_up, gamma, beta):
    h = jnp.where(x >= 0, x, 0.2 * x)
    d = lax.conv_general_dilated(h, w_down, (2, 2), [(1, 1), (1, 1)],
                                 dimension_numbers=('NCHW', 'OIHW', 'NCHW'))
    r = jnp.maximum(d, 0.0)
    w_conv = jnp.flip(w_up, axis=(2, 3)).transpose(1, 0, 2, 3)   # (Co, Cm, 4, 4)
    t = lax.conv_general_dilated(r, w_conv, (1, 1), [(2, 2), (2, 2)],
                                 lhs_dilation=(2, 2),
                                 dimension_numbers=('NCHW', 'OIHW', 'NCHW'))
    mean = t.mean(axis=(0, 2, 3), keepdims=True)
    var = ((t - mean) ** 2).mean(axis=(0, 2, 3), keepdims=True)
    bn = (t - mean) * lax.rsqrt(var + 1e-5) \
        * gamma.reshape(1, -1, 1, 1) + beta.reshape(1, -1, 1, 1)
    return jnp.concatenate([x, bn], axis=1)


# ----------------------------------------------------------------------------
if __name__ == "__main__":
    # Innermost UNet block at DewarpNet-like (ngf=64) sizes, kept small:
    # input_nc = outer_nc = 64, inner_nc = 128, spatial 16x16, batch 2.
    N, outer_nc, inner_nc, H, W = 2, 64, 128, 16, 16
    input_nc = outer_nc   # input_nc defaults to outer_nc in __init__

    key = jax.random.PRNGKey(0)
    kx, kd, ku, kg, kb = jax.random.split(key, 5)
    x = jax.random.normal(kx, (N, input_nc, H, W), dtype=jnp.float32)
    w_down = 0.1 * jax.random.normal(kd, (inner_nc, input_nc, 4, 4),
                                     dtype=jnp.float32)
    w_up = 0.1 * jax.random.normal(ku, (inner_nc, outer_nc, 4, 4),
                                   dtype=jnp.float32)
    gamma = 1.0 + 0.1 * jax.random.normal(kg, (outer_nc,), dtype=jnp.float32)
    beta = 0.1 * jax.random.normal(kb, (outer_nc,), dtype=jnp.float32)

    fwd = jax.jit(unet_innermost_forward)
    out = jax.block_until_ready(fwd(x, w_down, w_up, gamma, beta))
    ref = jax.block_until_ready(reference_forward(x, w_down, w_up, gamma, beta))

    assert out.shape == (N, input_nc + outer_nc, H, W), out.shape
    # bf16 MXU inputs with f32 accumulation vs an all-f32 XLA reference.
    max_err = float(jnp.max(jnp.abs(out - ref)))
    assert jnp.allclose(out, ref, atol=3e-2, rtol=3e-2), max_err

    print("KERNEL_OK")
</pallas_src>

<mosaic_0001>
module attributes {stable_mosaic.version = 11 : i64} {
  func.func @_unet_inner_kernel(%arg0: i32, %arg1: memref<1x2x2x9x9x64xf32, #tpu.memory_space<vmem>>, %arg2: memref<16x64x128xbf16, #tpu.memory_space<vmem>>, %arg3: memref<2x2x2x2x128x64xbf16, #tpu.memory_space<vmem>>, %arg4: memref<1x2x2x8x8x64xf32, #tpu.memory_space<vmem>>, %arg5: memref<1x2x64xf32, #tpu.memory_space<vmem>>, %arg6: memref<2x2x9x9x64xbf16, #tpu.memory_space<vmem>>, %arg7: memref<10x10x128xbf16, #tpu.memory_space<vmem>>) attributes {dimension_semantics = [#tpu.dimension_semantics<parallel>], iteration_bounds = array<i64: 2>, scalar_prefetch = 0 : i64, scratch_operands = 2 : i64, tpu.core_type = #tpu.core_type<tc>, window_params = [{transform_indices = @transform_0, window_bounds = array<i64: 1, 2, 2, 9, 9, 64>}, {pipeline_mode = #tpu.pipeline_mode<synchronous>, transform_indices = @transform_1, window_bounds = array<i64: 16, 64, 128>}, {pipeline_mode = #tpu.pipeline_mode<synchronous>, transform_indices = @transform_2, window_bounds = array<i64: 2, 2, 2, 2, 128, 64>}, {transform_indices = @transform_3, window_bounds = array<i64: 1, 2, 2, 8, 8, 64>}, {transform_indices = @transform_4, window_bounds = array<i64: 1, 2, 64>}]} {
    %c0 = arith.constant 0 : index
    %c0_0 = arith.constant 0 : index
    %c0_1 = arith.constant 0 : index
    %c0_2 = arith.constant 0 : index
    %c0_3 = arith.constant 0 : index
    %c0_4 = arith.constant 0 : index
    %0 = vector.load %arg1[%c0, %c0_0, %c0_1, %c0_2, %c0_3, %c0_4] : memref<1x2x2x9x9x64xf32, #tpu.memory_space<vmem>>, vector<1x1x1x9x9x64xf32>
    %1 = vector.shape_cast %0 : vector<1x1x1x9x9x64xf32> to vector<9x9x64xf32>
    %cst = arith.constant 0.000000e+00 : f32
    %2 = vector.broadcast %cst : f32 to vector<9x9x64xf32>
    %3 = arith.cmpf oge, %1, %2 : vector<9x9x64xf32>
    %cst_5 = arith.constant 2.000000e-01 : f32
    %4 = vector.broadcast %cst_5 : f32 to vector<9x9x64xf32>
    %5 = arith.mulf %1, %4 : vector<9x9x64xf32>
    %6 = arith.select %3, %1, %5 : vector<9x9x64xi1>, vector<9x9x64xf32>
    %7 = arith.truncf %6 : vector<9x9x64xf32> to vector<9x9x64xbf16>
    %c0_6 = arith.constant 0 : index
    %c0_7 = arith.constant 0 : index
    %c0_8 = arith.constant 0 : index
    %c0_9 = arith.constant 0 : index
    %c0_10 = arith.constant 0 : index
    %8 = vector.load %arg6[%c0_6, %c0_7, %c0_8, %c0_9, %c0_10] : memref<2x2x9x9x64xbf16, #tpu.memory_space<vmem>>, vector<1x1x9x9x64xbf16>
    %9 = vector.shape_cast %8 : vector<1x1x9x9x64xbf16> to vector<9x9x64xbf16>
    %10 = vector.shape_cast %7 : vector<9x9x64xbf16> to vector<1x1x9x9x64xbf16>
    tpu.vector_store %arg6[%c0_6, %c0_7, %c0_8, %c0_9, %c0_10], %10 {strides = array<i32>} : memref<2x2x9x9x64xbf16, #tpu.memory_space<vmem>>, vector<1x1x9x9x64xbf16>,
    %c0_11 = arith.constant 0 : index
    %c0_12 = arith.constant 0 : index
    %c1 = arith.constant 1 : index
    %c0_13 = arith.constant 0 : index
    %c0_14 = arith.constant 0 : index
    %c0_15 = arith.constant 0 : index
    %11 = vector.load %arg1[%c0_11, %c0_12, %c1, %c0_13, %c0_14, %c0_15] : memref<1x2x2x9x9x64xf32, #tpu.memory_space<vmem>>, vector<1x1x1x9x9x64xf32>
    %12 = vector.shape_cast %11 : vector<1x1x1x9x9x64xf32> to vector<9x9x64xf32>
    %cst_16 = arith.constant 0.000000e+00 : f32
    %13 = vector.broadcast %cst_16 : f32 to vector<9x9x64xf32>
    %14 = arith.cmpf oge, %12, %13 : vector<9x9x64xf32>
    %cst_17 = arith.constant 2.000000e-01 : f32
    %15 = vector.broadcast %cst_17 : f32 to vector<9x9x64xf32>
    %16 = arith.mulf %12, %15 : vector<9x9x64xf32>
    %17 = arith.select %14, %12, %16 : vector<9x9x64xi1>, vector<9x9x64xf32>
    %18 = arith.truncf %17 : vector<9x9x64xf32> to vector<9x9x64xbf16>
    %c0_18 = arith.constant 0 : index
    %c1_19 = arith.constant 1 : index
    %c0_20 = arith.constant 0 : index
    %c0_21 = arith.constant 0 : index
    %c0_22 = arith.constant 0 : index
    %19 = vector.load %arg6[%c0_18, %c1_19, %c0_20, %c0_21, %c0_22] : memref<2x2x9x9x64xbf16, #tpu.memory_space<vmem>>, vector<1x1x9x9x64xbf16>
    %20 = vector.shape_cast %19 : vector<1x1x9x9x64xbf16> to vector<9x9x64xbf16>
    %21 = vector.shape_cast %18 : vector<9x9x64xbf16> to vector<1x1x9x9x64xbf16>
    tpu.vector_store %arg6[%c0_18, %c1_19, %c0_20, %c0_21, %c0_22], %21 {strides = array<i32>} : memref<2x2x9x9x64xbf16, #tpu.memory_space<vmem>>, vector<1x1x9x9x64xbf16>,
    %c0_23 = arith.constant 0 : index
    %c1_24 = arith.constant 1 : index
    %c0_25 = arith.constant 0 : index
    %c0_26 = arith.constant 0 : index
    %c0_27 = arith.constant 0 : index
    %c0_28 = arith.constant 0 : index
    %22 = vector.load %arg1[%c0_23, %c1_24, %c0_25, %c0_26, %c0_27, %c0_28] : memref<1x2x2x9x9x64xf32, #tpu.memory_space<vmem>>, vector<1x1x1x9x9x64xf32>
    %23 = vector.shape_cast %22 : vector<1x1x1x9x9x64xf32> to vector<9x9x64xf32>
    %cst_29 = arith.constant 0.000000e+00 : f32
    %24 = vector.broadcast %cst_29 : f32 to vector<9x9x64xf32>
    %25 = arith.cmpf oge, %23, %24 : vector<9x9x64xf32>
    %cst_30 = arith.constant 2.000000e-01 : f32
    %26 = vector.broadcast %cst_30 : f32 to vector<9x9x64xf32>
    %27 = arith.mulf %23, %26 : vector<9x9x64xf32>
    %28 = arith.select %25, %23, %27 : vector<9x9x64xi1>, vector<9x9x64xf32>
    %29 = arith.truncf %28 : vector<9x9x64xf32> to vector<9x9x64xbf16>
    %c1_31 = arith.constant 1 : index
    %c0_32 = arith.constant 0 : index
    %c0_33 = arith.constant 0 : index
    %c0_34 = arith.constant 0 : index
    %c0_35 = arith.constant 0 : index
    %30 = vector.load %arg6[%c1_31, %c0_32, %c0_33, %c0_34, %c0_35] : memref<2x2x9x9x64xbf16, #tpu.memory_space<vmem>>, vector<1x1x9x9x64xbf16>
    %31 = vector.shape_cast %30 : vector<1x1x9x9x64xbf16> to vector<9x9x64xbf16>
    %32 = vector.shape_cast %29 : vector<9x9x64xbf16> to vector<1x1x9x9x64xbf16>
    tpu.vector_store %arg6[%c1_31, %c0_32, %c0_33, %c0_34, %c0_35], %32 {strides = array<i32>} : memref<2x2x9x9x64xbf16, #tpu.memory_space<vmem>>, vector<1x1x9x9x64xbf16>,
    %c0_36 = arith.constant 0 : index
    %c1_37 = arith.constant 1 : index
    %c1_38 = arith.constant 1 : index
    %c0_39 = arith.constant 0 : index
    %c0_40 = arith.constant 0 : index
    %c0_41 = arith.constant 0 : index
    %33 = vector.load %arg1[%c0_36, %c1_37, %c1_38, %c0_39, %c0_40, %c0_41] : memref<1x2x2x9x9x64xf32, #tpu.memory_space<vmem>>, vector<1x1x1x9x9x64xf32>
    %34 = vector.shape_cast %33 : vector<1x1x1x9x9x64xf32> to vector<9x9x64xf32>
    %cst_42 = arith.constant 0.000000e+00 : f32
    %35 = vector.broadcast %cst_42 : f32 to vector<9x9x64xf32>
    %36 = arith.cmpf oge, %34, %35 : vector<9x9x64xf32>
    %cst_43 = arith.constant 2.000000e-01 : f32
    %37 = vector.broadcast %cst_43 : f32 to vector<9x9x64xf32>
    %38 = arith.mulf %34, %37 : vector<9x9x64xf32>
    %39 = arith.select %36, %34, %38 : vector<9x9x64xi1>, vector<9x9x64xf32>
    %40 = arith.truncf %39 : vector<9x9x64xf32> to vector<9x9x64xbf16>
    %c1_44 = arith.constant 1 : index
    %c1_45 = arith.constant 1 : index
    %c0_46 = arith.constant 0 : index
    %c0_47 = arith.constant 0 : index
    %c0_48 = arith.constant 0 : index
    %41 = vector.load %arg6[%c1_44, %c1_45, %c0_46, %c0_47, %c0_48] : memref<2x2x9x9x64xbf16, #tpu.memory_space<vmem>>, vector<1x1x9x9x64xbf16>
    %42 = vector.shape_cast %41 : vector<1x1x9x9x64xbf16> to vector<9x9x64xbf16>
    %43 = vector.shape_cast %40 : vector<9x9x64xbf16> to vector<1x1x9x9x64xbf16>
    tpu.vector_store %arg6[%c1_44, %c1_45, %c0_46, %c0_47, %c0_48], %43 {strides = array<i32>} : memref<2x2x9x9x64xbf16, #tpu.memory_space<vmem>>, vector<1x1x9x9x64xbf16>,
    %cst_49 = arith.constant 0.000000e+00 : f32
    %44 = vector.broadcast %cst_49 : f32 to vector<64x128xf32>
    %c0_50 = arith.constant 0 : index
    %c0_51 = arith.constant 0 : index
    %c0_52 = arith.constant 0 : index
    %c0_53 = arith.constant 0 : index
    %c0_54 = arith.constant 0 : index
    %45 = vector.load %arg6[%c0_50, %c0_51, %c0_52, %c0_53, %c0_54] : memref<2x2x9x9x64xbf16, #tpu.memory_space<vmem>>, vector<1x1x8x8x64xbf16>
    %46 = vector.shape_cast %45 : vector<1x1x8x8x64xbf16> to vector<8x8x64xbf16>
    %47 = vector.shape_cast %46 : vector<8x8x64xbf16> to vector<64x64xbf16>
    %c0_55 = arith.constant 0 : index
    %c0_56 = arith.constant 0 : index
    %c0_57 = arith.constant 0 : index
    %48 = vector.load %arg2[%c0_55, %c0_56, %c0_57] : memref<16x64x128xbf16, #tpu.memory_space<vmem>>, vector<1x64x128xbf16>
    %49 = vector.shape_cast %48 : vector<1x64x128xbf16> to vector<64x128xbf16>
    %cst_58 = arith.constant dense<0.000000e+00> : vector<64x128xf32>
    %50 = tpu.matmul %47, %49, %cst_58 {dimension_numbers = #tpu.dot_dimension_numbers<[1], [0], [0], [1], [0, 0, 1, 1], [], []>} : vector<64x64xbf16>, vector<64x128xbf16>, vector<64x128xf32> -> vector<64x128xf32>
    %51 = arith.addf %44, %50 : vector<64x128xf32>
    %c0_59 = arith.constant 0 : index
    %c1_60 = arith.constant 1 : index
    %c0_61 = arith.constant 0 : index
    %c0_62 = arith.constant 0 : index
    %c0_63 = arith.constant 0 : index
    %52 = vector.load %arg6[%c0_59, %c1_60, %c0_61, %c0_62, %c0_63] : memref<2x2x9x9x64xbf16, #tpu.memory_space<vmem>>, vector<1x1x8x8x64xbf16>
    %53 = vector.shape_cast %52 : vector<1x1x8x8x64xbf16> to vector<8x8x64xbf16>
    %54 = vector.shape_cast %53 : vector<8x8x64xbf16> to vector<64x64xbf16>
    %c1_64 = arith.constant 1 : index
    %c0_65 = arith.constant 0 : index
    %c0_66 = arith.constant 0 : index
    %55 = vector.load %arg2[%c1_64, %c0_65, %c0_66] : memref<16x64x128xbf16, #tpu.memory_space<vmem>>, vector<1x64x128xbf16>
    %56 = vector.shape_cast %55 : vector<1x64x128xbf16> to vector<64x128xbf16>
    %cst_67 = arith.constant dense<0.000000e+00> : vector<64x128xf32>
    %57 = tpu.matmul %54, %56, %cst_67 {dimension_numbers = #tpu.dot_dimension_numbers<[1], [0], [0], [1], [0, 0, 1, 1], [], []>} : vector<64x64xbf16>, vector<64x128xbf16>, vector<64x128xf32> -> vector<64x128xf32>
    %58 = arith.addf %51, %57 : vector<64x128xf32>
    %c0_68 = arith.constant 0 : index
    %c0_69 = arith.constant 0 : index
    %c0_70 = arith.constant 0 : index
    %c1_71 = arith.constant 1 : index
    %c0_72 = arith.constant 0 : index
    %59 = vector.load %arg6[%c0_68, %c0_69, %c0_70, %c1_71, %c0_72] : memref<2x2x9x9x64xbf16, #tpu.memory_space<vmem>>, vector<1x1x8x8x64xbf16>
    %60 = vector.shape_cast %59 : vector<1x1x8x8x64xbf16> to vector<8x8x64xbf16>
    %61 = vector.shape_cast %60 : vector<8x8x64xbf16> to vector<64x64xbf16>
    %c2 = arith.constant 2 : index
    %c0_73 = arith.constant 0 : index
    %c0_74 = arith.constant 0 : index
    %62 = vector.load %arg2[%c2, %c0_73, %c0_74] : memref<16x64x128xbf16, #tpu.memory_space<vmem>>, vector<1x64x128xbf16>
    %63 = vector.shape_cast %62 : vector<1x64x128xbf16> to vector<64x128xbf16>
    %cst_75 = arith.constant dense<0.000000e+00> : vector<64x128xf32>
    %64 = tpu.matmul %61, %63, %cst_75 {dimension_numbers = #tpu.dot_dimension_numbers<[1], [0], [0], [1], [0, 0, 1, 1], [], []>} : vector<64x64xbf16>, vector<64x128xbf16>, vector<64x128xf32> -> vector<64x128xf32>
    %65 = arith.addf %58, %64 : vector<64x128xf32>
    %c0_76 = arith.constant 0 : index
    %c1_77 = arith.constant 1 : index
    %c0_78 = arith.constant 0 : index
    %c1_79 = arith.constant 1 : index
    %c0_80 = arith.constant 0 : index
    %66 = vector.load %arg6[%c0_76, %c1_77, %c0_78, %c1_79, %c0_80] : memref<2x2x9x9x64xbf16, #tpu.memory_space<vmem>>, vector<1x1x8x8x64xbf16>
    %67 = vector.shape_cast %66 : vector<1x1x8x8x64xbf16> to vector<8x8x64xbf16>
    %68 = vector.shape_cast %67 : vector<8x8x64xbf16> to vector<64x64xbf16>
    %c3 = arith.constant 3 : index
    %c0_81 = arith.constant 0 : index
    %c0_82 = arith.constant 0 : index
    %69 = vector.load %arg2[%c3, %c0_81, %c0_82] : memref<16x64x128xbf16, #tpu.memory_space<vmem>>, vector<1x64x128xbf16>
    %70 = vector.shape_cast %69 : vector<1x64x128xbf16> to vector<64x128xbf16>
    %cst_83 = arith.constant dense<0.000000e+00> : vector<64x128xf32>
    %71 = tpu.matmul %68, %70, %cst_83 {dimension_numbers = #tpu.dot_dimension_numbers<[1], [0], [0], [1], [0, 0, 1, 1], [], []>} : vector<64x64xbf16>, vector<64x128xbf16>, vector<64x128xf32> -> vector<64x128xf32>
    %72 = arith.addf %65, %71 : vector<64x128xf32>
    %c1_84 = arith.constant 1 : index
    %c0_85 = arith.constant 0 : index
    %c0_86 = arith.constant 0 : index
    %c0_87 = arith.constant 0 : index
    %c0_88 = arith.constant 0 : index
    %73 = vector.load %arg6[%c1_84, %c0_85, %c0_86, %c0_87, %c0_88] : memref<2x2x9x9x64xbf16, #tpu.memory_space<vmem>>, vector<1x1x8x8x64xbf16>
    %74 = vector.shape_cast %73 : vector<1x1x8x8x64xbf16> to vector<8x8x64xbf16>
    %75 = vector.shape_cast %74 : vector<8x8x64xbf16> to vector<64x64xbf16>
    %c4 = arith.constant 4 : index
    %c0_89 = arith.constant 0 : index
    %c0_90 = arith.constant 0 : index
    %76 = vector.load %arg2[%c4, %c0_89, %c0_90] : memref<16x64x128xbf16, #tpu.memory_space<vmem>>, vector<1x64x128xbf16>
    %77 = vector.shape_cast %76 : vector<1x64x128xbf16> to vector<64x128xbf16>
    %cst_91 = arith.constant dense<0.000000e+00> : vector<64x128xf32>
    %78 = tpu.matmul %75, %77, %cst_91 {dimension_numbers = #tpu.dot_dimension_numbers<[1], [0], [0], [1], [0, 0, 1, 1], [], []>} : vector<64x64xbf16>, vector<64x128xbf16>, vector<64x128xf32> -> vector<64x128xf32>
    %79 = arith.addf %72, %78 : vector<64x128xf32>
    %c1_92 = arith.constant 1 : index
    %c1_93 = arith.constant 1 : index
    %c0_94 = arith.constant 0 : index
    %c0_95 = arith.constant 0 : index
    %c0_96 = arith.constant 0 : index
    %80 = vector.load %arg6[%c1_92, %c1_93, %c0_94, %c0_95, %c0_96] : memref<2x2x9x9x64xbf16, #tpu.memory_space<vmem>>, vector<1x1x8x8x64xbf16>
    %81 = vector.shape_cast %80 : vector<1x1x8x8x64xbf16> to vector<8x8x64xbf16>
    %82 = vector.shape_cast %81 : vector<8x8x64xbf16> to vector<64x64xbf16>
    %c5 = arith.constant 5 : index
    %c0_97 = arith.constant 0 : index
    %c0_98 = arith.constant 0 : index
    %83 = vector.load %arg2[%c5, %c0_97, %c0_98] : memref<16x64x128xbf16, #tpu.memory_space<vmem>>, vector<1x64x128xbf16>
    %84 = vector.shape_cast %83 : vector<1x64x128xbf16> to vector<64x128xbf16>
    %cst_99 = arith.constant dense<0.000000e+00> : vector<64x128xf32>
    %85 = tpu.matmul %82, %84, %cst_99 {dimension_numbers = #tpu.dot_dimension_numbers<[1], [0], [0], [1], [0, 0, 1, 1], [], []>} : vector<64x64xbf16>, vector<64x128xbf16>, vector<64x128xf32> -> vector<64x128xf32>
    %86 = arith.addf %79, %85 : vector<64x128xf32>
    %c1_100 = arith.constant 1 : index
    %c0_101 = arith.constant 0 : index
    %c0_102 = arith.constant 0 : index
    %c1_103 = arith.constant 1 : index
    %c0_104 = arith.constant 0 : index
    %87 = vector.load %arg6[%c1_100, %c0_101, %c0_102, %c1_103, %c0_104] : memref<2x2x9x9x64xbf16, #tpu.memory_space<vmem>>, vector<1x1x8x8x64xbf16>
    %88 = vector.shape_cast %87 : vector<1x1x8x8x64xbf16> to vector<8x8x64xbf16>
    %89 = vector.shape_cast %88 : vector<8x8x64xbf16> to vector<64x64xbf16>
    %c6 = arith.constant 6 : index
    %c0_105 = arith.constant 0 : index
    %c0_106 = arith.constant 0 : index
    %90 = vector.load %arg2[%c6, %c0_105, %c0_106] : memref<16x64x128xbf16, #tpu.memory_space<vmem>>, vector<1x64x128xbf16>
    %91 = vector.shape_cast %90 : vector<1x64x128xbf16> to vector<64x128xbf16>
    %cst_107 = arith.constant dense<0.000000e+00> : vector<64x128xf32>
    %92 = tpu.matmul %89, %91, %cst_107 {dimension_numbers = #tpu.dot_dimension_numbers<[1], [0], [0], [1], [0, 0, 1, 1], [], []>} : vector<64x64xbf16>, vector<64x128xbf16>, vector<64x128xf32> -> vector<64x128xf32>
    %93 = arith.addf %86, %92 : vector<64x128xf32>
    %c1_108 = arith.constant 1 : index
    %c1_109 = arith.constant 1 : index
    %c0_110 = arith.constant 0 : index
    %c1_111 = arith.constant 1 : index
    %c0_112 = arith.constant 0 : index
    %94 = vector.load %arg6[%c1_108, %c1_109, %c0_110, %c1_111, %c0_112] : memref<2x2x9x9x64xbf16, #tpu.memory_space<vmem>>, vector<1x1x8x8x64xbf16>
    %95 = vector.shape_cast %94 : vector<1x1x8x8x64xbf16> to vector<8x8x64xbf16>
    %96 = vector.shape_cast %95 : vector<8x8x64xbf16> to vector<64x64xbf16>
    %c7 = arith.constant 7 : index
    %c0_113 = arith.constant 0 : index
    %c0_114 = arith.constant 0 : index
    %97 = vector.load %arg2[%c7, %c0_113, %c0_114] : memref<16x64x128xbf16, #tpu.memory_space<vmem>>, vector<1x64x128xbf16>
    %98 = vector.shape_cast %97 : vector<1x64x128xbf16> to vector<64x128xbf16>
    %cst_115 = arith.constant dense<0.000000e+00> : vector<64x128xf32>
    %99 = tpu.matmul %96, %98, %cst_115 {dimension_numbers = #tpu.dot_dimension_numbers<[1], [0], [0], [1], [0, 0, 1, 1], [], []>} : vector<64x64xbf16>, vector<64x128xbf16>, vector<64x128xf32> -> vector<64x128xf32>
    %100 = arith.addf %93, %99 : vector<64x128xf32>
    %c0_116 = arith.constant 0 : index
    %c0_117 = arith.constant 0 : index
    %c1_118 = arith.constant 1 : index
    %c0_119 = arith.constant 0 : index
    %c0_120 = arith.constant 0 : index
    %101 = vector.load %arg6[%c0_116, %c0_117, %c1_118, %c0_119, %c0_120] : memref<2x2x9x9x64xbf16, #tpu.memory_space<vmem>>, vector<1x1x8x8x64xbf16>
    %102 = vector.shape_cast %101 : vector<1x1x8x8x64xbf16> to vector<8x8x64xbf16>
    %103 = vector.shape_cast %102 : vector<8x8x64xbf16> to vector<64x64xbf16>
    %c8 = arith.constant 8 : index
    %c0_121 = arith.constant 0 : index
    %c0_122 = arith.constant 0 : index
    %104 = vector.load %arg2[%c8, %c0_121, %c0_122] : memref<16x64x128xbf16, #tpu.memory_space<vmem>>, vector<1x64x128xbf16>
    %105 = vector.shape_cast %104 : vector<1x64x128xbf16> to vector<64x128xbf16>
    %cst_123 = arith.constant dense<0.000000e+00> : vector<64x128xf32>
    %106 = tpu.matmul %103, %105, %cst_123 {dimension_numbers = #tpu.dot_dimension_numbers<[1], [0], [0], [1], [0, 0, 1, 1], [], []>} : vector<64x64xbf16>, vector<64x128xbf16>, vector<64x128xf32> -> vector<64x128xf32>
    %107 = arith.addf %100, %106 : vector<64x128xf32>
    %c0_124 = arith.constant 0 : index
    %c1_125 = arith.constant 1 : index
    %c1_126 = arith.constant 1 : index
    %c0_127 = arith.constant 0 : index
    %c0_128 = arith.constant 0 : index
    %108 = vector.load %arg6[%c0_124, %c1_125, %c1_126, %c0_127, %c0_128] : memref<2x2x9x9x64xbf16, #tpu.memory_space<vmem>>, vector<1x1x8x8x64xbf16>
    %109 = vector.shape_cast %108 : vector<1x1x8x8x64xbf16> to vector<8x8x64xbf16>
    %110 = vector.shape_cast %109 : vector<8x8x64xbf16> to vector<64x64xbf16>
    %c9 = arith.constant 9 : index
    %c0_129 = arith.constant 0 : index
    %c0_130 = arith.constant 0 : index
    %111 = vector.load %arg2[%c9, %c0_129, %c0_130] : memref<16x64x128xbf16, #tpu.memory_space<vmem>>, vector<1x64x128xbf16>
    %112 = vector.shape_cast %111 : vector<1x64x128xbf16> to vector<64x128xbf16>
    %cst_131 = arith.constant dense<0.000000e+00> : vector<64x128xf32>
    %113 = tpu.matmul %110, %112, %cst_131 {dimension_numbers = #tpu.dot_dimension_numbers<[1], [0], [0], [1], [0, 0, 1, 1], [], []>} : vector<64x64xbf16>, vector<64x128xbf16>, vector<64x128xf32> -> vector<64x128xf32>
    %114 = arith.addf %107, %113 : vector<64x128xf32>
    %c0_132 = arith.constant 0 : index
    %c0_133 = arith.constant 0 : index
    %c1_134 = arith.constant 1 : index
    %c1_135 = arith.constant 1 : index
    %c0_136 = arith.constant 0 : index
    %115 = vector.load %arg6[%c0_132, %c0_133, %c1_134, %c1_135, %c0_136] : memref<2x2x9x9x64xbf16, #tpu.memory_space<vmem>>, vector<1x1x8x8x64xbf16>
    %116 = vector.shape_cast %115 : vector<1x1x8x8x64xbf16> to vector<8x8x64xbf16>
    %117 = vector.shape_cast %116 : vector<8x8x64xbf16> to vector<64x64xbf16>
    %c10 = arith.constant 10 : index
    %c0_137 = arith.constant 0 : index
    %c0_138 = arith.constant 0 : index
    %118 = vector.load %arg2[%c10, %c0_137, %c0_138] : memref<16x64x128xbf16, #tpu.memory_space<vmem>>, vector<1x64x128xbf16>
    %119 = vector.shape_cast %118 : vector<1x64x128xbf16> to vector<64x128xbf16>
    %cst_139 = arith.constant dense<0.000000e+00> : vector<64x128xf32>
    %120 = tpu.matmul %117, %119, %cst_139 {dimension_numbers = #tpu.dot_dimension_numbers<[1], [0], [0], [1], [0, 0, 1, 1], [], []>} : vector<64x64xbf16>, vector<64x128xbf16>, vector<64x128xf32> -> vector<64x128xf32>
    %121 = arith.addf %114, %120 : vector<64x128xf32>
    %c0_140 = arith.constant 0 : index
    %c1_141 = arith.constant 1 : index
    %c1_142 = arith.constant 1 : index
    %c1_143 = arith.constant 1 : index
    %c0_144 = arith.constant 0 : index
    %122 = vector.load %arg6[%c0_140, %c1_141, %c1_142, %c1_143, %c0_144] : memref<2x2x9x9x64xbf16, #tpu.memory_space<vmem>>, vector<1x1x8x8x64xbf16>
    %123 = vector.shape_cast %122 : vector<1x1x8x8x64xbf16> to vector<8x8x64xbf16>
    %124 = vector.shape_cast %123 : vector<8x8x64xbf16> to vector<64x64xbf16>
    %c11 = arith.constant 11 : index
    %c0_145 = arith.constant 0 : index
    %c0_146 = arith.constant 0 : index
    %125 = vector.load %arg2[%c11, %c0_145, %c0_146] : memref<16x64x128xbf16, #tpu.memory_space<vmem>>, vector<1x64x128xbf16>
    %126 = vector.shape_cast %125 : vector<1x64x128xbf16> to vector<64x128xbf16>
    %cst_147 = arith.constant dense<0.000000e+00> : vector<64x128xf32>
    %127 = tpu.matmul %124, %126, %cst_147 {dimension_numbers = #tpu.dot_dimension_numbers<[1], [0], [0], [1], [0, 0, 1, 1], [], []>} : vector<64x64xbf16>, vector<64x128xbf16>, vector<64x128xf32> -> vector<64x128xf32>
    %128 = arith.addf %121, %127 : vector<64x128xf32>
    %c1_148 = arith.constant 1 : index
    %c0_149 = arith.constant 0 : index
    %c1_150 = arith.constant 1 : index
    %c0_151 = arith.constant 0 : index
    %c0_152 = arith.constant 0 : index
    %129 = vector.load %arg6[%c1_148, %c0_149, %c1_150, %c0_151, %c0_152] : memref<2x2x9x9x64xbf16, #tpu.memory_space<vmem>>, vector<1x1x8x8x64xbf16>
    %130 = vector.shape_cast %129 : vector<1x1x8x8x64xbf16> to vector<8x8x64xbf16>
    %131 = vector.shape_cast %130 : vector<8x8x64xbf16> to vector<64x64xbf16>
    %c12 = arith.constant 12 : index
    %c0_153 = arith.constant 0 : index
    %c0_154 = arith.constant 0 : index
    %132 = vector.load %arg2[%c12, %c0_153, %c0_154] : memref<16x64x128xbf16, #tpu.memory_space<vmem>>, vector<1x64x128xbf16>
    %133 = vector.shape_cast %132 : vector<1x64x128xbf16> to vector<64x128xbf16>
    %cst_155 = arith.constant dense<0.000000e+00> : vector<64x128xf32>
    %134 = tpu.matmul %131, %133, %cst_155 {dimension_numbers = #tpu.dot_dimension_numbers<[1], [0], [0], [1], [0, 0, 1, 1], [], []>} : vector<64x64xbf16>, vector<64x128xbf16>, vector<64x128xf32> -> vector<64x128xf32>
    %135 = arith.addf %128, %134 : vector<64x128xf32>
    %c1_156 = arith.constant 1 : index
    %c1_157 = arith.constant 1 : index
    %c1_158 = arith.constant 1 : index
    %c0_159 = arith.constant 0 : index
    %c0_160 = arith.constant 0 : index
    %136 = vector.load %arg6[%c1_156, %c1_157, %c1_158, %c0_159, %c0_160] : memref<2x2x9x9x64xbf16, #tpu.memory_space<vmem>>, vector<1x1x8x8x64xbf16>
    %137 = vector.shape_cast %136 : vector<1x1x8x8x64xbf16> to vector<8x8x64xbf16>
    %138 = vector.shape_cast %137 : vector<8x8x64xbf16> to vector<64x64xbf16>
    %c13 = arith.constant 13 : index
    %c0_161 = arith.constant 0 : index
    %c0_162 = arith.constant 0 : index
    %139 = vector.load %arg2[%c13, %c0_161, %c0_162] : memref<16x64x128xbf16, #tpu.memory_space<vmem>>, vector<1x64x128xbf16>
    %140 = vector.shape_cast %139 : vector<1x64x128xbf16> to vector<64x128xbf16>
    %cst_163 = arith.constant dense<0.000000e+00> : vector<64x128xf32>
    %141 = tpu.matmul %138, %140, %cst_163 {dimension_numbers = #tpu.dot_dimension_numbers<[1], [0], [0], [1], [0, 0, 1, 1], [], []>} : vector<64x64xbf16>, vector<64x128xbf16>, vector<64x128xf32> -> vector<64x128xf32>
    %142 = arith.addf %135, %141 : vector<64x128xf32>
    %c1_164 = arith.constant 1 : index
    %c0_165 = arith.constant 0 : index
    %c1_166 = arith.constant 1 : index
    %c1_167 = arith.constant 1 : index
    %c0_168 = arith.constant 0 : index
    %143 = vector.load %arg6[%c1_164, %c0_165, %c1_166, %c1_167, %c0_168] : memref<2x2x9x9x64xbf16, #tpu.memory_space<vmem>>, vector<1x1x8x8x64xbf16>
    %144 = vector.shape_cast %143 : vector<1x1x8x8x64xbf16> to vector<8x8x64xbf16>
    %145 = vector.shape_cast %144 : vector<8x8x64xbf16> to vector<64x64xbf16>
    %c14 = arith.constant 14 : index
    %c0_169 = arith.constant 0 : index
    %c0_170 = arith.constant 0 : index
    %146 = vector.load %arg2[%c14, %c0_169, %c0_170] : memref<16x64x128xbf16, #tpu.memory_space<vmem>>, vector<1x64x128xbf16>
    %147 = vector.shape_cast %146 : vector<1x64x128xbf16> to vector<64x128xbf16>
    %cst_171 = arith.constant dense<0.000000e+00> : vector<64x128xf32>
    %148 = tpu.matmul %145, %147, %cst_171 {dimension_numbers = #tpu.dot_dimension_numbers<[1], [0], [0], [1], [0, 0, 1, 1], [], []>} : vector<64x64xbf16>, vector<64x128xbf16>, vector<64x128xf32> -> vector<64x128xf32>
    %149 = arith.addf %142, %148 : vector<64x128xf32>
    %c1_172 = arith.constant 1 : index
    %c1_173 = arith.constant 1 : index
    %c1_174 = arith.constant 1 : index
    %c1_175 = arith.constant 1 : index
    %c0_176 = arith.constant 0 : index
    %150 = vector.load %arg6[%c1_172, %c1_173, %c1_174, %c1_175, %c0_176] : memref<2x2x9x9x64xbf16, #tpu.memory_space<vmem>>, vector<1x1x8x8x64xbf16>
    %151 = vector.shape_cast %150 : vector<1x1x8x8x64xbf16> to vector<8x8x64xbf16>
    %152 = vector.shape_cast %151 : vector<8x8x64xbf16> to vector<64x64xbf16>
    %c15 = arith.constant 15 : index
    %c0_177 = arith.constant 0 : index
    %c0_178 = arith.constant 0 : index
    %153 = vector.load %arg2[%c15, %c0_177, %c0_178] : memref<16x64x128xbf16, #tpu.memory_space<vmem>>, vector<1x64x128xbf16>
    %154 = vector.shape_cast %153 : vector<1x64x128xbf16> to vector<64x128xbf16>
    %cst_179 = arith.constant dense<0.000000e+00> : vector<64x128xf32>
    %155 = tpu.matmul %152, %154, %cst_179 {dimension_numbers = #tpu.dot_dimension_numbers<[1], [0], [0], [1], [0, 0, 1, 1], [], []>} : vector<64x64xbf16>, vector<64x128xbf16>, vector<64x128xf32> -> vector<64x128xf32>
    %156 = arith.addf %149, %155 : vector<64x128xf32>
    %cst_180 = arith.constant 0.000000e+00 : bf16
    %157 = vector.broadcast %cst_180 : bf16 to vector<10x10x128xbf16>
    %c0_181 = arith.constant 0 : index
    %c0_182 = arith.constant 0 : index
    %c0_183 = arith.constant 0 : index
    %158 = vector.load %arg7[%c0_181, %c0_182, %c0_183] : memref<10x10x128xbf16, #tpu.memory_space<vmem>>, vector<10x10x128xbf16>
    tpu.vector_store %arg7[%c0_181, %c0_182, %c0_183], %157 {strides = array<i32>} : memref<10x10x128xbf16, #tpu.memory_space<vmem>>, vector<10x10x128xbf16>,
    %cst_184 = arith.constant 0.000000e+00 : f32
    %159 = vector.broadcast %cst_184 : f32 to vector<64x128xf32>
    %160 = arith.maximumf %156, %159 : vector<64x128xf32>
    %161 = arith.truncf %160 : vector<64x128xf32> to vector<64x128xbf16>
    %162 = vector.shape_cast %161 : vector<64x128xbf16> to vector<8x8x128xbf16>
    %c1_185 = arith.constant 1 : index
    %c1_186 = arith.constant 1 : index
    %c0_187 = arith.constant 0 : index
    %163 = vector.load %arg7[%c1_185, %c1_186, %c0_187] : memref<10x10x128xbf16, #tpu.memory_space<vmem>>, vector<8x8x128xbf16>
    tpu.vector_store %arg7[%c1_185, %c1_186, %c0_187], %162 {strides = array<i32>} : memref<10x10x128xbf16, #tpu.memory_space<vmem>>, vector<8x8x128xbf16>,
    %cst_188 = arith.constant 0.000000e+00 : f32
    %164 = vector.broadcast %cst_188 : f32 to vector<1x64xf32>
    %cst_189 = arith.constant 0.000000e+00 : f32
    %165 = vector.broadcast %cst_189 : f32 to vector<1x64xf32>
    %cst_190 = arith.constant 0.000000e+00 : f32
    %166 = vector.broadcast %cst_190 : f32 to vector<64x64xf32>
    %c0_191 = arith.constant 0 : index
    %c0_192 = arith.constant 0 : index
    %c0_193 = arith.constant 0 : index
    %167 = vector.load %arg7[%c0_191, %c0_192, %c0_193] : memref<10x10x128xbf16, #tpu.memory_space<vmem>>, vector<8x8x128xbf16>
    %168 = vector.shape_cast %167 : vector<8x8x128xbf16> to vector<64x128xbf16>
    %c0_194 = arith.constant 0 : index
    %c0_195 = arith.constant 0 : index
    %c0_196 = arith.constant 0 : index
    %c0_197 = arith.constant 0 : index
    %c0_198 = arith.constant 0 : index
    %c0_199 = arith.constant 0 : index
    %169 = vector.load %arg3[%c0_194, %c0_195, %c0_196, %c0_197, %c0_198, %c0_199] : memref<2x2x2x2x128x64xbf16, #tpu.memory_space<vmem>>, vector<1x1x1x1x128x64xbf16>
    %170 = vector.shape_cast %169 : vector<1x1x1x1x128x64xbf16> to vector<128x64xbf16>
    %cst_200 = arith.constant dense<0.000000e+00> : vector<64x64xf32>
    %171 = tpu.matmul %168, %170, %cst_200 {dimension_numbers = #tpu.dot_dimension_numbers<[1], [0], [0], [1], [0, 0, 1, 1], [], []>} : vector<64x128xbf16>, vector<128x64xbf16>, vector<64x64xf32> -> vector<64x64xf32>
    %172 = arith.addf %166, %171 : vector<64x64xf32>
    %c0_201 = arith.constant 0 : index
    %c1_202 = arith.constant 1 : index
    %c0_203 = arith.constant 0 : index
    %173 = vector.load %arg7[%c0_201, %c1_202, %c0_203] : memref<10x10x128xbf16, #tpu.memory_space<vmem>>, vector<8x8x128xbf16>
    %174 = vector.shape_cast %173 : vector<8x8x128xbf16> to vector<64x128xbf16>
    %c0_204 = arith.constant 0 : index
    %c0_205 = arith.constant 0 : index
    %c0_206 = arith.constant 0 : index
    %c1_207 = arith.constant 1 : index
    %c0_208 = arith.constant 0 : index
    %c0_209 = arith.constant 0 : index
    %175 = vector.load %arg3[%c0_204, %c0_205, %c0_206, %c1_207, %c0_208, %c0_209] : memref<2x2x2x2x128x64xbf16, #tpu.memory_space<vmem>>, vector<1x1x1x1x128x64xbf16>
    %176 = vector.shape_cast %175 : vector<1x1x1x1x128x64xbf16> to vector<128x64xbf16>
    %cst_210 = arith.constant dense<0.000000e+00> : vector<64x64xf32>
    %177 = tpu.matmul %174, %176, %cst_210 {dimension_numbers = #tpu.dot_dimension_numbers<[1], [0], [0], [1], [0, 0, 1, 1], [], []>} : vector<64x128xbf16>, vector<128x64xbf16>, vector<64x64xf32> -> vector<64x64xf32>
    %178 = arith.addf %172, %177 : vector<64x64xf32>
    %c1_211 = arith.constant 1 : index
    %c0_212 = arith.constant 0 : index
    %c0_213 = arith.constant 0 : index
    %179 = vector.load %arg7[%c1_211, %c0_212, %c0_213] : memref<10x10x128xbf16, #tpu.memory_space<vmem>>, vector<8x8x128xbf16>
    %180 = vector.shape_cast %179 : vector<8x8x128xbf16> to vector<64x128xbf16>
    %c0_214 = arith.constant 0 : index
    %c0_215 = arith.constant 0 : index
    %c1_216 = arith.constant 1 : index
    %c0_217 = arith.constant 0 : index
    %c0_218 = arith.constant 0 : index
    %c0_219 = arith.constant 0 : index
    %181 = vector.load %arg3[%c0_214, %c0_215, %c1_216, %c0_217, %c0_218, %c0_219] : memref<2x2x2x2x128x64xbf16, #tpu.memory_space<vmem>>, vector<1x1x1x1x128x64xbf16>
    %182 = vector.shape_cast %181 : vector<1x1x1x1x128x64xbf16> to vector<128x64xbf16>
    %cst_220 = arith.constant dense<0.000000e+00> : vector<64x64xf32>
    %183 = tpu.matmul %180, %182, %cst_220 {dimension_numbers = #tpu.dot_dimension_numbers<[1], [0], [0], [1], [0, 0, 1, 1], [], []>} : vector<64x128xbf16>, vector<128x64xbf16>, vector<64x64xf32> -> vector<64x64xf32>
    %184 = arith.addf %178, %183 : vector<64x64xf32>
    %c1_221 = arith.constant 1 : index
    %c1_222 = arith.constant 1 : index
    %c0_223 = arith.constant 0 : index
    %185 = vector.load %arg7[%c1_221, %c1_222, %c0_223] : memref<10x10x128xbf16, #tpu.memory_space<vmem>>, vector<8x8x128xbf16>
    %186 = vector.shape_cast %185 : vector<8x8x128xbf16> to vector<64x128xbf16>
    %c0_224 = arith.constant 0 : index
    %c0_225 = arith.constant 0 : index
    %c1_226 = arith.constant 1 : index
    %c1_227 = arith.constant 1 : index
    %c0_228 = arith.constant 0 : index
    %c0_229 = arith.constant 0 : index
    %187 = vector.load %arg3[%c0_224, %c0_225, %c1_226, %c1_227, %c0_228, %c0_229] : memref<2x2x2x2x128x64xbf16, #tpu.memory_space<vmem>>, vector<1x1x1x1x128x64xbf16>
    %188 = vector.shape_cast %187 : vector<1x1x1x1x128x64xbf16> to vector<128x64xbf16>
    %cst_230 = arith.constant dense<0.000000e+00> : vector<64x64xf32>
    %189 = tpu.matmul %186, %188, %cst_230 {dimension_numbers = #tpu.dot_dimension_numbers<[1], [0], [0], [1], [0, 0, 1, 1], [], []>} : vector<64x128xbf16>, vector<128x64xbf16>, vector<64x64xf32> -> vector<64x64xf32>
    %190 = arith.addf %184, %189 : vector<64x64xf32>
    %191 = vector.shape_cast %190 : vector<64x64xf32> to vector<8x8x64xf32>
    %c0_231 = arith.constant 0 : index
    %c0_232 = arith.constant 0 : index
    %c0_233 = arith.constant 0 : index
    %c0_234 = arith.constant 0 : index
    %c0_235 = arith.constant 0 : index
    %c0_236 = arith.constant 0 : index
    %192 = vector.load %arg4[%c0_231, %c0_232, %c0_233, %c0_234, %c0_235, %c0_236] : memref<1x2x2x8x8x64xf32, #tpu.memory_space<vmem>>, vector<1x1x1x8x8x64xf32>
    %193 = vector.shape_cast %192 : vector<1x1x1x8x8x64xf32> to vector<8x8x64xf32>
    %194 = vector.shape_cast %191 : vector<8x8x64xf32> to vector<1x1x1x8x8x64xf32>
    tpu.vector_store %arg4[%c0_231, %c0_232, %c0_233, %c0_234, %c0_235, %c0_236], %194 {strides = array<i32>} : memref<1x2x2x8x8x64xf32, #tpu.memory_space<vmem>>, vector<1x1x1x8x8x64xf32>,
    %cst_237 = arith.constant dense<0.000000e+00> : vector<64xf32>
    %195 = vector.multi_reduction <add>, %190, %cst_237 [0] : vector<64x64xf32> to vector<64xf32>
    %196 = vector.shape_cast %195 : vector<64xf32> to vector<1x64xf32>
    %197 = arith.addf %164, %196 : vector<1x64xf32>
    %198 = arith.mulf %190, %190 : vector<64x64xf32>
    %cst_238 = arith.constant dense<0.000000e+00> : vector<64xf32>
    %199 = vector.multi_reduction <add>, %198, %cst_238 [0] : vector<64x64xf32> to vector<64xf32>
    %200 = vector.shape_cast %199 : vector<64xf32> to vector<1x64xf32>
    %201 = arith.addf %165, %200 : vector<1x64xf32>
    %cst_239 = arith.constant 0.000000e+00 : f32
    %202 = vector.broadcast %cst_239 : f32 to vector<64x64xf32>
    %c0_240 = arith.constant 0 : index
    %c1_241 = arith.constant 1 : index
    %c0_242 = arith.constant 0 : index
    %203 = vector.load %arg7[%c0_240, %c1_241, %c0_242] : memref<10x10x128xbf16, #tpu.memory_space<vmem>>, vector<8x8x128xbf16>
    %204 = vector.shape_cast %203 : vector<8x8x128xbf16> to vector<64x128xbf16>
    %c0_243 = arith.constant 0 : index
    %c1_244 = arith.constant 1 : index
    %c0_245 = arith.constant 0 : index
    %c0_246 = arith.constant 0 : index
    %c0_247 = arith.constant 0 : index
    %c0_248 = arith.constant 0 : index
    %205 = vector.load %arg3[%c0_243, %c1_244, %c0_245, %c0_246, %c0_247, %c0_248] : memref<2x2x2x2x128x64xbf16, #tpu.memory_space<vmem>>, vector<1x1x1x1x128x64xbf16>
    %206 = vector.shape_cast %205 : vector<1x1x1x1x128x64xbf16> to vector<128x64xbf16>
    %cst_249 = arith.constant dense<0.000000e+00> : vector<64x64xf32>
    %207 = tpu.matmul %204, %206, %cst_249 {dimension_numbers = #tpu.dot_dimension_numbers<[1], [0], [0], [1], [0, 0, 1, 1], [], []>} : vector<64x128xbf16>, vector<128x64xbf16>, vector<64x64xf32> -> vector<64x64xf32>
    %208 = arith.addf %202, %207 : vector<64x64xf32>
    %c0_250 = arith.constant 0 : index
    %c2_251 = arith.constant 2 : index
    %c0_252 = arith.constant 0 : index
    %209 = vector.load %arg7[%c0_250, %c2_251, %c0_252] : memref<10x10x128xbf16, #tpu.memory_space<vmem>>, vector<8x8x128xbf16>
    %210 = vector.shape_cast %209 : vector<8x8x128xbf16> to vector<64x128xbf16>
    %c0_253 = arith.constant 0 : index
    %c1_254 = arith.constant 1 : index
    %c0_255 = arith.constant 0 : index
    %c1_256 = arith.constant 1 : index
    %c0_257 = arith.constant 0 : index
    %c0_258 = arith.constant 0 : index
    %211 = vector.load %arg3[%c0_253, %c1_254, %c0_255, %c1_256, %c0_257, %c0_258] : memref<2x2x2x2x128x64xbf16, #tpu.memory_space<vmem>>, vector<1x1x1x1x128x64xbf16>
    %212 = vector.shape_cast %211 : vector<1x1x1x1x128x64xbf16> to vector<128x64xbf16>
    %cst_259 = arith.constant dense<0.000000e+00> : vector<64x64xf32>
    %213 = tpu.matmul %210, %212, %cst_259 {dimension_numbers = #tpu.dot_dimension_numbers<[1], [0], [0], [1], [0, 0, 1, 1], [], []>} : vector<64x128xbf16>, vector<128x64xbf16>, vector<64x64xf32> -> vector<64x64xf32>
    %214 = arith.addf %208, %213 : vector<64x64xf32>
    %c1_260 = arith.constant 1 : index
    %c1_261 = arith.constant 1 : index
    %c0_262 = arith.constant 0 : index
    %215 = vector.load %arg7[%c1_260, %c1_261, %c0_262] : memref<10x10x128xbf16, #tpu.memory_space<vmem>>, vector<8x8x128xbf16>
    %216 = vector.shape_cast %215 : vector<8x8x128xbf16> to vector<64x128xbf16>
    %c0_263 = arith.constant 0 : index
    %c1_264 = arith.constant 1 : index
    %c1_265 = arith.constant 1 : index
    %c0_266 = arith.constant 0 : index
    %c0_267 = arith.constant 0 : index
    %c0_268 = arith.constant 0 : index
    %217 = vector.load %arg3[%c0_263, %c1_264, %c1_265, %c0_266, %c0_267, %c0_268] : memref<2x2x2x2x128x64xbf16, #tpu.memory_space<vmem>>, vector<1x1x1x1x128x64xbf16>
    %218 = vector.shape_cast %217 : vector<1x1x1x1x128x64xbf16> to vector<128x64xbf16>
    %cst_269 = arith.constant dense<0.000000e+00> : vector<64x64xf32>
    %219 = tpu.matmul %216, %218, %cst_269 {dimension_numbers = #tpu.dot_dimension_numbers<[1], [0], [0], [1], [0, 0, 1, 1], [], []>} : vector<64x128xbf16>, vector<128x64xbf16>, vector<64x64xf32> -> vector<64x64xf32>
    %220 = arith.addf %214, %219 : vector<64x64xf32>
    %c1_270 = arith.constant 1 : index
    %c2_271 = arith.constant 2 : index
    %c0_272 = arith.constant 0 : index
    %221 = vector.load %arg7[%c1_270, %c2_271, %c0_272] : memref<10x10x128xbf16, #tpu.memory_space<vmem>>, vector<8x8x128xbf16>
    %222 = vector.shape_cast %221 : vector<8x8x128xbf16> to vector<64x128xbf16>
    %c0_273 = arith.constant 0 : index
    %c1_274 = arith.constant 1 : index
    %c1_275 = arith.constant 1 : index
    %c1_276 = arith.constant 1 : index
    %c0_277 = arith.constant 0 : index
    %c0_278 = arith.constant 0 : index
    %223 = vector.load %arg3[%c0_273, %c1_274, %c1_275, %c1_276, %c0_277, %c0_278] : memref<2x2x2x2x128x64xbf16, #tpu.memory_space<vmem>>, vector<1x1x1x1x128x64xbf16>
    %224 = vector.shape_cast %223 : vector<1x1x1x1x128x64xbf16> to vector<128x64xbf16>
    %cst_279 = arith.constant dense<0.000000e+00> : vector<64x64xf32>
    %225 = tpu.matmul %222, %224, %cst_279 {dimension_numbers = #tpu.dot_dimension_numbers<[1], [0], [0], [1], [0, 0, 1, 1], [], []>} : vector<64x128xbf16>, vector<128x64xbf16>, vector<64x64xf32> -> vector<64x64xf32>
    %226 = arith.addf %220, %225 : vector<64x64xf32>
    %227 = vector.shape_cast %226 : vector<64x64xf32> to vector<8x8x64xf32>
    %c0_280 = arith.constant 0 : index
    %c0_281 = arith.constant 0 : index
    %c1_282 = arith.constant 1 : index
    %c0_283 = arith.constant 0 : index
    %c0_284 = arith.constant 0 : index
    %c0_285 = arith.constant 0 : index
    %228 = vector.load %arg4[%c0_280, %c0_281, %c1_282, %c0_283, %c0_284, %c0_285] : memref<1x2x2x8x8x64xf32, #tpu.memory_space<vmem>>, vector<1x1x1x8x8x64xf32>
    %229 = vector.shape_cast %228 : vector<1x1x1x8x8x64xf32> to vector<8x8x64xf32>
    %230 = vector.shape_cast %227 : vector<8x8x64xf32> to vector<1x1x1x8x8x64xf32>
    tpu.vector_store %arg4[%c0_280, %c0_281, %c1_282, %c0_283, %c0_284, %c0_285], %230 {strides = array<i32>} : memref<1x2x2x8x8x64xf32, #tpu.memory_space<vmem>>, vector<1x1x1x8x8x64xf32>,
    %cst_286 = arith.constant dense<0.000000e+00> : vector<64xf32>
    %231 = vector.multi_reduction <add>, %226, %cst_286 [0] : vector<64x64xf32> to vector<64xf32>
    %232 = vector.shape_cast %231 : vector<64xf32> to vector<1x64xf32>
    %233 = arith.addf %197, %232 : vector<1x64xf32>
    %234 = arith.mulf %226, %226 : vector<64x64xf32>
    %cst_287 = arith.constant dense<0.000000e+00> : vector<64xf32>
    %235 = vector.multi_reduction <add>, %234, %cst_287 [0] : vector<64x64xf32> to vector<64xf32>
    %236 = vector.shape_cast %235 : vector<64xf32> to vector<1x64xf32>
    %237 = arith.addf %201, %236 : vector<1x64xf32>
    %cst_288 = arith.constant 0.000000e+00 : f32
    %238 = vector.broadcast %cst_288 : f32 to vector<64x64xf32>
    %c1_289 = arith.constant 1 : index
    %c0_290 = arith.constant 0 : index
    %c0_291 = arith.constant 0 : index
    %239 = vector.load %arg7[%c1_289, %c0_290, %c0_291] : memref<10x10x128xbf16, #tpu.memory_space<vmem>>, vector<8x8x128xbf16>
    %240 = vector.shape_cast %239 : vector<8x8x128xbf16> to vector<64x128xbf16>
    %c1_292 = arith.constant 1 : index
    %c0_293 = arith.constant 0 : index
    %c0_294 = arith.constant 0 : index
    %c0_295 = arith.constant 0 : index
    %c0_296 = arith.constant 0 : index
    %c0_297 = arith.constant 0 : index
    %241 = vector.load %arg3[%c1_292, %c0_293, %c0_294, %c0_295, %c0_296, %c0_297] : memref<2x2x2x2x128x64xbf16, #tpu.memory_space<vmem>>, vector<1x1x1x1x128x64xbf16>
    %242 = vector.shape_cast %241 : vector<1x1x1x1x128x64xbf16> to vector<128x64xbf16>
    %cst_298 = arith.constant dense<0.000000e+00> : vector<64x64xf32>
    %243 = tpu.matmul %240, %242, %cst_298 {dimension_numbers = #tpu.dot_dimension_numbers<[1], [0], [0], [1], [0, 0, 1, 1], [], []>} : vector<64x128xbf16>, vector<128x64xbf16>, vector<64x64xf32> -> vector<64x64xf32>
    %244 = arith.addf %238, %243 : vector<64x64xf32>
    %c1_299 = arith.constant 1 : index
    %c1_300 = arith.constant 1 : index
    %c0_301 = arith.constant 0 : index
    %245 = vector.load %arg7[%c1_299, %c1_300, %c0_301] : memref<10x10x128xbf16, #tpu.memory_space<vmem>>, vector<8x8x128xbf16>
    %246 = vector.shape_cast %245 : vector<8x8x128xbf16> to vector<64x128xbf16>
    %c1_302 = arith.constant 1 : index
    %c0_303 = arith.constant 0 : index
    %c0_304 = arith.constant 0 : index
    %c1_305 = arith.constant 1 : index
    %c0_306 = arith.constant 0 : index
    %c0_307 = arith.constant 0 : index
    %247 = vector.load %arg3[%c1_302, %c0_303, %c0_304, %c1_305, %c0_306, %c0_307] : memref<2x2x2x2x128x64xbf16, #tpu.memory_space<vmem>>, vector<1x1x1x1x128x64xbf16>
    %248 = vector.shape_cast %247 : vector<1x1x1x1x128x64xbf16> to vector<128x64xbf16>
    %cst_308 = arith.constant dense<0.000000e+00> : vector<64x64xf32>
    %249 = tpu.matmul %246, %248, %cst_308 {dimension_numbers = #tpu.dot_dimension_numbers<[1], [0], [0], [1], [0, 0, 1, 1], [], []>} : vector<64x128xbf16>, vector<128x64xbf16>, vector<64x64xf32> -> vector<64x64xf32>
    %250 = arith.addf %244, %249 : vector<64x64xf32>
    %c2_309 = arith.constant 2 : index
    %c0_310 = arith.constant 0 : index
    %c0_311 = arith.constant 0 : index
    %251 = vector.load %arg7[%c2_309, %c0_310, %c0_311] : memref<10x10x128xbf16, #tpu.memory_space<vmem>>, vector<8x8x128xbf16>
    %252 = vector.shape_cast %251 : vector<8x8x128xbf16> to vector<64x128xbf16>
    %c1_312 = arith.constant 1 : index
    %c0_313 = arith.constant 0 : index
    %c1_314 = arith.constant 1 : index
    %c0_315 = arith.constant 0 : index
    %c0_316 = arith.constant 0 : index
    %c0_317 = arith.constant 0 : index
    %253 = vector.load %arg3[%c1_312, %c0_313, %c1_314, %c0_315, %c0_316, %c0_317] : memref<2x2x2x2x128x64xbf16, #tpu.memory_space<vmem>>, vector<1x1x1x1x128x64xbf16>
    %254 = vector.shape_cast %253 : vector<1x1x1x1x128x64xbf16> to vector<128x64xbf16>
    %cst_318 = arith.constant dense<0.000000e+00> : vector<64x64xf32>
    %255 = tpu.matmul %252, %254, %cst_318 {dimension_numbers = #tpu.dot_dimension_numbers<[1], [0], [0], [1], [0, 0, 1, 1], [], []>} : vector<64x128xbf16>, vector<128x64xbf16>, vector<64x64xf32> -> vector<64x64xf32>
    %256 = arith.addf %250, %255 : vector<64x64xf32>
    %c2_319 = arith.constant 2 : index
    %c1_320 = arith.constant 1 : index
    %c0_321 = arith.constant 0 : index
    %257 = vector.load %arg7[%c2_319, %c1_320, %c0_321] : memref<10x10x128xbf16, #tpu.memory_space<vmem>>, vector<8x8x128xbf16>
    %258 = vector.shape_cast %257 : vector<8x8x128xbf16> to vector<64x128xbf16>
    %c1_322 = arith.constant 1 : index
    %c0_323 = arith.constant 0 : index
    %c1_324 = arith.constant 1 : index
    %c1_325 = arith.constant 1 : index
    %c0_326 = arith.constant 0 : index
    %c0_327 = arith.constant 0 : index
    %259 = vector.load %arg3[%c1_322, %c0_323, %c1_324, %c1_325, %c0_326, %c0_327] : memref<2x2x2x2x128x64xbf16, #tpu.memory_space<vmem>>, vector<1x1x1x1x128x64xbf16>
    %260 = vector.shape_cast %259 : vector<1x1x1x1x128x64xbf16> to vector<128x64xbf16>
    %cst_328 = arith.constant dense<0.000000e+00> : vector<64x64xf32>
    %261 = tpu.matmul %258, %260, %cst_328 {dimension_numbers = #tpu.dot_dimension_numbers<[1], [0], [0], [1], [0, 0, 1, 1], [], []>} : vector<64x128xbf16>, vector<128x64xbf16>, vector<64x64xf32> -> vector<64x64xf32>
    %262 = arith.addf %256, %261 : vector<64x64xf32>
    %263 = vector.shape_cast %262 : vector<64x64xf32> to vector<8x8x64xf32>
    %c0_329 = arith.constant 0 : index
    %c1_330 = arith.constant 1 : index
    %c0_331 = arith.constant 0 : index
    %c0_332 = arith.constant 0 : index
    %c0_333 = arith.constant 0 : index
    %c0_334 = arith.constant 0 : index
    %264 = vector.load %arg4[%c0_329, %c1_330, %c0_331, %c0_332, %c0_333, %c0_334] : memref<1x2x2x8x8x64xf32, #tpu.memory_space<vmem>>, vector<1x1x1x8x8x64xf32>
    %265 = vector.shape_cast %264 : vector<1x1x1x8x8x64xf32> to vector<8x8x64xf32>
    %266 = vector.shape_cast %263 : vector<8x8x64xf32> to vector<1x1x1x8x8x64xf32>
    tpu.vector_store %arg4[%c0_329, %c1_330, %c0_331, %c0_332, %c0_333, %c0_334], %266 {strides = array<i32>} : memref<1x2x2x8x8x64xf32, #tpu.memory_space<vmem>>, vector<1x1x1x8x8x64xf32>,
    %cst_335 = arith.constant dense<0.000000e+00> : vector<64xf32>
    %267 = vector.multi_reduction <add>, %262, %cst_335 [0] : vector<64x64xf32> to vector<64xf32>
    %268 = vector.shape_cast %267 : vector<64xf32> to vector<1x64xf32>
    %269 = arith.addf %233, %268 : vector<1x64xf32>
    %270 = arith.mulf %262, %262 : vector<64x64xf32>
    %cst_336 = arith.constant dense<0.000000e+00> : vector<64xf32>
    %271 = vector.multi_reduction <add>, %270, %cst_336 [0] : vector<64x64xf32> to vector<64xf32>
    %272 = vector.shape_cast %271 : vector<64xf32> to vector<1x64xf32>
    %273 = arith.addf %237, %272 : vector<1x64xf32>
    %cst_337 = arith.constant 0.000000e+00 : f32
    %274 = vector.broadcast %cst_337 : f32 to vector<64x64xf32>
    %c1_338 = arith.constant 1 : index
    %c1_339 = arith.constant 1 : index
    %c0_340 = arith.constant 0 : index
    %275 = vector.load %arg7[%c1_338, %c1_339, %c0_340] : memref<10x10x128xbf16, #tpu.memory_space<vmem>>, vector<8x8x128xbf16>
    %276 = vector.shape_cast %275 : vector<8x8x128xbf16> to vector<64x128xbf16>
    %c1_341 = arith.constant 1 : index
    %c1_342 = arith.constant 1 : index
    %c0_343 = arith.constant 0 : index
    %c0_344 = arith.constant 0 : index
    %c0_345 = arith.constant 0 : index
    %c0_346 = arith.constant 0 : index
    %277 = vector.load %arg3[%c1_341, %c1_342, %c0_343, %c0_344, %c0_345, %c0_346] : memref<2x2x2x2x128x64xbf16, #tpu.memory_space<vmem>>, vector<1x1x1x1x128x64xbf16>
    %278 = vector.shape_cast %277 : vector<1x1x1x1x128x64xbf16> to vector<128x64xbf16>
    %cst_347 = arith.constant dense<0.000000e+00> : vector<64x64xf32>
    %279 = tpu.matmul %276, %278, %cst_347 {dimension_numbers = #tpu.dot_dimension_numbers<[1], [0], [0], [1], [0, 0, 1, 1], [], []>} : vector<64x128xbf16>, vector<128x64xbf16>, vector<64x64xf32> -> vector<64x64xf32>
    %280 = arith.addf %274, %279 : vector<64x64xf32>
    %c1_348 = arith.constant 1 : index
    %c2_349 = arith.constant 2 : index
    %c0_350 = arith.constant 0 : index
    %281 = vector.load %arg7[%c1_348, %c2_349, %c0_350] : memref<10x10x128xbf16, #tpu.memory_space<vmem>>, vector<8x8x128xbf16>
    %282 = vector.shape_cast %281 : vector<8x8x128xbf16> to vector<64x128xbf16>
    %c1_351 = arith.constant 1 : index
    %c1_352 = arith.constant 1 : index
    %c0_353 = arith.constant 0 : index
    %c1_354 = arith.constant 1 : index
    %c0_355 = arith.constant 0 : index
    %c0_356 = arith.constant 0 : index
    %283 = vector.load %arg3[%c1_351, %c1_352, %c0_353, %c1_354, %c0_355, %c0_356] : memref<2x2x2x2x128x64xbf16, #tpu.memory_space<vmem>>, vector<1x1x1x1x128x64xbf16>
    %284 = vector.shape_cast %283 : vector<1x1x1x1x128x64xbf16> to vector<128x64xbf16>
    %cst_357 = arith.constant dense<0.000000e+00> : vector<64x64xf32>
    %285 = tpu.matmul %282, %284, %cst_357 {dimension_numbers = #tpu.dot_dimension_numbers<[1], [0], [0], [1], [0, 0, 1, 1], [], []>} : vector<64x128xbf16>, vector<128x64xbf16>, vector<64x64xf32> -> vector<64x64xf32>
    %286 = arith.addf %280, %285 : vector<64x64xf32>
    %c2_358 = arith.constant 2 : index
    %c1_359 = arith.constant 1 : index
    %c0_360 = arith.constant 0 : index
    %287 = vector.load %arg7[%c2_358, %c1_359, %c0_360] : memref<10x10x128xbf16, #tpu.memory_space<vmem>>, vector<8x8x128xbf16>
    %288 = vector.shape_cast %287 : vector<8x8x128xbf16> to vector<64x128xbf16>
    %c1_361 = arith.constant 1 : index
    %c1_362 = arith.constant 1 : index
    %c1_363 = arith.constant 1 : index
    %c0_364 = arith.constant 0 : index
    %c0_365 = arith.constant 0 : index
    %c0_366 = arith.constant 0 : index
    %289 = vector.load %arg3[%c1_361, %c1_362, %c1_363, %c0_364, %c0_365, %c0_366] : memref<2x2x2x2x128x64xbf16, #tpu.memory_space<vmem>>, vector<1x1x1x1x128x64xbf16>
    %290 = vector.shape_cast %289 : vector<1x1x1x1x128x64xbf16> to vector<128x64xbf16>
    %cst_367 = arith.constant dense<0.000000e+00> : vector<64x64xf32>
    %291 = tpu.matmul %288, %290, %cst_367 {dimension_numbers = #tpu.dot_dimension_numbers<[1], [0], [0], [1], [0, 0, 1, 1], [], []>} : vector<64x128xbf16>, vector<128x64xbf16>, vector<64x64xf32> -> vector<64x64xf32>
    %292 = arith.addf %286, %291 : vector<64x64xf32>
    %c2_368 = arith.constant 2 : index
    %c2_369 = arith.constant 2 : index
    %c0_370 = arith.constant 0 : index
    %293 = vector.load %arg7[%c2_368, %c2_369, %c0_370] : memref<10x10x128xbf16, #tpu.memory_space<vmem>>, vector<8x8x128xbf16>
    %294 = vector.shape_cast %293 : vector<8x8x128xbf16> to vector<64x128xbf16>
    %c1_371 = arith.constant 1 : index
    %c1_372 = arith.constant 1 : index
    %c1_373 = arith.constant 1 : index
    %c1_374 = arith.constant 1 : index
    %c0_375 = arith.constant 0 : index
    %c0_376 = arith.constant 0 : index
    %295 = vector.load %arg3[%c1_371, %c1_372, %c1_373, %c1_374, %c0_375, %c0_376] : memref<2x2x2x2x128x64xbf16, #tpu.memory_space<vmem>>, vector<1x1x1x1x128x64xbf16>
    %296 = vector.shape_cast %295 : vector<1x1x1x1x128x64xbf16> to vector<128x64xbf16>
    %cst_377 = arith.constant dense<0.000000e+00> : vector<64x64xf32>
    %297 = tpu.matmul %294, %296, %cst_377 {dimension_numbers = #tpu.dot_dimension_numbers<[1], [0], [0], [1], [0, 0, 1, 1], [], []>} : vector<64x128xbf16>, vector<128x64xbf16>, vector<64x64xf32> -> vector<64x64xf32>
    %298 = arith.addf %292, %297 : vector<64x64xf32>
    %299 = vector.shape_cast %298 : vector<64x64xf32> to vector<8x8x64xf32>
    %c0_378 = arith.constant 0 : index
    %c1_379 = arith.constant 1 : index
    %c1_380 = arith.constant 1 : index
    %c0_381 = arith.constant 0 : index
    %c0_382 = arith.constant 0 : index
    %c0_383 = arith.constant 0 : index
    %300 = vector.load %arg4[%c0_378, %c1_379, %c1_380, %c0_381, %c0_382, %c0_383] : memref<1x2x2x8x8x64xf32, #tpu.memory_space<vmem>>, vector<1x1x1x8x8x64xf32>
    %301 = vector.shape_cast %300 : vector<1x1x1x8x8x64xf32> to vector<8x8x64xf32>
    %302 = vector.shape_cast %299 : vector<8x8x64xf32> to vector<1x1x1x8x8x64xf32>
    tpu.vector_store %arg4[%c0_378, %c1_379, %c1_380, %c0_381, %c0_382, %c0_383], %302 {strides = array<i32>} : memref<1x2x2x8x8x64xf32, #tpu.memory_space<vmem>>, vector<1x1x1x8x8x64xf32>,
    %cst_384 = arith.constant dense<0.000000e+00> : vector<64xf32>
    %303 = vector.multi_reduction <add>, %298, %cst_384 [0] : vector<64x64xf32> to vector<64xf32>
    %304 = vector.shape_cast %303 : vector<64xf32> to vector<1x64xf32>
    %305 = arith.addf %269, %304 : vector<1x64xf32>
    %306 = arith.mulf %298, %298 : vector<64x64xf32>
    %cst_385 = arith.constant dense<0.000000e+00> : vector<64xf32>
    %307 = vector.multi_reduction <add>, %306, %cst_385 [0] : vector<64x64xf32> to vector<64xf32>
    %308 = vector.shape_cast %307 : vector<64xf32> to vector<1x64xf32>
    %309 = arith.addf %273, %308 : vector<1x64xf32>
    %c0_386 = arith.constant 0 : index
    %c0_387 = arith.constant 0 : index
    %c0_388 = arith.constant 0 : index
    %310 = vector.load %arg5[%c0_386, %c0_387, %c0_388] : memref<1x2x64xf32, #tpu.memory_space<vmem>>, vector<1x1x64xf32>
    %311 = vector.shape_cast %310 : vector<1x1x64xf32> to vector<1x64xf32>
    %312 = vector.shape_cast %305 : vector<1x64xf32> to vector<1x1x64xf32>
    tpu.vector_store %arg5[%c0_386, %c0_387, %c0_388], %312 {strides = array<i32>} : memref<1x2x64xf32, #tpu.memory_space<vmem>>, vector<1x1x64xf32>,
    %c0_389 = arith.constant 0 : index
    %c1_390 = arith.constant 1 : index
    %c0_391 = arith.constant 0 : index
    %313 = vector.load %arg5[%c0_389, %c1_390, %c0_391] : memref<1x2x64xf32, #tpu.memory_space<vmem>>, vector<1x1x64xf32>
    %314 = vector.shape_cast %313 : vector<1x1x64xf32> to vector<1x64xf32>
    %315 = vector.shape_cast %309 : vector<1x64xf32> to vector<1x1x64xf32>
    tpu.vector_store %arg5[%c0_389, %c1_390, %c0_391], %315 {strides = array<i32>} : memref<1x2x64xf32, #tpu.memory_space<vmem>>, vector<1x1x64xf32>,
    return
  }
  func.func @transform_0(%arg0: i32) -> (i32, i32, i32, i32, i32, i32) {
    %c0_i32 = arith.constant 0 : i32
    %c0_i32_0 = arith.constant 0 : i32
    %c0_i32_1 = arith.constant 0 : i32
    %c0_i32_2 = arith.constant 0 : i32
    %c0_i32_3 = arith.constant 0 : i32
    %c0_i32_4 = arith.constant 0 : i32
    return %arg0, %c0_i32, %c0_i32_0, %c0_i32_1, %c0_i32_2, %c0_i32_3 : i32, i32, i32, i32, i32, i32
  }
  func.func @transform_1(%arg0: i32) -> (i32, i32, i32) {
    %c0_i32 = arith.constant 0 : i32
    %c0_i32_0 = arith.constant 0 : i32
    %c0_i32_1 = arith.constant 0 : i32
    %c0_i32_2 = arith.constant 0 : i32
    return %c0_i32, %c0_i32_0, %c0_i32_1 : i32, i32, i32
  }
  func.func @transform_2(%arg0: i32) -> (i32, i32, i32, i32, i32, i32) {
    %c0_i32 = arith.constant 0 : i32
    %c0_i32_0 = arith.constant 0 : i32
    %c0_i32_1 = arith.constant 0 : i32
    %c0_i32_2 = arith.constant 0 : i32
    %c0_i32_3 = arith.constant 0 : i32
    %c0_i32_4 = arith.constant 0 : i32
    %c0_i32_5 = arith.constant 0 : i32
    return %c0_i32, %c0_i32_0, %c0_i32_1, %c0_i32_2, %c0_i32_3, %c0_i32_4 : i32, i32, i32, i32, i32, i32
  }
  func.func @transform_3(%arg0: i32) -> (i32, i32, i32, i32, i32, i32) {
    %c0_i32 = arith.constant 0 : i32
    %c0_i32_0 = arith.constant 0 : i32
    %c0_i32_1 = arith.constant 0 : i32
    %c0_i32_2 = arith.constant 0 : i32
    %c0_i32_3 = arith.constant 0 : i32
    %c0_i32_4 = arith.constant 0 : i32
    return %arg0, %c0_i32, %c0_i32_0, %c0_i32_1, %c0_i32_2, %c0_i32_3 : i32, i32, i32, i32, i32, i32
  }
  func.func @transform_4(%arg0: i32) -> (i32, i32, i32) {
    %c0_i32 = arith.constant 0 : i32
    %c0_i32_0 = arith.constant 0 : i32
    %c0_i32_1 = arith.constant 0 : i32
    return %arg0, %c0_i32, %c0_i32_0 : i32, i32, i32
  }
}

</mosaic_0001>

<bundles_post_ra>
// kernel: unet_innermost_forward.1
= control target key start
LH: loop header
LB: loop body
LE: loop exit
PB: predicated region body
PF: predicated region fallthrough
CT: control target
= control target key end

     0   :  { %s10866_s15 = smov 0   ;;  %s12772_s0 = inlined_call_operand.vmem [shape: f32[2,2,2,9,9,64], index: 0, kind: input, shape index: {}]   ;;  %s12773_s1 = inlined_call_operand.vmem [shape: bf16[16,64,128], index: 1, kind: input, shape index: {}]   ;;  %s12774_s2 = inlined_call_operand.vmem [shape: bf16[2,2,2,2,128,64], index: 2, kind: input, shape index: {}]   ;;  %s12775_s3 = inlined_call_operand.vmem [shape: f32[2,2,2,8,8,64], index: 3, kind: output, shape index: {0}]   ;;  %s12776_s4 = inlined_call_operand.vmem [shape: f32[2,2,64], index: 4, kind: output, shape index: {1}]  }
   0x1 LB: > { %s8380_s16 = sadd.s32 4294967295, %s10838_s15   ;;  %p8384_p0 = scmp.ge.s32.totalorder %s10838_s15, 1  ;;  %s10838_s15 = sphi %s10866_s15, %s15_s15  }
   0x2   : > { %p165_p1 = scmp.lt.s32.totalorder %s10838_s15, 3 }
   0x4   : > { %p166_p2 = pnand %p8384_p0, %p165_p1 }
   0x5   : > { %v10592_v0 = vld [vmem:[%s12773_s1 + $0x20] sm:$0xff] (!%p166_p2)   ;;  %p195_p3 = scmp.lt.s32.totalorder (!%p166_p2), %s8380_s16, 1  ;;  %v10593_v1 = vld [vmem:[%s12773_s1 + $0x28] sm:$0xff] (!%p166_p2)   ;;  %v10594_v2 = vld [vmem:[%s12773_s1 + $0x30] sm:$0xff] (!%p166_p2)   ;;  %vm354_vm0 = vcmask (!%p166_p2), 519168   ;;  %vm1017_vm5 = vcmask (!%p166_p2), 523264  }
   0x6   : > { %169 = sbr.rel (%p166_p2) target bundleno = 1161 (0x489), region = 32  ;;  %9726 = vmatprep.subr.bf16.mxu0 (!%p166_p2), %v10592_v0  ;;  %v10595_v3 = vld [vmem:[%s12773_s1 + $0x38] sm:$0xff] (!%p166_p2)   ;;  %v10903_v15 = vld [vmem:[%s12773_s1] sm:$0xff] (!%p166_p2)   ;;  %v10599_v54 = vld [vmem:[%s12773_s1 + $0x8] sm:$0xff] (!%p166_p2)  }
   0x7   : > { %9727 = vmatpush3.bf16.msra.mxu0 (!%p166_p2), %v10592_v0 }
   0x8   : > { %9728 = vmatprep.subr.bf16.mxu0 (!%p166_p2), %v10593_v1 }
   0xb   : > { %9729 = vmatpush3.bf16.msra.mxu0 (!%p166_p2), %v10593_v1 }
   0xc   : > { %9730 = vmatprep.subr.bf16.mxu0 (!%p166_p2), %v10594_v2 }
   0xd   : > { %s12788_s16 = smov (!%p195_p3, %s8380_s16), 1 }
   0xe   : > { %s10582_s23 = smul.u32 576, %s12788_s16  ;;  %s9325_s26 = sshll.u32 %s12788_s16, 8 }
   0xf   : > { %9731 = vmatpush3.bf16.msra.mxu0 %v10594_v2  ;;  %v10601_v2 = vld [vmem:[%s12773_s1 + $0x10] sm:$0xff]   ;;  %s12516_s6 = scalar_lea.vmem %s12775_s3, %s9325_s26  ;;  %s8388_s29 = sshll.u32 %s12788_s16, 1 }
  0x10   : > { %s10892_s28 = scalar_lea.vmem %s12772_s0, %s10582_s23  ;;  %9732 = vmatprep.subr.bf16.mxu0 %v10595_v3 }
  0x11   : > { %v8407_v4 = vld [vmem:[%s10892_s28 + $0x90] sm:$0xff]  ;;  %v8409_v5 = vld [vmem:[%s10892_s28 + $0xa0] sm:$0xff] }
  0x12   : > { %v8411_v6 = vld [vmem:[%s10892_s28 + $0xb0] sm:$0xff]  ;;  %vm413_vm1 = vcmp.ge.f32.partialorder %v8407_v4, 0.0  ;;  %vm415_vm2 = vcmp.ge.f32.partialorder %v8409_v5, 0.0  ;;  %v431_v7 = vmul.f32 0.2, %v8407_v4  ;;  %v8413_v9 = vld [vmem:[%s10892_s28 + $0xc0] sm:$0xff] }
  0x13   : > { %v433_v8 = vmul.f32 0.2, %v8409_v5  ;;  %vm417_vm3 = vcmp.ge.f32.partialorder %v8411_v6, 0.0  ;;  %v435_v10 = vmul.f32 0.2, %v8411_v6  ;;  %v8415_v11 = vld [vmem:[%s10892_s28 + $0xd0] sm:$0xff]  ;;  %9733 = vmatpush3.bf16.msra.mxu0 %v10595_v3 }
  0x14   : > { %v8417_v12 = vld [vmem:[%s10892_s28 + $0xe0] sm:$0xff]  ;;  %v449_v13 = vsel %vm413_vm1, %v8407_v4, %v431_v7  ;;  %vm419_vm4 = vcmp.ge.f32.partialorder %v8413_v9, 0.0  ;;  %v437_v16 = vmul.f32 0.2, %v8413_v9  ;;  %v8419_v17 = vld [vmem:[%s10892_s28 + $0xf0] sm:$0xff]  ;;  %vm421_vm6 = vcmp.ge.f32.partialorder %v8415_v11, 0.0  ;;  %9742 = vmatprep.subr.bf16.mxu0 %v10903_v15 }
  0x15   : > { %v451_v14 = vsel %vm415_vm2, %v8409_v5, %v433_v8  ;;  %v8421_v18 = vld [vmem:[%s10892_s28 + $0x100] sm:$0xff]  ;;  %v9344_v19 = vpack.c.bf16 %v449_v13, %v449_v13  ;;  %v453_v21 = vsel %vm417_vm3, %v8411_v6, %v435_v10  ;;  %vm423_vm7 = vcmp.ge.f32.partialorder %v8417_v12, 0.0  ;;  %v212_v26 = vld [vmem:[%s10892_s28 + $0x10] sm:$0xff]  ;;  %v211_v8 = vld [vmem:[%s10892_s28 + $0x8] sm:$0x1] }
  0x16   : > { %v9346_v20 = vpack.c.bf16 %v451_v14, %v451_v14  ;;  %v210_v22 = vld [vmem:[%s10892_s28] sm:$0xff]  ;;  %v455_v23 = vsel %vm419_vm4, %v8413_v9, %v437_v16  ;;  %v9348_v24 = vpack.c.bf16 %v453_v21, %v453_v21  ;;  %v439_v25 = vmul.f32 0.2, %v8415_v11  ;;  %v216_v36 = vld [vmem:[%s10892_s28 + $0x30] sm:$0xff]  ;;  %v363_v21 = vld [vmem:[#allocation2 + $0xc] sm:$0x1] }
  0x17   : > { %540 = vst.msk [vmem:[#allocation2 + $0x48] sm:$0xf] %vm354_vm0, %v9344_v19  ;;  %v9350_v27 = vpack.c.bf16 %v455_v23, %v455_v23  ;;  %v441_v28 = vmul.f32 0.2, %v8417_v12  ;;  %vm425_vm8 = vcmp.ge.f32.partialorder %v8419_v17, 0.0  ;;  %vm427_vm9 = vcmp.ge.f32.partialorder %v8421_v18, 0.0 }
  0x18   : > { %544 = vst.msk [vmem:[#allocation2 + $0x50] sm:$0xf] %vm354_vm0, %v9346_v20  ;;  %548 = vst.msk [vmem:[#allocation2 + $0x58] sm:$0xf] %vm354_vm0, %v9348_v24  ;;  %v457_v29 = vsel %vm421_vm6, %v8415_v11, %v439_v25  ;;  %v443_v30 = vmul.f32 0.2, %v8419_v17 }
  0x19   : > { %v445_v31 = vmul.f32 0.2, %v8421_v18  ;;  %vm228_vm10 = vcmp.ge.f32.partialorder %v210_v22, 0.0  ;;  %552 = vst.msk [vmem:[#allocation2 + $0x60] sm:$0xf] %vm354_vm0, %v9350_v27  ;;  %v459_v32 = vsel %vm423_vm7, %v8417_v12, %v441_v28  ;;  %v9352_v33 = vpack.c.bf16 %v457_v29, %v457_v29  ;;  %v214_v35 = vld [vmem:[%s10892_s28 + $0x20] sm:$0xff] }
  0x1a   : > { %vm230_vm11 = vcmp.ge.f32.partialorder %v212_v26, 0.0  ;;  %v246_v34 = vmul.f32 0.2, %v210_v22  ;;  %v9354_v37 = vpack.c.bf16 %v459_v32, %v459_v32  ;;  %v461_v38 = vsel %vm425_vm8, %v8419_v17, %v443_v30  ;;  %v218_v44 = vld [vmem:[%s10892_s28 + $0x40] sm:$0xff]  ;;  %v220_v45 = vld [vmem:[%s10892_s28 + $0x50] sm:$0xff]  ;;  %v10603_v17 = vld [vmem:[%s12773_s1 + $0x18] sm:$0xff]  }
  0x1b   : > { %v463_v39 = vsel %vm427_vm9, %v8421_v18, %v445_v31  ;;  %v248_v40 = vmul.f32 0.2, %v212_v26  ;;  %556 = vst.msk [vmem:[#allocation2 + $0x68] sm:$0xf] %vm354_vm0, %v9352_v33  ;;  %v9356_v41 = vpack.c.bf16 %v461_v38, %v461_v38  ;;  %vm232_vm12 = vcmp.ge.f32.partialorder %v214_v35, 0.0  ;;  %v222_v51 = vld [vmem:[%s10892_s28 + $0x60] sm:$0xff] }
  0x1c   : > { %v9358_v42 = vpack.c.bf16 %v463_v39, %v463_v39  ;;  %v264_v43 = vsel %vm228_vm10, %v210_v22, %v246_v34  ;;  %560 = vst.msk [vmem:[#allocation2 + $0x70] sm:$0xf] %vm354_vm0, %v9354_v37  ;;  %vm234_vm13 = vcmp.ge.f32.partialorder %v216_v36, 0.0  ;;  %v250_v48 = vmul.f32 0.2, %v214_v35  ;;  %v224_v52 = vld [vmem:[%s10892_s28 + $0x70] sm:$0xff] }
  0x1d   : > { %v266_v46 = vsel %vm230_vm11, %v212_v26, %v248_v40  ;;  %v9326_v47 = vpack.c.bf16 %v264_v43, %v264_v43  ;;  %564 = vst.msk [vmem:[#allocation2 + $0x78] sm:$0xf] %vm354_vm0, %v9356_v41  ;;  %v252_v50 = vmul.f32 0.2, %v216_v36  ;;  %vm236_vm14 = vcmp.ge.f32.partialorder %v218_v44, 0.0  ;;  %v10605_v23 = vld [vmem:[%s12773_s1 + $0x40] sm:$0xff]  }
  0x1e   : > { %568 = vst.msk [vmem:[#allocation2 + $0x80] sm:$0xf] %vm354_vm0, %v9358_v42  ;;  %v9328_v49 = vpack.c.bf16 %v266_v46, %v266_v46  ;;  %vm238_vm15 = vcmp.ge.f32.partialorder %v220_v45, 0.0  ;;  %v268_v55 = vsel %vm232_vm12, %v214_v35, %v250_v48  ;;  %v254_v58 = vmul.f32 0.2, %v218_v44  ;;  %v10607_v34 = vld [vmem:[%s12773_s1 + $0x48] sm:$0xff]  }
  0x1f   : > { %v10596_v53 = vld [vmem:[#allocation2 + $0x48] ss:$8 sps:$4 sm:$0xff]   ;;  %355 = vst.msk [vmem:[#allocation2] sm:$0xf] %vm354_vm0, %v9326_v47  ;;  %v270_v56 = vsel %vm234_vm13, %v216_v36, %v252_v50  ;;  %v9330_v57 = vpack.c.bf16 %v268_v55, %v268_v55  ;;  %v256_v59 = vmul.f32 0.2, %v220_v45 }
  0x20   : > { %362 = vst.msk [vmem:[#allocation2 + $0x8] sm:$0xf] %vm354_vm0, %v9328_v49  ;;  %9734 = vmatprep.mubr.msk.bf16.mxu0 %vm1017_vm5, %v10596_v53  ;;  %v10598_v60 = vld [vmem:[#allocation2 + $0x58] ss:$8 sps:$4 sm:$0xff]   ;;  %v9332_v61 = vpack.c.bf16 %v270_v56, %v270_v56  ;;  %vm240_vm1 = vcmp.ge.f32.partialorder %v222_v51, 0.0  ;;  %vm242_vm2 = vcmp.ge.f32.partialorder %v224_v52, 0.0  ;;  %v272_v62 = vsel %vm236_vm14, %v218_v44, %v254_v58 }
  0x21   : > { %366 = vst.msk [vmem:[#allocation2 + $0x10] sm:$0xf] %vm354_vm0, %v9330_v57  ;;  %v274_v63 = vsel %vm238_vm15, %v220_v45, %v256_v59  ;;  %v258_v0 = vmul.f32 0.2, %v222_v51  ;;  %v260_v1 = vmul.f32 0.2, %v224_v52  ;;  %9735 = vmatmul.mubr.msk.bf16.vlgmr.msra.gmra.mrb[0].mxu0 %vm1017_vm5, %v10598_v60  ;;  %v9334_v3 = vpack.c.bf16 %v272_v62, %v272_v62 }
  0x22   : > { %370 = vst.msk [vmem:[#allocation2 + $0x18] sm:$0xf] %vm354_vm0, %v9332_v61  ;;  %v9336_v4 = vpack.c.bf16 %v274_v63, %v274_v63  ;;  %vm356_vm3 = vcmask 516096   ;;  %9743 = vmatpush3.bf16.msra.mxu0 %v10903_v15  ;;  %vm357_vm4 = vsmask.f32 256  ;;  %vm229_vm6 = vcmp.ge.f32.partialorder %v211_v8, 0.0 }
  0x23   : > { %v10600_v5 = vld [vmem:[#allocation2 + $0x68] ss:$8 sps:$4 sm:$0xff]   ;;  %v276_v6 = vsel %vm240_vm1, %v222_v51, %v258_v0  ;;  %v278_v7 = vsel %vm242_vm2, %v224_v52, %v260_v1  ;;  %9744 = vmatprep.subr.bf16.mxu0 %v10599_v54  ;;  %374 = vst.msk [vmem:[#allocation2 + $0x20] sm:$0xf] %vm354_vm0, %v9334_v3  ;;  %v213_v11 = vld [vmem:[%s10892_s28 + $0x18] sm:$0x1]  ;;  %vm10954_vm8 = vmand %vm356_vm3, %vm357_vm4 }
  0x24   : > { %378 = vst.msk [vmem:[#allocation2 + $0x28] sm:$0xf] %vm354_vm0, %v9336_v4  ;;  %v9338_v9 = vpack.c.bf16 %v276_v6, %v276_v6  ;;  %v9340_v10 = vpack.c.bf16 %v278_v7, %v278_v7  ;;  %9738 = vmatprep.mubr.msk.bf16.mxu0 %vm1017_vm5, %v10600_v5  ;;  %vm231_vm7 = vcmp.ge.f32.partialorder %v213_v11, 0.0  ;;  %v247_v14 = vmul.f32 0.2, %v211_v8  ;;  %v10609_v51 = vld [vmem:[%s12773_s1 + $0x50] sm:$0xff]  }
  0x25   : > { %v10602_v12 = vld [vmem:[#allocation2 + $0x78] ss:$8 sps:$4 sm:$0xff]   ;;  %v249_v15 = vmul.f32 0.2, %v213_v11  ;;  %v359_v18 = vld [vmem:[#allocation2 + $0x4] sm:$0x1] }
  0x26   : > { %382 = vst.msk [vmem:[#allocation2 + $0x30] sm:$0xf] %vm354_vm0, %v9338_v9  ;;  %386 = vst.msk [vmem:[#allocation2 + $0x38] sm:$0xf] %vm354_vm0, %v9340_v10  ;;  %9745 = vmatpush3.bf16.msra.mxu0 %v10599_v54  ;;  %v265_v19 = vsel %vm229_vm6, %v211_v8, %v247_v14  ;;  %v1216_v22 = vld [vmem:[#allocation2] sm:$0xf] }
  0x27   : > { %v10604_v13 = vld [vmem:[#allocation2] ss:$8 sps:$4 sm:$0xff]   ;;  %9746 = vmatprep.subr.bf16.mxu0 %v10601_v2  ;;  %v267_v20 = vsel %vm231_vm7, %v213_v11, %v249_v15  ;;  %v9327_v24 = vpack.c.bf16 %v265_v19, %v265_v19  ;;  %vm1232_vm9 = vsmask.f32 3328  ;;  %vm1233_vm10 = vsmask.f32 7440 }
  0x28   : > { %v9329_v25 = vpack.c.bf16 %v267_v20, %v267_v20  ;;  %v1218_v26 = vld [vmem:[#allocation2 + $0x8] sm:$0xf]  ;;  %v1236_v30 = vshrl.u32 %v1216_v22, 16  ;;  %v1239_v31 = vshll.u32 %v1216_v22, 16  ;;  %v217_v39 = vld [vmem:[%s10892_s28 + $0x38] sm:$0x1]  ;;  %vm10991_vm14 = vmor %vm1232_vm9, %vm1233_vm10 }
  0x29   : > { %9739 = vmatmul.mubr.msk.bf16.gmra.mrb[4].mxu0 %vm1017_vm5, %v10602_v12  ;;  %v10606_v27 = vld [vmem:[#allocation2 + $0x10] ss:$8 sps:$4 sm:$0xff]   ;;  %v360_v28 = vsel %vm10954_vm8, %v9327_v24, %v359_v18  ;;  %v215_v32 = vld [vmem:[%s10892_s28 + $0x28] sm:$0x1]  ;;  %v1250_v37 = vshrl.u32 %v1218_v26, 16  ;;  %v1253_v38 = vshll.u32 %v1218_v26, 16 }
  0x2a   : > { %9747 = vmatpush3.bf16.msra.mxu0 %v10601_v2  ;;  %9750 = vmatprep.mubr.msk.bf16.mxu0 %vm1017_vm5, %v10604_v13  ;;  %v364_v29 = vsel %vm10954_vm8, %v9329_v25, %v363_v21  ;;  %361 = vst [vmem:[#allocation2 + $0x4] sm:$0x1] %v360_v28  ;;  %v1238_v35 = vrot.slane %v1236_v30, 4  ;;  %v1241_v36 = vrot.slane %v1239_v31, 5  ;;  %vm233_vm11 = vcmp.ge.f32.partialorder %v215_v32, 0.0  ;;  %v10611_v8 = vld [vmem:[%s12773_s1 + $0x58] sm:$0xff]  }
  0x2b   : > { %9748 = vmatprep.subr.bf16.mxu0 %v10603_v17  ;;  %v10608_v33 = vld [vmem:[#allocation2 + $0x20] ss:$8 sps:$4 sm:$0xff]   ;;  %365 = vst [vmem:[#allocation2 + $0xc] sm:$0x1] %v364_v29  ;;  %vm235_vm12 = vcmp.ge.f32.partialorder %v217_v39, 0.0  ;;  %v1252_v43 = vrot.slane %v1250_v37, 4 }
  0x2c   : > { %v251_v40 = vmul.f32 0.2, %v215_v32  ;;  %v253_v41 = vmul.f32 0.2, %v217_v39  ;;  %v1242_v42 = vor.u32 %v1241_v36, %v1238_v35  ;;  %v1255_v44 = vrot.slane %v1253_v38, 5 }
  0x2d   : > { %v367_v45 = vld [vmem:[#allocation2 + $0x14] sm:$0x1]  ;;  %v371_v46 = vld [vmem:[#allocation2 + $0x1c] sm:$0x1]  ;;  %v1220_v49 = vld [vmem:[#allocation2 + $0x10] sm:$0xf] }
  0x2e   : > { %9749 = vmatpush3.bf16.msra.mxu0 %v10603_v17  ;;  %v269_v47 = vsel %vm233_vm11, %v215_v32, %v251_v40  ;;  %v271_v48 = vsel %vm235_vm12, %v217_v39, %v253_v41  ;;  %v1222_v50 = vld [vmem:[#allocation2 + $0x18] sm:$0xf]  ;;  %v1243_v52 = vrot.slane %v1242_v42, 4  ;;  %v1256_v53 = vor.u32 %v1255_v44, %v1252_v43  ;;  %v219_v56 = vld [vmem:[%s10892_s28 + $0x48] sm:$0x1] }
  0x2f   : > { %9758 = vmatprep.subr.bf16.mxu0 %v10605_v23  ;;  %v9331_v54 = vpack.c.bf16 %v269_v47, %v269_v47  ;;  %v9333_v55 = vpack.c.bf16 %v271_v48, %v271_v48  ;;  %v1264_v57 = vshrl.u32 %v1220_v49, 16  ;;  %v1267_v58 = vshll.u32 %v1220_v49, 16  ;;  %v221_v61 = vld [vmem:[%s10892_s28 + $0x58] sm:$0x1]  ;;  %v375_v18 = vld [vmem:[#allocation2 + $0x24] sm:$0x1] }
  0x30   : > { %v1278_v59 = vshrl.u32 %v1222_v50, 16  ;;  %v1281_v60 = vshll.u32 %v1222_v50, 16  ;;  %v1257_v0 = vrot.slane %v1256_v53, 4  ;;  %vm237_vm13 = vcmp.ge.f32.partialorder %v219_v56, 0.0  ;;  %v10610_v3 = vld [vmem:[#allocation2 + $0x30] ss:$8 sps:$4 sm:$0xff]  }
  0x31   : > { %9751 = vmatmul.mubr.msk.bf16.vlgmr.msra.gmra.mrb[0].mxu0 %vm1017_vm5, %v10606_v27  ;;  %v1217_v62 = vld [vmem:[#allocation2 + $0x4] sm:$0x1]  ;;  %v368_v1 = vsel %vm10954_vm8, %v9331_v54, %v367_v45  ;;  %v372_v2 = vsel %vm10954_vm8, %v9333_v55, %v371_v46  ;;  %v1266_v6 = vrot.slane %v1264_v57, 4  ;;  %v1269_v7 = vrot.slane %v1267_v58, 5  ;;  %v379_v19 = vld [vmem:[#allocation2 + $0x2c] sm:$0x1] }
  0x32   : > { %9759 = vmatpush3.bf16.msra.mxu0 %v10605_v23  ;;  %9754 = vmatprep.mubr.msk.bf16.mxu0 %vm1017_vm5, %v10608_v33  ;;  %v1219_v63 = vld [vmem:[#allocation2 + $0xc] sm:$0x1]  ;;  %v1245_v4 = vshll.u32 %v1217_v62, 16  ;;  %369 = vst [vmem:[#allocation2 + $0x14] sm:$0x1] %v368_v1  ;;  %v1280_v10 = vrot.slane %v1278_v59, 4 }
  0x33   : > { %9760 = vmatprep.subr.bf16.mxu0 %v10607_v34  ;;  %v1259_v5 = vshll.u32 %v1219_v63, 16  ;;  %373 = vst [vmem:[#allocation2 + $0x1c] sm:$0x1] %v372_v2  ;;  %v1283_v11 = vrot.slane %v1281_v60, 5  ;;  %vm239_vm15 = vcmp.ge.f32.partialorder %v221_v61, 0.0  ;;  %v1270_v15 = vor.u32 %v1269_v7, %v1266_v6  ;;  %v10613_v6 = vld [vmem:[%s12773_s1 + $0x68] sm:$0xff]  }
  0x34   : > { %v255_v12 = vmul.f32 0.2, %v219_v56  ;;  %v1247_v13 = vrot.slane %v1245_v4, 5  ;;  %v257_v17 = vmul.f32 0.2, %v221_v61 }
  0x35   : > { %v1261_v14 = vrot.slane %v1259_v5, 5  ;;  %v1284_v20 = vor.u32 %v1283_v11, %v1280_v10  ;;  %v1224_v22 = vld [vmem:[#allocation2 + $0x20] sm:$0xf]  ;;  %v1226_v23 = vld [vmem:[#allocation2 + $0x28] sm:$0xf]  ;;  %v1271_v26 = vrot.slane %v1270_v15, 4 }
  0x36   : > { %9761 = vmatpush3.bf16.msra.mxu0 %v10607_v34  ;;  %v273_v21 = vsel %vm237_vm13, %v219_v56, %v255_v12  ;;  %v1248_v24 = vsel %vm10991_vm14, %v1243_v52, %v1247_v13  ;;  %v275_v27 = vsel %vm239_vm15, %v221_v61, %v257_v17  ;;  %v223_v28 = vld [vmem:[%s10892_s28 + $0x68] sm:$0x1]  ;;  %v225_v33 = vld [vmem:[%s10892_s28 + $0x78] sm:$0x1]  ;;  %v10612_v34 = vld [vmem:[%s12773_s1 + $0x60] sm:$0xff]   ;;  %v1292_v35 = vshrl.u32 %v1224_v22, 16 }
  0x37   : > { %9762 = vmatprep.subr.bf16.mxu0 %v10609_v51  ;;  %v1262_v25 = vsel %vm10991_vm14, %v1257_v0, %v1261_v14  ;;  %v1285_v30 = vrot.slane %v1284_v20, 4  ;;  %v9335_v31 = vpack.c.bf16 %v273_v21, %v273_v21  ;;  %v9337_v32 = vpack.c.bf16 %v275_v27, %v275_v27  ;;  %v1228_v47 = vld [vmem:[#allocation2 + $0x30] sm:$0xf]  ;;  %v383_v52 = vld [vmem:[#allocation2 + $0x34] sm:$0x1] }
  0x38   : > { %v8555_v29 = vcombine.low %v1248_v24, %v1262_v25  ;;  %v1295_v36 = vshll.u32 %v1224_v22, 16  ;;  %v1306_v37 = vshrl.u32 %v1226_v23, 16  ;;  %v1309_v38 = vshll.u32 %v1226_v23, 16  ;;  %v387_v56 = vld [vmem:[#allocation2 + $0x3c] sm:$0x1]  ;;  %v10614_v22 = vld [vmem:[%s12773_s1 + $0x70] sm:$0xff]  }
  0x39   : > { %9755 = vmatmul.mubr.msk.bf16.gmra.mrb[4].mxu0 %vm1017_vm5, %v10610_v3  ;;  %v1221_v39 = vld [vmem:[#allocation2 + $0x14] sm:$0x1]  ;;  %v376_v41 = vsel %vm10954_vm8, %v9335_v31, %v375_v18  ;;  %v380_v42 = vsel %vm10954_vm8, %v9337_v32, %v379_v19  ;;  %vm241_vm1 = vcmp.ge.f32.partialorder %v223_v28, 0.0  ;;  %vm243_vm2 = vcmp.ge.f32.partialorder %v225_v33, 0.0  ;;  %v1230_v57 = vld [vmem:[#allocation2 + $0x38] sm:$0xf] }
  0x3a   : > { %9763 = vmatpush3.bf16.msra.mxu0 %v10609_v51  ;;  %9766 = vmatprep.mubr.msk.bf16.mxu0 %vm1017_vm5, %v8555_v29  ;;  %v1223_v40 = vld [vmem:[#allocation2 + $0x1c] sm:$0x1]  ;;  %v1273_v43 = vshll.u32 %v1221_v39, 16  ;;  %377 = vst [vmem:[#allocation2 + $0x24] sm:$0x1] %v376_v41  ;;  %v1294_v45 = vrot.slane %v1292_v35, 4 }
  0x3b   : > { %9764 = vmatprep.subr.bf16.mxu0 %v10611_v8  ;;  %v1287_v44 = vshll.u32 %v1223_v40, 16  ;;  %381 = vst [vmem:[#allocation2 + $0x2c] sm:$0x1] %v380_v42  ;;  %v1297_v46 = vrot.slane %v1295_v36, 5  ;;  %v1308_v48 = vrot.slane %v1306_v37, 4  ;;  %v1311_v49 = vrot.slane %v1309_v38, 5 }
  0x3c   : > { %v259_v50 = vmul.f32 0.2, %v223_v28  ;;  %v261_v51 = vmul.f32 0.2, %v225_v33  ;;  %v1275_v53 = vrot.slane %v1273_v43, 5  ;;  %v1320_v58 = vshrl.u32 %v1228_v47, 16 }
  0x3d   : > { %v1289_v54 = vrot.slane %v1287_v44, 5  ;;  %v1298_v55 = vor.u32 %v1297_v46, %v1294_v45  ;;  %v1312_v59 = vor.u32 %v1311_v49, %v1308_v48  ;;  %v1323_v62 = vshll.u32 %v1228_v47, 16  ;;  %v8408_v3 = vld [vmem:[%s10892_s28 + $0x98] sm:$0x1]  ;;  %v8410_v4 = vld [vmem:[%s10892_s28 + $0xa8] sm:$0x1] }
  0x3e   : > { %9765 = vmatpush3.bf16.msra.mxu0 %v10611_v8  ;;  %v277_v60 = vsel %vm241_vm1, %v223_v28, %v259_v50  ;;  %v279_v61 = vsel %vm243_vm2, %v225_v33, %v261_v51  ;;  %v1276_v63 = vsel %vm10991_vm14, %v1271_v26, %v1275_v53  ;;  %v1322_v10 = vrot.slane %v1320_v58, 4  ;;  %v1477_v15 = vld [vmem:[#allocation2 + $0x48] sm:$0xf]  ;;  %v1479_v25 = vld [vmem:[#allocation2 + $0x50] sm:$0xf]  ;;  %v10615_v48 = vld [vmem:[%s12773_s1 + $0x78] sm:$0xff]  }
  0x3f   : > { %9774 = vmatprep.subr.bf16.mxu0 %v10612_v34  ;;  %v1290_v0 = vsel %vm10991_vm14, %v1285_v30, %v1289_v54  ;;  %v1299_v1 = vrot.slane %v1298_v55, 4  ;;  %v9339_v2 = vpack.c.bf16 %v277_v60, %v277_v60  ;;  %v1313_v7 = vrot.slane %v1312_v59, 4  ;;  %v541_v29 = vld [vmem:[#allocation2 + $0x4c] sm:$0x1]  ;;  %v545_v30 = vld [vmem:[#allocation2 + $0x54] sm:$0x1] }
  0x40   : > { %v8556_v5 = vcombine.low %v1276_v63, %v1290_v0  ;;  %v9341_v8 = vpack.c.bf16 %v279_v61, %v279_v61  ;;  %v1325_v12 = vrot.slane %v1323_v62, 5  ;;  %v1334_v13 = vshrl.u32 %v1230_v57, 16  ;;  %v8412_v40 = vld [vmem:[%s10892_s28 + $0xb8] sm:$0x1]  ;;  %v8414_v45 = vld [vmem:[%s10892_s28 + $0xc8] sm:$0x1] }
  0x41   : > { %v384_v11 = vsel %vm10954_vm8, %v9339_v2, %v383_v52  ;;  %v1337_v14 = vshll.u32 %v1230_v57, 16  ;;  %v1225_v17 = vld [vmem:[#allocation2 + $0x24] sm:$0x1]  ;;  %vm414_vm6 = vcmp.ge.f32.partialorder %v8408_v3, 0.0  ;;  %vm416_vm7 = vcmp.ge.f32.partialorder %v8410_v4, 0.0 }
  0x42   : > { %9767 = vmatmul.mubr.msk.bf16.vlgmr.msra.gmra.mrb[0].mxu0 %vm1017_vm5, %v8556_v5  ;;  %v1227_v18 = vld [vmem:[#allocation2 + $0x2c] sm:$0x1]  ;;  %385 = vst [vmem:[#allocation2 + $0x34] sm:$0x1] %v384_v11  ;;  %v388_v19 = vsel %vm10954_vm8, %v9341_v8, %v387_v56  ;;  %v1301_v20 = vshll.u32 %v1225_v17, 16  ;;  %v1326_v23 = vor.u32 %v1325_v12, %v1322_v10  ;;  %v1336_v24 = vrot.slane %v1334_v13, 4 }
  0x43   : > { %9775 = vmatpush3.bf16.msra.mxu0 %v10612_v34  ;;  %v1315_v21 = vshll.u32 %v1227_v18, 16  ;;  %389 = vst [vmem:[#allocation2 + $0x3c] sm:$0x1] %v388_v19  ;;  %v1339_v26 = vrot.slane %v1337_v14, 5  ;;  %v432_v27 = vmul.f32 0.2, %v8408_v3 }
  0x44   : > { %9776 = vmatprep.subr.bf16.mxu0 %v10613_v6  ;;  %v434_v28 = vmul.f32 0.2, %v8410_v4  ;;  %v1494_v31 = vshrl.u32 %v1477_v15, 16  ;;  %v1303_v32 = vrot.slane %v1301_v20, 5  ;;  %v11031_v34 = vrot.slane %v1326_v23, 4  ;;  %v11052_v60 = vld [vmem:[%s12773_s1 + $0x80] sm:$0xff]  }
  0x45   : > { %v1317_v33 = vrot.slane %v1315_v21, 5  ;;  %v1497_v35 = vshll.u32 %v1477_v15, 16  ;;  %v1340_v36 = vor.u32 %v1339_v26, %v1336_v24  ;;  %v450_v37 = vsel %vm414_vm6, %v8408_v3, %v432_v27  ;;  %v1481_v55 = vld [vmem:[#allocation2 + $0x58] sm:$0xf]  ;;  %v1483_v61 = vld [vmem:[#allocation2 + $0x60] sm:$0xf] }
  0x46   : > { %v452_v38 = vsel %vm416_vm7, %v8410_v4, %v434_v28  ;;  %v1496_v39 = vrot.slane %v1494_v31, 4  ;;  %v1304_v41 = vsel %vm10991_vm14, %v1299_v1, %v1303_v32  ;;  %v9345_v43 = vpack.c.bf16 %v450_v37, %v450_v37  ;;  %v549_v2 = vld [vmem:[#allocation2 + $0x5c] sm:$0x1]  ;;  %v553_v12 = vld [vmem:[#allocation2 + $0x64] sm:$0x1] }
  0x47   : > { %9777 = vmatpush3.bf16.msra.mxu0 %v10613_v6  ;;  %v1318_v42 = vsel %vm10991_vm14, %v1313_v7, %v1317_v33  ;;  %v9347_v44 = vpack.c.bf16 %v452_v38, %v452_v38  ;;  %v1341_v47 = vrot.slane %v1340_v36, 4  ;;  %v1499_v49 = vrot.slane %v1497_v35, 5  ;;  %v8416_v18 = vld [vmem:[%s10892_s28 + $0xd8] sm:$0x1]  ;;  %v8418_v23 = vld [vmem:[%s10892_s28 + $0xe8] sm:$0x1] }
  0x48   : > { %v8557_v46 = vcombine.low %v1304_v41, %v1318_v42  ;;  %9778 = vmatprep.subr.bf16.mxu0 %v10614_v22  ;;  %v1508_v50 = vshrl.u32 %v1479_v25, 16  ;;  %v542_v52 = vsel %vm10954_vm8, %v9345_v43, %v541_v29  ;;  %v1511_v54 = vshll.u32 %v1479_v25, 16  ;;  %v1485_v28 = vld [vmem:[#allocation2 + $0x68] sm:$0xf]  ;;  %v1487_v29 = vld [vmem:[#allocation2 + $0x70] sm:$0xf] }
  0x49   : > { %v1229_v51 = vld [vmem:[#allocation2 + $0x34] sm:$0x1]  ;;  %v546_v53 = vsel %vm10954_vm8, %v9347_v44, %v545_v30  ;;  %vm418_vm9 = vcmp.ge.f32.partialorder %v8412_v40, 0.0  ;;  %543 = vst [vmem:[#allocation2 + $0x4c] sm:$0x1] %v542_v52  ;;  %v1500_v58 = vor.u32 %v1499_v49, %v1496_v39  ;;  %vm420_vm10 = vcmp.ge.f32.partialorder %v8414_v45, 0.0 }
  0x4a   : > { %9770 = vmatprep.mubr.msk.bf16.mxu0 %vm1017_vm5, %v8557_v46  ;;  %v1231_v56 = vld [vmem:[#allocation2 + $0x3c] sm:$0x1]  ;;  %v1329_v57 = vshll.u32 %v1229_v51, 16  ;;  %547 = vst [vmem:[#allocation2 + $0x54] sm:$0x1] %v546_v53  ;;  %v1510_v59 = vrot.slane %v1508_v50, 4 }
  0x4b   : > { %v1343_v62 = vshll.u32 %v1231_v56, 16  ;;  %9779 = vmatpush3.bf16.msra.mxu0 %v10614_v22  ;;  %v1513_v63 = vrot.slane %v1511_v54, 5  ;;  %v436_v0 = vmul.f32 0.2, %v8412_v40  ;;  %v438_v1 = vmul.f32 0.2, %v8414_v45 }
  0x4c   : > { %v1331_v3 = vrot.slane %v1329_v57, 5  ;;  %9780 = vmatprep.subr.bf16.mxu0 %v10615_v48  ;;  %v1501_v4 = vrot.slane %v1500_v58, 4  ;;  %v1522_v5 = vshrl.u32 %v1481_v55, 16  ;;  %v1525_v6 = vshll.u32 %v1481_v55, 16  ;;  %v8420_v50 = vld [vmem:[%s10892_s28 + $0xf8] sm:$0x1] }
  0x4d   : > { %v1345_v7 = vrot.slane %v1343_v62, 5  ;;  %v1514_v8 = vor.u32 %v1513_v63, %v1510_v59  ;;  %v454_v10 = vsel %vm418_vm9, %v8412_v40, %v436_v0  ;;  %v456_v11 = vsel %vm420_vm10, %v8414_v45, %v438_v1  ;;  %v561_v55 = vld [vmem:[#allocation2 + $0x74] sm:$0x1]  ;;  %v1489_v62 = vld [vmem:[#allocation2 + $0x78] sm:$0xf] }
  0x4e   : > { %v1332_v13 = vsel %vm10991_vm14, %v11031_v34, %v1331_v3  ;;  %v9349_v14 = vpack.c.bf16 %v454_v10, %v454_v10  ;;  %v9351_v15 = vpack.c.bf16 %v456_v11, %v456_v11  ;;  %v1524_v17 = vrot.slane %v1522_v5, 4  ;;  %v565_v11 = vld [vmem:[#allocation2 + $0x7c] sm:$0x1] }
  0x4f   : > { %v1346_v19 = vsel %vm10991_vm14, %v1341_v47, %v1345_v7  ;;  %9781 = vmatpush3.bf16.msra.mxu0 %v10615_v48  ;;  %v1515_v20 = vrot.slane %v1514_v8, 4  ;;  %v1527_v21 = vrot.slane %v1525_v6, 5  ;;  %v1536_v22 = vshrl.u32 %v1483_v61, 16  ;;  %v557_v47 = vld [vmem:[#allocation2 + $0x6c] sm:$0x1] }
  0x50   : > { %v8558_v24 = vcombine.low %v1332_v13, %v1346_v19  ;;  %9790 = vmatprep.subr.bf16.mxu0 %v11052_v60  ;;  %v550_v25 = vsel %vm10954_vm8, %v9349_v14, %v549_v2  ;;  %v554_v26 = vsel %vm10954_vm8, %v9351_v15, %v553_v12  ;;  %v1539_v27 = vshll.u32 %v1483_v61, 16  ;;  %v1478_v30 = vld [vmem:[#allocation2 + $0x4c] sm:$0x1]  ;;  %v8422_v61 = vld [vmem:[%s10892_s28 + $0x108] sm:$0x1]  ;;  %v8443_v19 = vld [vmem:[%s10892_s28 + $0x120] sm:$0xff] }
  0x51   : > { %v1480_v31 = vld [vmem:[#allocation2 + $0x54] sm:$0x1]  ;;  %551 = vst [vmem:[#allocation2 + $0x5c] sm:$0x1] %v550_v25  ;;  %555 = vst [vmem:[#allocation2 + $0x64] sm:$0x1] %v554_v26  ;;  %v1528_v32 = vor.u32 %v1527_v21, %v1524_v17 }
  0x52   : > { %v1538_v33 = vrot.slane %v1536_v22, 4  ;;  %vm422_vm11 = vcmp.ge.f32.partialorder %v8416_v18, 0.0  ;;  %9771 = vmatmul.mubr.msk.bf16.gmra.mrb[4].mxu0 %vm1017_vm5, %v8558_v24  ;;  %v1503_v34 = vshll.u32 %v1478_v30, 16  ;;  %v1517_v35 = vshll.u32 %v1480_v31, 16  ;;  %v569_v12 = vld [vmem:[#allocation2 + $0x84] sm:$0x1] }
  0x53   : > { %v1541_v36 = vrot.slane %v1539_v27, 5  ;;  %vm424_vm12 = vcmp.ge.f32.partialorder %v8418_v23, 0.0  ;;  %v1529_v37 = vrot.slane %v1528_v32, 4  ;;  %v440_v38 = vmul.f32 0.2, %v8416_v18  ;;  %v10617_v21 = vld [vmem:[%s12773_s1 + $0x88] sm:$0xff]  }
  0x54   : > { %v442_v39 = vmul.f32 0.2, %v8418_v23  ;;  %v1550_v40 = vshrl.u32 %v1485_v28, 16  ;;  %v1505_v41 = vrot.slane %v1503_v34, 5  ;;  %v1519_v42 = vrot.slane %v1517_v35, 5  ;;  %v8447_v26 = vld [vmem:[%s10892_s28 + $0x140] sm:$0xff] }
  0x55   : > { %v1542_v43 = vor.u32 %v1541_v36, %v1538_v33  ;;  %v1553_v44 = vshll.u32 %v1485_v28, 16  ;;  %v458_v45 = vsel %vm422_vm11, %v8416_v18, %v440_v38  ;;  %v1564_v49 = vshrl.u32 %v1487_v29, 16  ;;  %v1491_v13 = vld [vmem:[#allocation2 + $0x80] sm:$0xf]  ;;  %v8449_v35 = vld [vmem:[%s10892_s28 + $0x150] sm:$0xff] }
  0x56   : > { %v460_v46 = vsel %vm424_vm12, %v8418_v23, %v442_v39  ;;  %v1552_v48 = vrot.slane %v1550_v40, 4  ;;  %v1506_v51 = vsel %vm10991_vm14, %v1501_v4, %v1505_v41  ;;  %v1520_v52 = vsel %vm10991_vm14, %v1515_v20, %v1519_v42  ;;  %v8445_v20 = vld [vmem:[%s10892_s28 + $0x130] sm:$0xff] }
  0x57   : > { %v1543_v53 = vrot.slane %v1542_v43, 4  ;;  %v9353_v54 = vpack.c.bf16 %v458_v45, %v458_v45  ;;  %v8575_v56 = vcombine.low %v1506_v51, %v1520_v52  ;;  %v9355_v57 = vpack.c.bf16 %v460_v46, %v460_v46  ;;  %v10618_v41 = vld [vmem:[%s12773_s1 + $0x90] sm:$0xff]  }
  0x58   : > { %v1555_v58 = vrot.slane %v1553_v44, 5  ;;  %v1566_v59 = vrot.slane %v1564_v49, 4  ;;  %v1482_v63 = vld [vmem:[#allocation2 + $0x5c] sm:$0x1]  ;;  %v1484_v0 = vld [vmem:[#allocation2 + $0x64] sm:$0x1] }
  0x59   : > { %v558_v1 = vsel %vm10954_vm8, %v9353_v54, %v557_v47  ;;  %v1567_v2 = vshll.u32 %v1487_v29, 16  ;;  %vm426_vm13 = vcmp.ge.f32.partialorder %v8420_v50, 0.0  ;;  %9782 = vmatprep.mubr.msk.bf16.mxu0 %vm1017_vm5, %v8575_v56  ;;  %v1531_v3 = vshll.u32 %v1482_v63, 16  ;;  %v8451_v44 = vld [vmem:[%s10892_s28 + $0x160] sm:$0xff]  ;;  %v8453_v56 = vld [vmem:[%s10892_s28 + $0x170] sm:$0xff] }
  0x5a   : > { %v1545_v4 = vshll.u32 %v1484_v0, 16  ;;  %559 = vst [vmem:[#allocation2 + $0x6c] sm:$0x1] %v558_v1  ;;  %v562_v5 = vsel %vm10954_vm8, %v9355_v57, %v561_v55  ;;  %v1556_v6 = vor.u32 %v1555_v58, %v1552_v48  ;;  %vm428_vm15 = vcmp.ge.f32.partialorder %v8422_v61, 0.0 }
  0x5b   : > { %563 = vst [vmem:[#allocation2 + $0x74] sm:$0x1] %v562_v5  ;;  %v1569_v7 = vrot.slane %v1567_v2, 5  ;;  %v444_v8 = vmul.f32 0.2, %v8420_v50  ;;  %v1533_v14 = vrot.slane %v1531_v3, 5 }
  0x5c   : > { %v446_v10 = vmul.f32 0.2, %v8422_v61  ;;  %v1547_v15 = vrot.slane %v1545_v4, 5  ;;  %v11080_v17 = vrot.slane %v1556_v6, 4  ;;  %v1578_v18 = vshrl.u32 %v1489_v62, 16  ;;  %v10619_v2 = vld [vmem:[%s12773_s1 + $0x98] sm:$0xff]  }
  0x5d   : > { %v1570_v22 = vor.u32 %v1569_v7, %v1566_v59  ;;  %v462_v23 = vsel %vm426_vm13, %v8420_v50, %v444_v8  ;;  %v1581_v25 = vshll.u32 %v1489_v62, 16  ;;  %v1534_v27 = vsel %vm10991_vm14, %v1529_v37, %v1533_v14  ;;  %v8457_v5 = vld [vmem:[%s10892_s28 + $0x190] sm:$0xff] }
  0x5e   : > { %v464_v24 = vsel %vm428_vm15, %v8422_v61, %v446_v10  ;;  %v1548_v28 = vsel %vm10991_vm14, %v1543_v53, %v1547_v15  ;;  %v9357_v29 = vpack.c.bf16 %v462_v23, %v462_v23  ;;  %v1580_v33 = vrot.slane %v1578_v18, 4  ;;  %v8455_v61 = vld [vmem:[%s10892_s28 + $0x180] sm:$0xff] }
  0x5f   : > { %v9359_v30 = vpack.c.bf16 %v464_v24, %v464_v24  ;;  %v8576_v31 = vcombine.low %v1534_v27, %v1548_v28  ;;  %v1571_v32 = vrot.slane %v1570_v22, 4  ;;  %v1583_v34 = vrot.slane %v1581_v25, 5  ;;  %v11127_v18 = vld [vmem:[%s12773_s1 + $0xa0] sm:$0xff]   ;;  %v8483_v27 = vld [vmem:[%s10892_s28 + $0x1d0] sm:$0xff] }
  0x60   : > { %v566_v36 = vsel %vm10954_vm8, %v9357_v29, %v565_v11  ;;  %v1592_v39 = vshrl.u32 %v1491_v13, 16  ;;  %v1595_v40 = vshll.u32 %v1491_v13, 16  ;;  %vm595_vm1 = vcmp.ge.f32.partialorder %v8443_v19, 0.0 }
  0x61   : > { %v570_v38 = vsel %vm10954_vm8, %v9359_v30, %v569_v12  ;;  %9783 = vmatmul.mubr.msk.bf16.vlgmr.msra.gmra.mrb[0].mxu0 %vm1017_vm5, %v8576_v31  ;;  %v1486_v37 = vld [vmem:[#allocation2 + $0x6c] sm:$0x1]  ;;  %567 = vst [vmem:[#allocation2 + $0x7c] sm:$0x1] %v566_v36  ;;  %v1584_v42 = vor.u32 %v1583_v34, %v1580_v33  ;;  %vm597_vm2 = vcmp.ge.f32.partialorder %v8445_v20, 0.0  ;;  %vm599_vm6 = vcmp.ge.f32.partialorder %v8447_v26, 0.0 }
  0x62   : > { %571 = vst [vmem:[#allocation2 + $0x84] sm:$0x1] %v570_v38  ;;  %v613_v43 = vmul.f32 0.2, %v8443_v19  ;;  %9791 = vmatpush3.bf16.msra.mxu0 %v11052_v60  ;;  %v1488_v45 = vld [vmem:[#allocation2 + $0x74] sm:$0x1] }
  0x63   : > { %v1559_v46 = vshll.u32 %v1486_v37, 16  ;;  %v1594_v47 = vrot.slane %v1592_v39, 4  ;;  %v1597_v48 = vrot.slane %v1595_v40, 5  ;;  %9792 = vmatprep.subr.bf16.mxu0 %v10617_v21  ;;  %v1573_v49 = vshll.u32 %v1488_v45, 16  ;;  %v8485_v31 = vld [vmem:[%s10892_s28 + $0x1e0] sm:$0xff]  ;;  %v8487_v36 = vld [vmem:[%s10892_s28 + $0x1f0] sm:$0xff] }
  0x64   : > { %v11104_v50 = vrot.slane %v1584_v42, 4  ;;  %v615_v51 = vmul.f32 0.2, %v8445_v20  ;;  %v631_v52 = vsel %vm595_vm1, %v8443_v19, %v613_v43  ;;  %vm601_vm7 = vcmp.ge.f32.partialorder %v8449_v35, 0.0  ;;  %v8489_v37 = vld [vmem:[%s10892_s28 + $0x200] sm:$0xff] }
  0x65   : > { %v1561_v53 = vrot.slane %v1559_v46, 5  ;;  %v1598_v54 = vor.u32 %v1597_v48, %v1594_v47  ;;  %v9362_v55 = vpack.c.bf16 %v631_v52, %v631_v52  ;;  %v1575_v57 = vrot.slane %v1573_v49, 5  ;;  %v8491_v46 = vld [vmem:[%s10892_s28 + $0x210] sm:$0xff]  ;;  %v8493_v49 = vld [vmem:[%s10892_s28 + $0x220] sm:$0xff] }
  0x66   : > { %v633_v60 = vsel %vm597_vm2, %v8445_v20, %v615_v51  ;;  %v617_v58 = vmul.f32 0.2, %v8447_v26  ;;  %v619_v59 = vmul.f32 0.2, %v8449_v35  ;;  %9793 = vmatpush3.bf16.msra.mxu0 %v10617_v21  ;;  %vm603_vm9 = vcmp.ge.f32.partialorder %v8451_v44, 0.0 }
  0x67   : > { %v1562_v62 = vsel %vm10991_vm14, %v11080_v17, %v1561_v53  ;;  %v1599_v63 = vrot.slane %v1598_v54, 4  ;;  %v9364_v0 = vpack.c.bf16 %v633_v60, %v633_v60  ;;  %722 = vst.msk [vmem:[#allocation2 + $0x90] sm:$0xf] %vm354_vm0, %v9362_v55  ;;  %v1576_v1 = vsel %vm10991_vm14, %v1571_v32, %v1575_v57  ;;  %9794 = vmatprep.subr.bf16.mxu0 %v10618_v41  ;;  %v8479_v17 = vld [vmem:[%s10892_s28 + $0x1b0] sm:$0xff]  ;;  %v8444_v53 = vld [vmem:[%s10892_s28 + $0x128] sm:$0x1] }
  0x68   : > { %v635_v3 = vsel %vm599_vm6, %v8447_v26, %v617_v58  ;;  %v637_v4 = vsel %vm601_vm7, %v8449_v35, %v619_v59  ;;  %vm605_vm10 = vcmp.ge.f32.partialorder %v8453_v56, 0.0  ;;  %v8577_v6 = vcombine.low %v1562_v62, %v1576_v1  ;;  %v1490_v7 = vld [vmem:[#allocation2 + $0x7c] sm:$0x1]  ;;  %v8481_v26 = vld [vmem:[%s10892_s28 + $0x1c0] sm:$0xff]  ;;  %v8446_v54 = vld [vmem:[%s10892_s28 + $0x138] sm:$0x1] }
  0x69   : > { %v1492_v8 = vld [vmem:[#allocation2 + $0x84] sm:$0x1]  ;;  %726 = vst.msk [vmem:[#allocation2 + $0x98] sm:$0xf] %vm354_vm0, %v9364_v0  ;;  %v9366_v10 = vpack.c.bf16 %v635_v3, %v635_v3  ;;  %v9368_v11 = vpack.c.bf16 %v637_v4, %v637_v4  ;;  %v621_v12 = vmul.f32 0.2, %v8451_v44 }
  0x6a   : > { %v1587_v13 = vshll.u32 %v1490_v7, 16  ;;  %v1601_v14 = vshll.u32 %v1492_v8, 16  ;;  %v623_v15 = vmul.f32 0.2, %v8453_v56  ;;  %vm607_vm11 = vcmp.ge.f32.partialorder %v8455_v61, 0.0  ;;  %9786 = vmatprep.mubr.msk.bf16.mxu0 %vm1017_vm5, %v8577_v6  ;;  %9795 = vmatpush3.bf16.msra.mxu0 %v10618_v41  ;;  %v10623_v59 = vld [vmem:[%s12773_s1 + $0xa8] sm:$0xff]  }
  0x6b   : > { %730 = vst.msk [vmem:[#allocation2 + $0xa0] sm:$0xf] %vm354_vm0, %v9366_v10  ;;  %734 = vst.msk [vmem:[#allocation2 + $0xa8] sm:$0xf] %vm354_vm0, %v9368_v11  ;;  %v639_v19 = vsel %vm603_vm9, %v8451_v44, %v621_v12  ;;  %vm609_vm12 = vcmp.ge.f32.partialorder %v8457_v5, 0.0  ;;  %9796 = vmatprep.subr.bf16.mxu0 %v10619_v2  ;;  %vm777_vm13 = vcmp.ge.f32.partialorder %v8479_v17, 0.0 }
  0x6c   : > { %v625_v20 = vmul.f32 0.2, %v8455_v61  ;;  %v627_v21 = vmul.f32 0.2, %v8457_v5  ;;  %v1589_v22 = vrot.slane %v1587_v13, 5  ;;  %v1603_v23 = vrot.slane %v1601_v14, 5 }
  0x6d   : > { %v641_v24 = vsel %vm605_vm10, %v8453_v56, %v623_v15  ;;  %v9370_v25 = vpack.c.bf16 %v639_v19, %v639_v19  ;;  %vm779_vm15 = vcmp.ge.f32.partialorder %v8481_v26, 0.0  ;;  %v795_v39 = vmul.f32 0.2, %v8479_v17  ;;  %v723_v13 = vld [vmem:[#allocation2 + $0x94] sm:$0x1] }
  0x6e   : > { %v9372_v28 = vpack.c.bf16 %v641_v24, %v641_v24  ;;  %v643_v29 = vsel %vm607_vm11, %v8455_v61, %v625_v20  ;;  %v645_v30 = vsel %vm609_vm12, %v8457_v5, %v627_v21  ;;  %v1590_v32 = vsel %vm10991_vm14, %v11104_v50, %v1589_v22  ;;  %9797 = vmatpush3.bf16.msra.mxu0 %v10619_v2  ;;  %v2027_v58 = vld [vmem:[#allocation2 + $0x90] sm:$0xf]  ;;  %v727_v14 = vld [vmem:[#allocation2 + $0x9c] sm:$0x1] }
  0x6f   : > { %v1604_v33 = vsel %vm10991_vm14, %v1599_v63, %v1603_v23  ;;  %738 = vst.msk [vmem:[#allocation2 + $0xb0] sm:$0xf] %vm354_vm0, %v9370_v25  ;;  %v9374_v34 = vpack.c.bf16 %v643_v29, %v643_v29  ;;  %v9376_v35 = vpack.c.bf16 %v645_v30, %v645_v30  ;;  %v797_v40 = vmul.f32 0.2, %v8481_v26  ;;  %9806 = vmatprep.subr.bf16.mxu0 %v11127_v18  ;;  %v10625_v19 = vld [vmem:[%s12773_s1 + $0xb0] sm:$0xff]   ;;  %v10627_v29 = vld [vmem:[%s12773_s1 + $0xb8] sm:$0xff]  }
  0x70   : > { %v8578_v38 = vcombine.low %v1590_v32, %v1604_v33  ;;  %742 = vst.msk [vmem:[#allocation2 + $0xb8] sm:$0xf] %vm354_vm0, %v9372_v28  ;;  %v10620_v41 = vld [vmem:[#allocation2 + $0x90] ss:$8 sps:$4 sm:$0xff]   ;;  %vm781_vm1 = vcmp.ge.f32.partialorder %v8483_v27, 0.0  ;;  %vm783_vm2 = vcmp.ge.f32.partialorder %v8485_v31, 0.0  ;;  %v813_v42 = vsel %vm777_vm13, %v8479_v17, %v795_v39 }
  0x71   : > { %746 = vst.msk [vmem:[#allocation2 + $0xc0] sm:$0xf] %vm354_vm0, %v9374_v34  ;;  %750 = vst.msk [vmem:[#allocation2 + $0xc8] sm:$0xf] %vm354_vm0, %v9376_v35  ;;  %v815_v43 = vsel %vm779_vm15, %v8481_v26, %v797_v40  ;;  %v799_v44 = vmul.f32 0.2, %v8483_v27  ;;  %v9380_v47 = vpack.c.bf16 %v813_v42, %v813_v42 }
  0x72   : > { %9787 = vmatmul.mubr.msk.bf16.gmra.mrb[4].mxu0 %vm1017_vm5, %v8578_v38  ;;  %v801_v45 = vmul.f32 0.2, %v8485_v31  ;;  %v9382_v48 = vpack.c.bf16 %v815_v43, %v815_v43  ;;  %v10622_v50 = vld [vmem:[#allocation2 + $0xa0] ss:$8 sps:$4 sm:$0xff]   ;;  %vm785_vm6 = vcmp.ge.f32.partialorder %v8487_v36, 0.0  ;;  %vm787_vm7 = vcmp.ge.f32.partialorder %v8489_v37, 0.0 }
  0x73   : > { %9798 = vmatprep.mubr.msk.bf16.mxu0 %vm1017_vm5, %v10620_v41  ;;  %v817_v51 = vsel %vm781_vm1, %v8483_v27, %v799_v44  ;;  %904 = vst.msk [vmem:[#allocation2 + $0xd8] sm:$0xf] %vm354_vm0, %v9380_v47  ;;  %v803_v57 = vmul.f32 0.2, %v8487_v36  ;;  %v805_v60 = vmul.f32 0.2, %v8489_v37 }
  0x74   : > { %v819_v52 = vsel %vm783_vm2, %v8485_v31, %v801_v45  ;;  %908 = vst.msk [vmem:[#allocation2 + $0xe0] sm:$0xf] %vm354_vm0, %v9382_v48  ;;  %v9384_v55 = vpack.c.bf16 %v817_v51, %v817_v51  ;;  %vm789_vm9 = vcmp.ge.f32.partialorder %v8491_v46, 0.0  ;;  %vm791_vm10 = vcmp.ge.f32.partialorder %v8493_v49, 0.0  ;;  %v2029_v5 = vld [vmem:[#allocation2 + $0x98] sm:$0xf] }
  0x75   : > { %v9386_v56 = vpack.c.bf16 %v819_v52, %v819_v52  ;;  %v807_v61 = vmul.f32 0.2, %v8491_v46  ;;  %v821_v63 = vsel %vm785_vm6, %v8487_v36, %v803_v57  ;;  %v823_v0 = vsel %vm787_vm7, %v8489_v37, %v805_v60  ;;  %v8448_v27 = vld [vmem:[%s10892_s28 + $0x148] sm:$0x1]  ;;  %v8450_v28 = vld [vmem:[%s10892_s28 + $0x158] sm:$0x1] }
  0x76   : > { %912 = vst.msk [vmem:[#allocation2 + $0xe8] sm:$0xf] %vm354_vm0, %v9384_v55  ;;  %v809_v1 = vmul.f32 0.2, %v8493_v49  ;;  %v9388_v2 = vpack.c.bf16 %v821_v63, %v821_v63  ;;  %v9390_v3 = vpack.c.bf16 %v823_v0, %v823_v0  ;;  %vm596_vm11 = vcmp.ge.f32.partialorder %v8444_v53, 0.0  ;;  %v10629_v45 = vld [vmem:[%s12773_s1 + $0xc0] sm:$0xff]  }
  0x77   : > { %v10624_v62 = vld [vmem:[#allocation2 + $0xb0] ss:$8 sps:$4 sm:$0xff]   ;;  %916 = vst.msk [vmem:[#allocation2 + $0xf0] sm:$0xf] %vm354_vm0, %v9386_v56  ;;  %v825_v4 = vsel %vm789_vm9, %v8491_v46, %v807_v61  ;;  %vm598_vm12 = vcmp.ge.f32.partialorder %v8446_v54, 0.0  ;;  %v2044_v12 = vshrl.u32 %v2027_v58, 16 }
  0x78   : > { %v827_v6 = vsel %vm791_vm10, %v8493_v49, %v809_v1  ;;  %v9392_v7 = vpack.c.bf16 %v825_v4, %v825_v4  ;;  %920 = vst.msk [vmem:[#allocation2 + $0xf8] sm:$0xf] %vm354_vm0, %v9388_v2  ;;  %924 = vst.msk [vmem:[#allocation2 + $0x100] sm:$0xf] %vm354_vm0, %v9390_v3  ;;  %v614_v10 = vmul.f32 0.2, %v8444_v53 }
  0x79   : > { %v9394_v8 = vpack.c.bf16 %v827_v6, %v827_v6  ;;  %v616_v11 = vmul.f32 0.2, %v8446_v54  ;;  %v2047_v15 = vshll.u32 %v2027_v58, 16  ;;  %v2058_v17 = vshrl.u32 %v2029_v5, 16  ;;  %v10626_v22 = vld [vmem:[#allocation2 + $0xc0] ss:$8 sps:$4 sm:$0xff]  }
  0x7a   : > { %9799 = vmatmul.mubr.msk.bf16.vlgmr.msra.gmra.mrb[0].mxu0 %vm1017_vm5, %v10622_v50  ;;  %928 = vst.msk [vmem:[#allocation2 + $0x108] sm:$0xf] %vm354_vm0, %v9392_v7  ;;  %v632_v20 = vsel %vm596_vm11, %v8444_v53, %v614_v10  ;;  %v2061_v21 = vshll.u32 %v2029_v5, 16  ;;  %v2046_v25 = vrot.slane %v2044_v12, 4  ;;  %vm600_vm13 = vcmp.ge.f32.partialorder %v8448_v27, 0.0  ;;  %v10631_v2 = vld [vmem:[%s12773_s1 + $0xc8] sm:$0xff]  }
  0x7b   : > { %9807 = vmatpush3.bf16.msra.mxu0 %v11127_v18  ;;  %9802 = vmatprep.mubr.msk.bf16.mxu0 %vm1017_vm5, %v10624_v62  ;;  %932 = vst.msk [vmem:[#allocation2 + $0x110] sm:$0xf] %vm354_vm0, %v9394_v8  ;;  %v634_v18 = vsel %vm598_vm12, %v8446_v54, %v616_v11  ;;  %v9363_v23 = vpack.c.bf16 %v632_v20, %v632_v20  ;;  %v2049_v26 = vrot.slane %v2047_v15, 5  ;;  %v10628_v30 = vld [vmem:[#allocation2 + $0xd8] ss:$8 sps:$4 sm:$0xff]   ;;  %v2060_v33 = vrot.slane %v2058_v17, 4 }
  0x7c   : > { %9808 = vmatprep.subr.bf16.mxu0 %v10623_v59  ;;  %v9365_v24 = vpack.c.bf16 %v634_v18, %v634_v18  ;;  %v2063_v35 = vrot.slane %v2061_v21, 5  ;;  %v618_v36 = vmul.f32 0.2, %v8448_v27  ;;  %v2031_v38 = vld [vmem:[#allocation2 + $0xa0] sm:$0xf]  ;;  %vm602_vm15 = vcmp.ge.f32.partialorder %v8450_v28, 0.0 }
  0x7d   : > { %v724_v31 = vsel %vm10954_vm8, %v9363_v23, %v723_v13  ;;  %v2050_v34 = vor.u32 %v2049_v26, %v2046_v25  ;;  %v620_v40 = vmul.f32 0.2, %v8450_v28  ;;  %v731_v41 = vld [vmem:[#allocation2 + $0xa4] sm:$0x1]  ;;  %v735_v43 = vld [vmem:[#allocation2 + $0xac] sm:$0x1] }
  0x7e   : > { %v728_v32 = vsel %vm10954_vm8, %v9365_v24, %v727_v14  ;;  %725 = vst [vmem:[#allocation2 + $0x94] sm:$0x1] %v724_v31  ;;  %v2064_v39 = vor.u32 %v2063_v35, %v2060_v33  ;;  %v636_v37 = vsel %vm600_vm13, %v8448_v27, %v618_v36  ;;  %v2033_v44 = vld [vmem:[#allocation2 + $0xa8] sm:$0xf]  ;;  %v2072_v49 = vshrl.u32 %v2031_v38, 16  ;;  %v10633_v12 = vld [vmem:[%s12773_s1 + $0xd0] sm:$0xff]  }
  0x7f   : > { %9809 = vmatpush3.bf16.msra.mxu0 %v10623_v59  ;;  %729 = vst [vmem:[#allocation2 + $0x9c] sm:$0x1] %v728_v32  ;;  %v9367_v42 = vpack.c.bf16 %v636_v37, %v636_v37  ;;  %v10630_v46 = vld [vmem:[#allocation2 + $0xe8] ss:$8 sps:$4 sm:$0xff]   ;;  %v2051_v47 = vrot.slane %v2050_v34, 4  ;;  %v638_v48 = vsel %vm602_vm15, %v8450_v28, %v620_v40  ;;  %v2075_v50 = vshll.u32 %v2031_v38, 16 }
  0x80   : > { %9810 = vmatprep.subr.bf16.mxu0 %v10625_v19  ;;  %v10632_v51 = vld [vmem:[#allocation2 + $0xf8] ss:$8 sps:$4 sm:$0xff]   ;;  %v9369_v52 = vpack.c.bf16 %v638_v48, %v638_v48  ;;  %v2086_v54 = vshrl.u32 %v2033_v44, 16  ;;  %v2089_v55 = vshll.u32 %v2033_v44, 16  ;;  %v8452_v56 = vld [vmem:[%s10892_s28 + $0x168] sm:$0x1] }
  0x81   : > { %v732_v53 = vsel %vm10954_vm8, %v9367_v42, %v731_v41  ;;  %v2065_v57 = vrot.slane %v2064_v39, 4  ;;  %v2074_v60 = vrot.slane %v2072_v49, 4  ;;  %v2077_v58 = vrot.slane %v2075_v50, 5  ;;  %v8454_v59 = vld [vmem:[%s10892_s28 + $0x178] sm:$0x1] }
  0x82   : > { %9803 = vmatmul.mubr.msk.bf16.gmra.mrb[4].mxu0 %vm1017_vm5, %v10626_v22  ;;  %733 = vst [vmem:[#allocation2 + $0xa4] sm:$0x1] %v732_v53  ;;  %vm604_vm1 = vcmp.ge.f32.partialorder %v8452_v56, 0.0  ;;  %v736_v63 = vsel %vm10954_vm8, %v9369_v52, %v735_v43  ;;  %v2088_v0 = vrot.slane %v2086_v54, 4  ;;  %v2091_v1 = vrot.slane %v2089_v55, 5  ;;  %v10635_v42 = vld [vmem:[%s12773_s1 + $0xd8] sm:$0xff]  }
  0x83   : > { %9811 = vmatpush3.bf16.msra.mxu0 %v10625_v19  ;;  %9814 = vmatprep.mubr.msk.bf16.mxu0 %vm1017_vm5, %v10628_v30  ;;  %737 = vst [vmem:[#allocation2 + $0xac] sm:$0x1] %v736_v63  ;;  %v2078_v5 = vor.u32 %v2077_v58, %v2074_v60  ;;  %vm606_vm2 = vcmp.ge.f32.partialorder %v8454_v59, 0.0  ;;  %v622_v7 = vmul.f32 0.2, %v8452_v56  ;;  %v10636_v55 = vld [vmem:[%s12773_s1 + $0xe0] sm:$0xff]  }
  0x84   : > { %9812 = vmatprep.subr.bf16.mxu0 %v10627_v29  ;;  %v2092_v6 = vor.u32 %v2091_v1, %v2088_v0  ;;  %v624_v8 = vmul.f32 0.2, %v8454_v59  ;;  %v739_v10 = vld [vmem:[#allocation2 + $0xb4] sm:$0x1]  ;;  %v743_v11 = vld [vmem:[#allocation2 + $0xbc] sm:$0x1] }
  0x85   : > { %v2028_v61 = vld [vmem:[#allocation2 + $0x94] sm:$0x1]  ;;  %v11204_v15 = vrot.slane %v2078_v5, 4  ;;  %v2035_v17 = vld [vmem:[#allocation2 + $0xb0] sm:$0xf]  ;;  %v640_v20 = vsel %vm604_vm1, %v8452_v56, %v622_v7 }
  0x86   : > { %v2030_v62 = vld [vmem:[#allocation2 + $0x9c] sm:$0x1]  ;;  %v2053_v3 = vshll.u32 %v2028_v61, 16  ;;  %v11207_v19 = vrot.slane %v2092_v6, 4  ;;  %v642_v18 = vsel %vm606_vm2, %v8454_v59, %v624_v8  ;;  %v2037_v21 = vld [vmem:[#allocation2 + $0xb8] sm:$0xf]  ;;  %v9371_v25 = vpack.c.bf16 %v640_v20, %v640_v20 }
  0x87   : > { %9813 = vmatpush3.bf16.msra.mxu0 %v10627_v29  ;;  %v2067_v4 = vshll.u32 %v2030_v62, 16  ;;  %v2100_v22 = vshrl.u32 %v2035_v17, 16  ;;  %v9373_v26 = vpack.c.bf16 %v642_v18, %v642_v18  ;;  %v8456_v27 = vld [vmem:[%s10892_s28 + $0x188] sm:$0x1]  ;;  %v8458_v28 = vld [vmem:[%s10892_s28 + $0x198] sm:$0x1] }
  0x88   : > { %9822 = vmatprep.subr.bf16.mxu0 %v10629_v45  ;;  %v2055_v13 = vrot.slane %v2053_v3, 5  ;;  %v2103_v32 = vshll.u32 %v2035_v17, 16  ;;  %v2114_v33 = vshrl.u32 %v2037_v21, 16  ;;  %v10634_v34 = vld [vmem:[#allocation2 + $0x108] ss:$8 sps:$4 sm:$0xff]   ;;  %v740_v36 = vsel %vm10954_vm8, %v9371_v25, %v739_v10 }
  0x89   : > { %v2069_v14 = vrot.slane %v2067_v4, 5  ;;  %v2032_v30 = vld [vmem:[#allocation2 + $0xa4] sm:$0x1]  ;;  %v2102_v31 = vrot.slane %v2100_v22, 4  ;;  %v744_v38 = vsel %vm10954_vm8, %v9373_v26, %v743_v11  ;;  %v2117_v39 = vshll.u32 %v2037_v21, 16  ;;  %v10637_v10 = vld [vmem:[%s12773_s1 + $0xe8] sm:$0xff]  }
  0x8a   : > { %9815 = vmatmul.mubr.msk.bf16.vlgmr.msra.gmra.mrb[0].mxu0 %vm1017_vm5, %v10630_v46  ;;  %v2056_v23 = vsel %vm10991_vm14, %v2051_v47, %v2055_v13  ;;  %v2081_v35 = vshll.u32 %v2032_v30, 16  ;;  %v2034_v40 = vld [vmem:[#allocation2 + $0xac] sm:$0x1]  ;;  %741 = vst [vmem:[#allocation2 + $0xb4] sm:$0x1] %v740_v36  ;;  %v2105_v37 = vrot.slane %v2103_v32, 5 }
  0x8b   : > { %9823 = vmatpush3.bf16.msra.mxu0 %v10629_v45  ;;  %9818 = vmatprep.mubr.msk.bf16.mxu0 %vm1017_vm5, %v10632_v51  ;;  %v2070_v24 = vsel %vm10991_vm14, %v2065_v57, %v2069_v14  ;;  %745 = vst [vmem:[#allocation2 + $0xbc] sm:$0x1] %v744_v38  ;;  %v2116_v41 = vrot.slane %v2114_v33, 4  ;;  %vm608_vm6 = vcmp.ge.f32.partialorder %v8456_v27, 0.0  ;;  %vm610_vm7 = vcmp.ge.f32.partialorder %v8458_v28, 0.0 }
  0x8c   : > { %9824 = vmatprep.subr.bf16.mxu0 %v10631_v2  ;;  %v8635_v29 = vcombine.low %v2056_v23, %v2070_v24  ;;  %v2083_v43 = vrot.slane %v2081_v35, 5  ;;  %v2095_v44 = vshll.u32 %v2034_v40, 16  ;;  %v2119_v45 = vrot.slane %v2117_v39, 5  ;;  %v747_v47 = vld [vmem:[#allocation2 + $0xc4] sm:$0x1] }
  0x8d   : > { %v626_v46 = vmul.f32 0.2, %v8456_v27  ;;  %v2106_v48 = vor.u32 %v2105_v37, %v2102_v31  ;;  %v628_v49 = vmul.f32 0.2, %v8458_v28  ;;  %v2039_v50 = vld [vmem:[#allocation2 + $0xc0] sm:$0xf] }
  0x8e   : > { %v2041_v51 = vld [vmem:[#allocation2 + $0xc8] sm:$0xf]  ;;  %v2097_v52 = vrot.slane %v2095_v44, 5  ;;  %v2120_v53 = vor.u32 %v2119_v45, %v2116_v41  ;;  %v2084_v56 = vsel %vm10991_vm14, %v11204_v15, %v2083_v43  ;;  %v751_v58 = vld [vmem:[#allocation2 + $0xcc] sm:$0x1]  ;;  %v2128_v59 = vshrl.u32 %v2039_v50, 16 }
  0x8f   : > { %9825 = vmatpush3.bf16.msra.mxu0 %v10631_v2  ;;  %v644_v54 = vsel %vm608_vm6, %v8456_v27, %v626_v46  ;;  %v646_v57 = vsel %vm610_vm7, %v8458_v28, %v628_v49  ;;  %v2107_v62 = vrot.slane %v2106_v48, 4  ;;  %v2131_v0 = vshll.u32 %v2039_v50, 16  ;;  %v8480_v1 = vld [vmem:[%s10892_s28 + $0x1b8] sm:$0x1]  ;;  %v8482_v2 = vld [vmem:[%s10892_s28 + $0x1c8] sm:$0x1] }
  0x90   : > { %9826 = vmatprep.subr.bf16.mxu0 %v10633_v12  ;;  %v9375_v60 = vpack.c.bf16 %v644_v54, %v644_v54  ;;  %v2098_v61 = vsel %vm10991_vm14, %v11207_v19, %v2097_v52  ;;  %v9377_v63 = vpack.c.bf16 %v646_v57, %v646_v57  ;;  %v2121_v3 = vrot.slane %v2120_v53, 4  ;;  %v2285_v7 = vld [vmem:[#allocation2 + $0xd8] sm:$0xf]  ;;  %v10638_v27 = vld [vmem:[%s12773_s1 + $0xf0] sm:$0xff]   ;;  %v905_v31 = vld [vmem:[#allocation2 + $0xdc] sm:$0x1] }
  0x91   : > { %v2130_v5 = vrot.slane %v2128_v59, 4  ;;  %v2142_v6 = vshrl.u32 %v2041_v51, 16  ;;  %v8636_v8 = vcombine.low %v2084_v56, %v2098_v61  ;;  %v2036_v11 = vld [vmem:[#allocation2 + $0xb4] sm:$0x1]  ;;  %v2133_v14 = vrot.slane %v2131_v0, 5 }
  0x92   : > { %9819 = vmatmul.mubr.msk.bf16.gmra.mrb[4].mxu0 %vm1017_vm5, %v10634_v34  ;;  %v748_v4 = vsel %vm10954_vm8, %v9375_v60, %v747_v47  ;;  %v752_v13 = vsel %vm10954_vm8, %v9377_v63, %v751_v58  ;;  %v2145_v15 = vshll.u32 %v2041_v51, 16  ;;  %v2109_v17 = vshll.u32 %v2036_v11, 16  ;;  %v2287_v32 = vld [vmem:[#allocation2 + $0xe0] sm:$0xf]  ;;  %v909_v39 = vld [vmem:[#allocation2 + $0xe4] sm:$0x1] }
  0x93   : > { %9827 = vmatpush3.bf16.msra.mxu0 %v10633_v12  ;;  %9830 = vmatprep.mubr.msk.bf16.mxu0 %vm1017_vm5, %v8635_v29  ;;  %v2038_v12 = vld [vmem:[#allocation2 + $0xbc] sm:$0x1]  ;;  %749 = vst [vmem:[#allocation2 + $0xc4] sm:$0x1] %v748_v4  ;;  %753 = vst [vmem:[#allocation2 + $0xcc] sm:$0x1] %v752_v13  ;;  %v2134_v18 = vor.u32 %v2133_v14, %v2130_v5 }
  0x94   : > { %9828 = vmatprep.subr.bf16.mxu0 %v10635_v42  ;;  %v2123_v19 = vshll.u32 %v2038_v12, 16  ;;  %v2144_v20 = vrot.slane %v2142_v6, 4  ;;  %vm778_vm9 = vcmp.ge.f32.partialorder %v8480_v1, 0.0  ;;  %v2147_v21 = vrot.slane %v2145_v15, 5  ;;  %v8484_v40 = vld [vmem:[%s10892_s28 + $0x1d8] sm:$0x1] }
  0x95   : > { %vm780_vm10 = vcmp.ge.f32.partialorder %v8482_v2, 0.0  ;;  %v796_v22 = vmul.f32 0.2, %v8480_v1  ;;  %v2111_v23 = vrot.slane %v2109_v17, 5  ;;  %v798_v25 = vmul.f32 0.2, %v8482_v2 }
  0x96   : > { %v2125_v24 = vrot.slane %v2123_v19, 5  ;;  %v2302_v26 = vshrl.u32 %v2285_v7, 16  ;;  %v11250_v28 = vrot.slane %v2134_v18, 4  ;;  %v2148_v29 = vor.u32 %v2147_v21, %v2144_v20  ;;  %v8486_v37 = vld [vmem:[%s10892_s28 + $0x1e8] sm:$0x1]  ;;  %v11281_v20 = vld [vmem:[%s12773_s1 + $0x100] sm:$0xff]  }
  0x97   : > { %9829 = vmatpush3.bf16.msra.mxu0 %v10635_v42  ;;  %v814_v30 = vsel %vm778_vm9, %v8480_v1, %v796_v22  ;;  %v2305_v33 = vshll.u32 %v2285_v7, 16  ;;  %v2112_v34 = vsel %vm10991_vm14, %v2107_v62, %v2111_v23  ;;  %v816_v36 = vsel %vm780_vm10, %v8482_v2, %v798_v25  ;;  %v2289_v45 = vld [vmem:[#allocation2 + $0xe8] sm:$0xf]  ;;  %v913_v62 = vld [vmem:[#allocation2 + $0xec] sm:$0x1] }
  0x98   : > { %9838 = vmatprep.subr.bf16.mxu0 %v10636_v55  ;;  %v2126_v35 = vsel %vm10991_vm14, %v2121_v3, %v2125_v24  ;;  %v9381_v38 = vpack.c.bf16 %v814_v30, %v814_v30  ;;  %v2149_v42 = vrot.slane %v2148_v29, 4  ;;  %v9383_v43 = vpack.c.bf16 %v816_v36, %v816_v36  ;;  %v917_v63 = vld [vmem:[#allocation2 + $0xf4] sm:$0x1]  ;;  %v2291_v4 = vld [vmem:[#allocation2 + $0xf0] sm:$0xf] }
  0x99   : > { %v8637_v41 = vcombine.low %v2112_v34, %v2126_v35  ;;  %v2304_v44 = vrot.slane %v2302_v26, 4  ;;  %v2307_v48 = vrot.slane %v2305_v33, 5  ;;  %v2316_v49 = vshrl.u32 %v2287_v32, 16  ;;  %v8488_v11 = vld [vmem:[%s10892_s28 + $0x1f8] sm:$0x1] }
  0x9a   : > { %9831 = vmatmul.mubr.msk.bf16.vlgmr.msra.gmra.mrb[0].mxu0 %vm1017_vm5, %v8636_v8  ;;  %v2040_v46 = vld [vmem:[#allocation2 + $0xc4] sm:$0x1]  ;;  %v906_v47 = vsel %vm10954_vm8, %v9381_v38, %v905_v31  ;;  %v2319_v50 = vshll.u32 %v2287_v32, 16  ;;  %v2042_v51 = vld [vmem:[#allocation2 + $0xcc] sm:$0x1]  ;;  %v910_v53 = vsel %vm10954_vm8, %v9383_v43, %v909_v39  ;;  %vm782_vm11 = vcmp.ge.f32.partialorder %v8484_v40, 0.0 }
  0x9b   : > { %9839 = vmatpush3.bf16.msra.mxu0 %v10636_v55  ;;  %9834 = vmatprep.mubr.msk.bf16.mxu0 %vm1017_vm5, %v8637_v41  ;;  %v2137_v52 = vshll.u32 %v2040_v46, 16  ;;  %907 = vst [vmem:[#allocation2 + $0xdc] sm:$0x1] %v906_v47  ;;  %vm784_vm12 = vcmp.ge.f32.partialorder %v8486_v37, 0.0  ;;  %v2151_v54 = vshll.u32 %v2042_v51, 16  ;;  %v10639_v55 = vld [vmem:[%s12773_s1 + $0xf8] sm:$0xff]   ;;  %v2308_v56 = vor.u32 %v2307_v48, %v2304_v44 }
  0x9c   : > { %9840 = vmatprep.subr.bf16.mxu0 %v10637_v10  ;;  %911 = vst [vmem:[#allocation2 + $0xe4] sm:$0x1] %v910_v53  ;;  %v2318_v57 = vrot.slane %v2316_v49, 4  ;;  %v2321_v60 = vrot.slane %v2319_v50, 5  ;;  %v800_v59 = vmul.f32 0.2, %v8484_v40 }
  0x9d   : > { %v2139_v58 = vrot.slane %v2137_v52, 5  ;;  %v802_v61 = vmul.f32 0.2, %v8486_v37  ;;  %v2330_v0 = vshrl.u32 %v2289_v45, 16  ;;  %v2153_v1 = vrot.slane %v2151_v54, 5 }
  0x9e   : > { %v11267_v2 = vrot.slane %v2308_v56, 4  ;;  %v2322_v3 = vor.u32 %v2321_v60, %v2318_v57  ;;  %v2333_v5 = vshll.u32 %v2289_v45, 16  ;;  %v818_v7 = vsel %vm782_vm11, %v8484_v40, %v800_v59  ;;  %v8490_v12 = vld [vmem:[%s10892_s28 + $0x208] sm:$0x1]  ;;  %v2293_v23 = vld [vmem:[#allocation2 + $0xf8] sm:$0xf] }
  0x9f   : > { %9841 = vmatpush3.bf16.msra.mxu0 %v10637_v10  ;;  %v2140_v6 = vsel %vm10991_vm14, %v11250_v28, %v2139_v58  ;;  %v820_v8 = vsel %vm784_vm12, %v8486_v37, %v802_v61  ;;  %v2332_v10 = vrot.slane %v2330_v0, 4  ;;  %v2154_v13 = vsel %vm10991_vm14, %v2149_v42, %v2153_v1  ;;  %v2295_v32 = vld [vmem:[#allocation2 + $0x100] sm:$0xf]  ;;  %v921_v36 = vld [vmem:[#allocation2 + $0xfc] sm:$0x1] }
  0xa0   : > { %9842 = vmatprep.subr.bf16.mxu0 %v10638_v27  ;;  %v2323_v14 = vrot.slane %v2322_v3, 4  ;;  %v9385_v15 = vpack.c.bf16 %v818_v7, %v818_v7  ;;  %v9387_v17 = vpack.c.bf16 %v820_v8, %v820_v8  ;;  %v8638_v19 = vcombine.low %v2140_v6, %v2154_v13  ;;  %v925_v45 = vld [vmem:[#allocation2 + $0x104] sm:$0x1]  ;;  %v8492_v47 = vld [vmem:[%s10892_s28 + $0x218] sm:$0x1] }
  0xa1   : > { %v2335_v18 = vrot.slane %v2333_v5, 5  ;;  %v2344_v21 = vshrl.u32 %v2291_v4, 16  ;;  %v2347_v22 = vshll.u32 %v2291_v4, 16  ;;  %vm786_vm13 = vcmp.ge.f32.partialorder %v8488_v11, 0.0  ;;  %v8494_v56 = vld [vmem:[%s10892_s28 + $0x228] sm:$0x1] }
  0xa2   : > { %v2286_v24 = vld [vmem:[#allocation2 + $0xdc] sm:$0x1]  ;;  %v914_v25 = vsel %vm10954_vm8, %v9385_v15, %v913_v62  ;;  %v918_v26 = vsel %vm10954_vm8, %v9387_v17, %v917_v63  ;;  %vm788_vm15 = vcmp.ge.f32.partialorder %v8490_v12, 0.0  ;;  %9835 = vmatmul.mubr.msk.bf16.gmra.mrb[4].mxu0 %vm1017_vm5, %v8638_v19  ;;  %v804_v34 = vmul.f32 0.2, %v8488_v11  ;;  %v10641_v15 = vld [vmem:[%s12773_s1 + $0x108] sm:$0xff]  }
  0xa3   : > { %9843 = vmatpush3.bf16.msra.mxu0 %v10638_v27  ;;  %v2288_v27 = vld [vmem:[#allocation2 + $0xe4] sm:$0x1]  ;;  %v2311_v28 = vshll.u32 %v2286_v24, 16  ;;  %915 = vst [vmem:[#allocation2 + $0xec] sm:$0x1] %v914_v25  ;;  %v2336_v29 = vor.u32 %v2335_v18, %v2332_v10  ;;  %v2346_v30 = vrot.slane %v2344_v21, 4 }
  0xa4   : > { %9844 = vmatprep.subr.bf16.mxu0 %v10639_v55  ;;  %919 = vst [vmem:[#allocation2 + $0xf4] sm:$0x1] %v918_v26  ;;  %v2349_v31 = vrot.slane %v2347_v22, 5  ;;  %v2325_v33 = vshll.u32 %v2288_v27, 16  ;;  %v806_v35 = vmul.f32 0.2, %v8490_v12  ;;  %v822_v43 = vsel %vm786_vm13, %v8488_v11, %v804_v34 }
  0xa5   : > { %v2358_v38 = vshrl.u32 %v2293_v23, 16  ;;  %v2313_v39 = vrot.slane %v2311_v28, 5  ;;  %v2337_v40 = vrot.slane %v2336_v29, 4  ;;  %v2361_v41 = vshll.u32 %v2293_v23, 16  ;;  %v2297_v59 = vld [vmem:[#allocation2 + $0x108] sm:$0xf] }
  0xa6   : > { %v2350_v37 = vor.u32 %v2349_v31, %v2346_v30  ;;  %v2327_v42 = vrot.slane %v2325_v33, 5  ;;  %v824_v44 = vsel %vm788_vm15, %v8490_v12, %v806_v35  ;;  %v9389_v50 = vpack.c.bf16 %v822_v43, %v822_v43  ;;  %v929_v5 = vld [vmem:[#allocation2 + $0x10c] sm:$0x1]  ;;  %v2299_v6 = vld [vmem:[#allocation2 + $0x110] sm:$0xf]  ;;  %v226_v26 = vld [vmem:[%s10892_s28 + $0x80] sm:$0xff] }
  0xa7   : > { %9845 = vmatpush3.bf16.msra.mxu0 %v10639_v55  ;;  %v2360_v46 = vrot.slane %v2358_v38, 4  ;;  %v2314_v48 = vsel %vm10991_vm14, %v11267_v2, %v2313_v39  ;;  %v9391_v51 = vpack.c.bf16 %v824_v44, %v824_v44  ;;  %v2363_v53 = vrot.slane %v2361_v41, 5  ;;  %v933_v21 = vld [vmem:[#allocation2 + $0x114] sm:$0x1] }
  0xa8   : > { %9854 = vmatprep.subr.bf16.mxu0 %v11281_v20  ;;  %v2351_v49 = vrot.slane %v2350_v37, 4  ;;  %v2328_v52 = vsel %vm10991_vm14, %v2323_v14, %v2327_v42  ;;  %v2372_v54 = vshrl.u32 %v2295_v32, 16  ;;  %v2375_v55 = vshll.u32 %v2295_v32, 16  ;;  %v10642_v42 = vld [vmem:[%s12773_s1 + $0x110] sm:$0xff]  }
  0xa9   : > { %v8655_v57 = vcombine.low %v2314_v48, %v2328_v52  ;;  %v922_v60 = vsel %vm10954_vm8, %v9389_v50, %v921_v36  ;;  %v926_v58 = vsel %vm10954_vm8, %v9391_v51, %v925_v45  ;;  %vm790_vm1 = vcmp.ge.f32.partialorder %v8492_v47, 0.0  ;;  %v8423_v52 = vld [vmem:[%s10892_s28 + $0x110] sm:$0xff] }
  0xaa   : > { %v2290_v61 = vld [vmem:[#allocation2 + $0xec] sm:$0x1]  ;;  %923 = vst [vmem:[#allocation2 + $0xfc] sm:$0x1] %v922_v60  ;;  %927 = vst [vmem:[#allocation2 + $0x104] sm:$0x1] %v926_v58  ;;  %v2364_v63 = vor.u32 %v2363_v53, %v2360_v46 }
  0xab   : > { %v2292_v62 = vld [vmem:[#allocation2 + $0xf4] sm:$0x1]  ;;  %v2374_v0 = vrot.slane %v2372_v54, 4  ;;  %v2377_v1 = vrot.slane %v2375_v55, 5  ;;  %9846 = vmatprep.mubr.msk.bf16.mxu0 %vm1017_vm5, %v8655_v57  ;;  %v2339_v2 = vshll.u32 %v2290_v61, 16  ;;  %vm792_vm2 = vcmp.ge.f32.partialorder %v8494_v56, 0.0 }
  0xac   : > { %v2353_v3 = vshll.u32 %v2292_v62, 16  ;;  %v808_v4 = vmul.f32 0.2, %v8492_v47  ;;  %v810_v8 = vmul.f32 0.2, %v8494_v56  ;;  %v2386_v10 = vshrl.u32 %v2297_v59, 16 }
  0xad   : > { %v2378_v7 = vor.u32 %v2377_v1, %v2374_v0  ;;  %v2341_v11 = vrot.slane %v2339_v2, 5  ;;  %v2389_v14 = vshll.u32 %v2297_v59, 16  ;;  %v2365_v17 = vrot.slane %v2364_v63, 4  ;;  %v10644_v59 = vld [vmem:[#allocation2 + $0x8] ss:$8 sps:$4 sm:$0xff]   ;;  %v10645_v61 = vld [vmem:[%s12773_s1 + $0x120] sm:$0xff]  }
  0xae   : > { %v2355_v12 = vrot.slane %v2353_v3, 5  ;;  %v826_v13 = vsel %vm790_vm1, %v8492_v47, %v808_v4  ;;  %v828_v19 = vsel %vm792_vm2, %v8494_v56, %v810_v8  ;;  %v2400_v29 = vshrl.u32 %v2299_v6, 16  ;;  %v2837_v2 = vld [vmem:[#allocation2 + $0x8] sm:$0xf]  ;;  %v2839_v4 = vld [vmem:[#allocation2 + $0x10] sm:$0xf] }
  0xaf   : > { %v9393_v18 = vpack.c.bf16 %v826_v13, %v826_v13  ;;  %v2342_v22 = vsel %vm10991_vm14, %v2337_v40, %v2341_v11  ;;  %v2379_v24 = vrot.slane %v2378_v7, 4  ;;  %v9395_v25 = vpack.c.bf16 %v828_v19, %v828_v19  ;;  %v10646_v11 = vld [vmem:[#allocation2 + $0x18] ss:$8 sps:$4 sm:$0xff]   ;;  %v10648_v13 = vld [vmem:[#allocation2 + $0x28] ss:$8 sps:$4 sm:$0xff]  }
  0xb0   : > { %v2356_v23 = vsel %vm10991_vm14, %v2351_v49, %v2355_v12  ;;  %v2403_v30 = vshll.u32 %v2299_v6, 16  ;;  %v2388_v34 = vrot.slane %v2386_v10, 4  ;;  %v2391_v35 = vrot.slane %v2389_v14, 5  ;;  %v2841_v12 = vld [vmem:[#allocation2 + $0x18] sm:$0xf] }
  0xb1   : > { %v8656_v27 = vcombine.low %v2342_v22, %v2356_v23  ;;  %v930_v28 = vsel %vm10954_vm8, %v9393_v18, %v929_v5  ;;  %v2294_v31 = vld [vmem:[#allocation2 + $0xfc] sm:$0x1]  ;;  %v2296_v32 = vld [vmem:[#allocation2 + $0x104] sm:$0x1]  ;;  %v934_v33 = vsel %vm10954_vm8, %v9395_v25, %v933_v21  ;;  %v2402_v39 = vrot.slane %v2400_v29, 4  ;;  %v10647_v18 = vld [vmem:[%s12773_s1 + $0x128] sm:$0xff]  }
  0xb2   : > { %931 = vst [vmem:[#allocation2 + $0x10c] sm:$0x1] %v930_v28  ;;  %v2367_v36 = vshll.u32 %v2294_v31, 16  ;;  %v2381_v38 = vshll.u32 %v2296_v32, 16  ;;  %935 = vst [vmem:[#allocation2 + $0x114] sm:$0x1] %v934_v33  ;;  %v2392_v43 = vor.u32 %v2391_v35, %v2388_v34 }
  0xb3   : > { %9847 = vmatmul.mubr.msk.bf16.vlgmr.msra.gmra.mrb[0].mxu0 %vm1017_vm5, %v8656_v27  ;;  %v2405_v40 = vrot.slane %v2403_v30, 5  ;;  %vm244_vm6 = vcmp.ge.f32.partialorder %v226_v26, 0.0  ;;  %v262_v44 = vmul.f32 0.2, %v226_v26  ;;  %vm429_vm7 = vcmp.ge.f32.partialorder %v8423_v52, 0.0 }
  0xb4   : > { %9855 = vmatpush3.bf16.msra.mxu0 %v11281_v20  ;;  %v2369_v37 = vrot.slane %v2367_v36, 5  ;;  %v2383_v41 = vrot.slane %v2381_v38, 5  ;;  %v10643_v20 = vld [vmem:[%s12773_s1 + $0x118] sm:$0xff]   ;;  %v2393_v54 = vrot.slane %v2392_v43, 4  ;;  %v447_v0 = vmul.f32 0.2, %v8423_v52 }
  0xb5   : > { %9856 = vmatprep.subr.bf16.mxu0 %v10641_v15  ;;  %v2406_v47 = vor.u32 %v2405_v40, %v2402_v39  ;;  %v280_v49 = vsel %vm244_vm6, %v226_v26, %v262_v44  ;;  %v2854_v6 = vshrl.u32 %v2837_v2, 16  ;;  %v2857_v7 = vshll.u32 %v2837_v2, 16  ;;  %v2838_v14 = vld [vmem:[#allocation2 + $0xc] sm:$0x1]  ;;  %v2843_v23 = vld [vmem:[#allocation2 + $0x20] sm:$0xf] }
  0xb6   : > { %v2370_v45 = vsel %vm10991_vm14, %v2365_v17, %v2369_v37  ;;  %v2384_v46 = vsel %vm10991_vm14, %v2379_v24, %v2383_v41  ;;  %v9342_v51 = vpack.c.bf16 %v280_v49, %v280_v49  ;;  %v465_v3 = vsel %vm429_vm7, %v8423_v52, %v447_v0  ;;  %v2842_v26 = vld [vmem:[#allocation2 + $0x1c] sm:$0x1]  ;;  %v2844_v29 = vld [vmem:[#allocation2 + $0x24] sm:$0x1]  ;;  %v2845_v35 = vld [vmem:[#allocation2 + $0x28] sm:$0xf] }
  0xb7   : > { %v8657_v48 = vcombine.low %v2370_v45, %v2384_v46  ;;  %v2407_v56 = vrot.slane %v2406_v47, 4  ;;  %v9360_v5 = vpack.c.bf16 %v465_v3, %v465_v3  ;;  %v2868_v8 = vshrl.u32 %v2839_v4, 16  ;;  %v10649_v41 = vld [vmem:[%s12773_s1 + $0x130] sm:$0xff]  }
  0xb8   : > { %9857 = vmatpush3.bf16.msra.mxu0 %v10641_v15  ;;  %390 = vst.msk [vmem:[#allocation2 + $0x40] sm:$0xf] %vm354_vm0, %v9342_v51  ;;  %v2871_v10 = vshll.u32 %v2839_v4, 16  ;;  %v2840_v15 = vld [vmem:[#allocation2 + $0x14] sm:$0x1]  ;;  %v2856_v17 = vrot.slane %v2854_v6, 4 }
  0xb9   : > { %9858 = vmatprep.subr.bf16.mxu0 %v10642_v42  ;;  %v2298_v50 = vld [vmem:[#allocation2 + $0x10c] sm:$0x1]  ;;  %9850 = vmatprep.mubr.msk.bf16.mxu0 %vm1017_vm5, %v8657_v48  ;;  %v2300_v53 = vld [vmem:[#allocation2 + $0x114] sm:$0x1]  ;;  %572 = vst.msk [vmem:[#allocation2 + $0x88] sm:$0xf] %vm354_vm0, %v9360_v5 }
  0xba   : > { %v2395_v55 = vshll.u32 %v2298_v50, 16  ;;  %v2409_v57 = vshll.u32 %v2300_v53, 16  ;;  %v2859_v19 = vrot.slane %v2857_v7, 5  ;;  %v2870_v21 = vrot.slane %v2868_v8, 4  ;;  %v2847_v44 = vld [vmem:[#allocation2 + $0x30] sm:$0xf] }
  0xbb   : > { %v2873_v22 = vrot.slane %v2871_v10, 5  ;;  %v2882_v24 = vshrl.u32 %v2841_v12, 16  ;;  %v2885_v25 = vshll.u32 %v2841_v12, 16  ;;  %v2896_v27 = vshrl.u32 %v2843_v23, 16  ;;  %v10652_v47 = vld [vmem:[#allocation2 + $0x50] ss:$8 sps:$4 sm:$0xff]  }
  0xbc   : > { %v2397_v60 = vrot.slane %v2395_v55, 5  ;;  %9859 = vmatpush3.bf16.msra.mxu0 %v10642_v42  ;;  %v2411_v58 = vrot.slane %v2409_v57, 5  ;;  %v2899_v28 = vshll.u32 %v2843_v23, 16  ;;  %v2863_v32 = vshll.u32 %v2838_v14, 16  ;;  %v10651_v48 = vld [vmem:[%s12773_s1 + $0x138] sm:$0xff]  }
  0xbd   : > { %9860 = vmatprep.subr.bf16.mxu0 %v10643_v20  ;;  %v2884_v30 = vrot.slane %v2882_v24, 4  ;;  %v2887_v31 = vrot.slane %v2885_v25, 5  ;;  %v2898_v33 = vrot.slane %v2896_v27, 4  ;;  %v2860_v36 = vor.u32 %v2859_v19, %v2856_v17  ;;  %v227_v53 = vld [vmem:[%s10892_s28 + $0x88] sm:$0x1] }
  0xbe   : > { %v2398_v62 = vsel %vm10991_vm14, %v2393_v54, %v2397_v60  ;;  %v2412_v63 = vsel %vm10991_vm14, %v2407_v56, %v2411_v58  ;;  %v2901_v34 = vrot.slane %v2899_v28, 5  ;;  %v2874_v38 = vor.u32 %v2873_v22, %v2870_v21  ;;  %v2846_v56 = vld [vmem:[#allocation2 + $0x2c] sm:$0x1]  ;;  %v391_v6 = vld [vmem:[#allocation2 + $0x44] sm:$0x1] }
  0xbf   : > { %v8658_v1 = vcombine.low %v2398_v62, %v2412_v63  ;;  %v2877_v39 = vshll.u32 %v2840_v15, 16  ;;  %v2891_v40 = vshll.u32 %v2842_v26, 16  ;;  %v2905_v37 = vshll.u32 %v2844_v29, 16  ;;  %v10650_v46 = vld [vmem:[#allocation2 + $0x38] ss:$8 sps:$4 sm:$0xff]  }
  0xc0   : > { %9861 = vmatpush3.bf16.msra.mxu0 %v10643_v20  ;;  %v2888_v42 = vor.u32 %v2887_v31, %v2884_v30  ;;  %v2902_v43 = vor.u32 %v2901_v34, %v2898_v33  ;;  %v2910_v45 = vshrl.u32 %v2845_v35, 16  ;;  %v2865_v20 = vrot.slane %v2863_v32, 5  ;;  %v2849_v63 = vld [vmem:[#allocation2 + $0x38] sm:$0xf]  ;;  %v3095_v12 = vld [vmem:[#allocation2 + $0x50] sm:$0xf] }
  0xc1   : > { %9870 = vmatprep.subr.bf16.mxu0 %v10645_v61  ;;  %9851 = vmatmul.mubr.msk.bf16.gmra.mrb[4].mxu0 %vm1017_vm5, %v8658_v1  ;;  %v2861_v49 = vrot.slane %v2860_v36, 4  ;;  %v2875_v50 = vrot.slane %v2874_v38, 4  ;;  %v2879_v51 = vrot.slane %v2877_v39, 5  ;;  %v2913_v52 = vshll.u32 %v2845_v35, 16  ;;  %v2851_v1 = vld [vmem:[#allocation2 + $0x40] sm:$0xf] }
  0xc2   : > { %9862 = vmatprep.mubr.msk.bf16.mxu0 %vm1017_vm5, %v10644_v59  ;;  %v11353_v54 = vrot.slane %v2891_v40, 5  ;;  %v11355_v55 = vrot.slane %v2905_v37, 5  ;;  %v2924_v57 = vshrl.u32 %v2847_v44, 16  ;;  %v2927_v60 = vshll.u32 %v2847_v44, 16  ;;  %v10654_v14 = vld [vmem:[#allocation2 + $0x60] ss:$8 sps:$4 sm:$0xff]  }
  0xc3   : > { %v11357_v58 = vrot.slane %v2888_v42, 4  ;;  %v11359_v59 = vrot.slane %v2902_v43, 4  ;;  %v11363_v62 = vrot.slane %v2910_v45, 4  ;;  %vm245_vm9 = vcmp.ge.f32.partialorder %v227_v53, 0.0  ;;  %v2850_v17 = vld [vmem:[#allocation2 + $0x3c] sm:$0x1] }
  0xc4   : > { %v263_v0 = vmul.f32 0.2, %v227_v53  ;;  %v2866_v2 = vsel %vm10991_vm14, %v2861_v49, %v2865_v20  ;;  %v2880_v3 = vsel %vm10991_vm14, %v2875_v50, %v2879_v51  ;;  %v11370_v4 = vrot.slane %v2913_v52, 5  ;;  %v3097_v22 = vld [vmem:[#allocation2 + $0x58] sm:$0xf]  ;;  %v10655_v31 = vld [vmem:[%s12773_s1 + $0x148] sm:$0xff]  }
  0xc5   : > { %v2919_v5 = vshll.u32 %v2846_v56, 16  ;;  %v11373_v7 = vrot.slane %v2924_v57, 4  ;;  %v2929_v8 = vrot.slane %v2927_v60, 5  ;;  %v2941_v19 = vshll.u32 %v2849_v63, 16  ;;  %v11379_v24 = vld [vmem:[#allocation2 + $0x54] sm:$0x1] }
  0xc6   : > { %v281_v10 = vsel %vm245_vm9, %v227_v53, %v263_v0  ;;  %v2955_v21 = vshll.u32 %v2851_v1, 16  ;;  %v3112_v25 = vshrl.u32 %v3095_v12, 16  ;;  %v11381_v26 = vcombine.low %v2866_v2, %v2880_v3  ;;  %v3099_v30 = vld [vmem:[#allocation2 + $0x60] sm:$0xf]  ;;  %v10656_v32 = vld [vmem:[#allocation2 + $0x70] ss:$8 sps:$4 sm:$0xff]  }
  0xc7   : > { %v9343_v15 = vpack.c.bf16 %v281_v10, %v281_v10  ;;  %v11383_v27 = vrot.slane %v2919_v5, 5  ;;  %v3115_v29 = vshll.u32 %v3095_v12, 16  ;;  %v2916_v33 = vor.u32 %v11370_v4, %v11363_v62  ;;  %v3098_v43 = vld [vmem:[#allocation2 + $0x5c] sm:$0x1]  ;;  %v3100_v50 = vld [vmem:[#allocation2 + $0x64] sm:$0x1] }
  0xc8   : > { %v2930_v34 = vor.u32 %v2929_v8, %v11373_v7  ;;  %v3126_v36 = vshrl.u32 %v3097_v22, 16  ;;  %v2943_v38 = vrot.slane %v2941_v19, 5  ;;  %v2957_v40 = vrot.slane %v2955_v21, 5  ;;  %v3102_v62 = vld [vmem:[#allocation2 + $0x6c] sm:$0x1] }
  0xc9   : > { %9863 = vmatmul.mubr.msk.bf16.vlgmr.msra.gmra.mrb[0].mxu0 %vm1017_vm5, %v10646_v11  ;;  %v2938_v11 = vshrl.u32 %v2849_v63, 16  ;;  %v392_v28 = vsel %vm10954_vm8, %v9343_v15, %v391_v6  ;;  %v3129_v37 = vshll.u32 %v3097_v22, 16  ;;  %v2947_v42 = vshll.u32 %v2850_v17, 16  ;;  %v10658_v2 = vld [vmem:[#allocation2 + $0x80] ss:$8 sps:$4 sm:$0xff]  }
  0xca   : > { %9871 = vmatpush3.bf16.msra.mxu0 %v10645_v61  ;;  %9866 = vmatprep.mubr.msk.bf16.mxu0 %vm1017_vm5, %v10648_v13  ;;  %v11361_v61 = vld [vmem:[#allocation2 + $0x34] sm:$0x1]  ;;  %v10653_v13 = vld [vmem:[%s12773_s1 + $0x140] sm:$0xff]   ;;  %393 = vst [vmem:[#allocation2 + $0x44] sm:$0x1] %v392_v28  ;;  %v3114_v44 = vrot.slane %v3112_v25, 4  ;;  %v2894_v20 = vsel %vm10991_vm14, %v11357_v58, %v11353_v54 }
  0xcb   : > { %9872 = vmatprep.subr.bf16.mxu0 %v10647_v18  ;;  %v2933_v23 = vshll.u32 %v11361_v61, 16  ;;  %v2940_v35 = vrot.slane %v2938_v11, 4  ;;  %v3121_v45 = vshll.u32 %v11379_v24, 16  ;;  %v3117_v49 = vrot.slane %v3115_v29, 5  ;;  %v3105_v17 = vld [vmem:[#allocation2 + $0x78] sm:$0xf] }
  0xcc   : > { %v3143_v51 = vshll.u32 %v3099_v30, 16  ;;  %v3128_v52 = vrot.slane %v3126_v36, 4  ;;  %v3131_v53 = vrot.slane %v3129_v37, 5  ;;  %v2917_v3 = vrot.slane %v2916_v33, 4  ;;  %v8424_v36 = vld [vmem:[%s10892_s28 + $0x118] sm:$0x1] }
  0xcd   : > { %v2944_v60 = vor.u32 %v2943_v38, %v2940_v35  ;;  %v2931_v4 = vrot.slane %v2930_v34, 4  ;;  %v2935_v5 = vrot.slane %v2933_v23, 5  ;;  %v11407_v6 = vrot.slane %v2947_v42, 5  ;;  %v11430_v38 = vld [vmem:[%s10892_s28 + $0x1a0] sm:$0xff] }
  0xce   : > { %9873 = vmatpush3.bf16.msra.mxu0 %v10647_v18  ;;  %v2952_v18 = vshrl.u32 %v2851_v1, 16  ;;  %v3145_v0 = vrot.slane %v3143_v51, 5  ;;  %v3103_v1 = vld [vmem:[#allocation2 + $0x70] sm:$0xf]  ;;  %v3118_v8 = vor.u32 %v3117_v49, %v3114_v44  ;;  %v3135_v10 = vshll.u32 %v3098_v43, 16 }
  0xcf   : > { %9874 = vmatprep.subr.bf16.mxu0 %v10649_v41  ;;  %v3163_v15 = vshll.u32 %v3102_v62, 16  ;;  %v3168_v19 = vshrl.u32 %v3103_v1, 16  ;;  %v11412_v21 = vrot.slane %v2944_v60, 4  ;;  %v11416_v23 = vrot.slane %v3121_v45, 5  ;;  %v3106_v51 = vld [vmem:[#allocation2 + $0x7c] sm:$0x1] }
  0xd0   : > { %v2954_v39 = vrot.slane %v2952_v18, 4  ;;  %v10659_v18 = vld [vmem:[%s12773_s1 + $0x158] sm:$0xff]   ;;  %v2922_v25 = vsel %vm10991_vm14, %v2917_v3, %v11383_v27  ;;  %v2936_v28 = vsel %vm10991_vm14, %v2931_v4, %v2935_v5  ;;  %v11426_v33 = vrot.slane %v3135_v10, 5  ;;  %v573_v60 = vld [vmem:[#allocation2 + $0x8c] sm:$0x1] }
  0xd1   : > { %9867 = vmatmul.mubr.msk.bf16.gmra.mrb[4].mxu0 %vm1017_vm5, %v10650_v46  ;;  %v3140_v46 = vshrl.u32 %v3099_v30, 16  ;;  %v2852_v7 = vld [vmem:[#allocation2 + $0x44] sm:$0x1]  ;;  %v3104_v30 = vld [vmem:[#allocation2 + $0x74] sm:$0x1]  ;;  %v3182_v35 = vshrl.u32 %v3105_v17, 16 }
  0xd2   : > { %9875 = vmatpush3.bf16.msra.mxu0 %v10649_v41  ;;  %9878 = vmatprep.mubr.msk.bf16.mxu0 %vm1017_vm5, %v10652_v47  ;;  %v3101_v41 = vld [vmem:[#allocation2 + $0x68] sm:$0xf]  ;;  %v10657_v47 = vld [vmem:[%s12773_s1 + $0x150] sm:$0xff]   ;;  %v2958_v61 = vor.u32 %v2957_v40, %v2954_v39  ;;  %v2961_v29 = vshll.u32 %v2852_v7, 16  ;;  %v11436_v40 = vrot.slane %v3163_v15, 5  ;;  %v3170_v37 = vrot.slane %v3168_v19, 4 }
  0xd3   : > { %9876 = vmatprep.subr.bf16.mxu0 %v10651_v48  ;;  %v3154_v56 = vshrl.u32 %v3101_v41, 16  ;;  %v3157_v57 = vshll.u32 %v3101_v41, 16  ;;  %v3142_v63 = vrot.slane %v3140_v46, 4  ;;  %v10660_v41 = vld [vmem:[%s12773_s1 + $0x160] sm:$0xff]   ;;  %v3177_v43 = vshll.u32 %v3104_v30, 16  ;;  %v10663_v19 = vld [vmem:[%s12773_s1 + $0x178] sm:$0xff]  }
  0xd4   : > { %v11414_v22 = vrot.slane %v2958_v61, 4  ;;  %v3185_v44 = vshll.u32 %v3105_v17, 16  ;;  %vm430_vm10 = vcmp.ge.f32.partialorder %v8424_v36, 0.0  ;;  %v2963_v45 = vrot.slane %v2961_v29, 5  ;;  %v3108_v58 = vld [vmem:[#allocation2 + $0x84] sm:$0x1] }
  0xd5   : > { %v3156_v11 = vrot.slane %v3154_v56, 4  ;;  %v3159_v12 = vrot.slane %v3157_v57, 5  ;;  %v3146_v24 = vor.u32 %v3145_v0, %v3142_v63  ;;  %vm611_vm11 = vcmp.ge.f32.partialorder %v11430_v38, 0.0  ;;  %v10662_v0 = vld [vmem:[%s12773_s1 + $0x170] sm:$0xff]  }
  0xd6   : > { %9877 = vmatpush3.bf16.msra.mxu0 %v10651_v48  ;;  %v2908_v48 = vsel %vm10991_vm14, %v11359_v59, %v11355_v55  ;;  %v8717_v56 = vcombine.low %v2922_v25, %v2936_v28  ;;  %v10661_v55 = vld [vmem:[%s12773_s1 + $0x168] sm:$0xff]   ;;  %v3187_v59 = vrot.slane %v3185_v44, 5  ;;  %v2964_v3 = vsel %vm10991_vm14, %v11414_v22, %v2963_v45  ;;  %v8495_v22 = vld [vmem:[%s10892_s28 + $0x230] sm:$0xff]  ;;  %v3647_v45 = vld [vmem:[#allocation2 + $0x98] sm:$0xf] }
  0xd7   : > { %9886 = vmatprep.subr.bf16.mxu0 %v10653_v13  ;;  %v3160_v34 = vor.u32 %v3159_v12, %v3156_v11  ;;  %v11441_v42 = vrot.slane %v3146_v24, 4  ;;  %v8716_v49 = vcombine.low %v2894_v20, %v2908_v48  ;;  %v3179_v5 = vrot.slane %v3177_v43, 5 }
  0xd8   : > { %v3191_v7 = vshll.u32 %v3106_v51, 16  ;;  %vm793_vm12 = vcmp.ge.f32.partialorder %v8495_v22, 0.0  ;;  %vm4297_vm15 = vsmask.f32 7938  ;;  %vm4302_vm1 = vcmask 1040384  }
  0xd9   : > { %9879 = vmatmul.mubr.msk.bf16.vlgmr.msra.gmra.mrb[0].mxu0 %vm1017_vm5, %v10654_v14  ;;  %v3149_v14 = vshll.u32 %v3100_v50, 16  ;;  %v11454_v50 = vrot.slane %v3160_v34, 4  ;;  %vm11776_vm6 = vmand %vm4302_vm1, %vm357_vm4  ;;  %vm5457_vm4 = vcmask 1042432   ;;  %vm5458_vm7 = vcmask 1046532  }
  0xda   : > { %9887 = vmatpush3.bf16.msra.mxu0 %v10653_v13  ;;  %9882 = vmatprep.mubr.msk.bf16.mxu0 %vm1017_vm5, %v10656_v32  ;;  %v3132_v13 = vor.u32 %v3131_v53, %v3128_v52  ;;  %v11424_v32 = vrot.slane %v3118_v8, 4  ;;  %v3184_v52 = vrot.slane %v3182_v35, 4  ;;  %v3109_v53 = vld [vmem:[#allocation2 + $0x88] sm:$0xf]  ;;  %v3193_v24 = vrot.slane %v3191_v7, 5  ;;  %vm12115_vm9 = vmor %vm5457_vm4, %vm5458_vm7 }
  0xdb   : > { %9888 = vmatprep.subr.bf16.mxu0 %v10655_v31  ;;  %v11434_v39 = vrot.slane %v3149_v14, 5  ;;  %v3210_v20 = vshrl.u32 %v3109_v53, 16  ;;  %v3213_v48 = vshll.u32 %v3109_v53, 16  ;;  %v3166_v34 = vsel %vm10991_vm14, %v11454_v50, %v11436_v40  ;;  %v10666_v53 = vld [vmem:[%s12773_s1 + $0x190] sm:$0xff]   ;;  %v10668_v7 = vld [vmem:[#allocation2 + $0x98] ss:$8 sps:$4 sm:$0xff]  }
  0xdc   : > { %v3133_v27 = vrot.slane %v3132_v13, 4  ;;  %v3124_v4 = vsel %vm10991_vm14, %v11424_v32, %v11416_v23  ;;  %v3188_v8 = vor.u32 %v3187_v59, %v3184_v52  ;;  %v3205_v13 = vshll.u32 %v3108_v58, 16  ;;  %v3652_v58 = vld [vmem:[#allocation2 + $0xac] sm:$0x1] }
  0xdd   : > { %v3212_v14 = vrot.slane %v3210_v20, 4  ;;  %v3215_v15 = vrot.slane %v3213_v48, 5  ;;  %v3667_v50 = vshll.u32 %v3647_v45, 16  ;;  %v3653_v20 = vld [vmem:[#allocation2 + $0xb0] sm:$0xf] }
  0xde   : > { %9889 = vmatpush3.bf16.msra.mxu0 %v10655_v31  ;;  %v3171_v31 = vshll.u32 %v3103_v1, 16  ;;  %v2950_v1 = vsel %vm10991_vm14, %v11412_v21, %v11407_v6  ;;  %v3138_v6 = vsel %vm10991_vm14, %v3133_v27, %v11426_v33  ;;  %v3189_v23 = vrot.slane %v3188_v8, 4  ;;  %v3654_v48 = vld [vmem:[#allocation2 + $0xb4] sm:$0x1] }
  0xdf   : > { %9890 = vmatprep.subr.bf16.mxu0 %v10657_v47  ;;  %v8718_v17 = vcombine.low %v2950_v1, %v2964_v3  ;;  %v8735_v21 = vcombine.low %v3124_v4, %v3138_v6  ;;  %v3216_v29 = vor.u32 %v3215_v15, %v3212_v14  ;;  %v3152_v33 = vsel %vm10991_vm14, %v11441_v42, %v11434_v39 }
  0xe0   : > { %v3173_v46 = vrot.slane %v3171_v31, 5  ;;  %v10664_v31 = vld [vmem:[%s12773_s1 + $0x180] sm:$0xff]   ;;  %v3207_v35 = vrot.slane %v3205_v13, 5  ;;  %v3194_v27 = vsel %vm10991_vm14, %v3189_v23, %v3193_v24  ;;  %v811_v42 = vmul.f32 0.2, %v8495_v22 }
  0xe1   : > { %9883 = vmatmul.mubr.msk.bf16.gmra.mrb[4].mxu0 %vm1017_vm5, %v10658_v2  ;;  %v8736_v43 = vcombine.low %v3152_v33, %v3166_v34  ;;  %v3669_v59 = vrot.slane %v3667_v50, 5  ;;  %v3706_v4 = vshrl.u32 %v3653_v20, 16  ;;  %v3701_v15 = vshll.u32 %v3652_v58, 16  ;;  %v3658_v34 = vld [vmem:[#allocation2 + $0xc4] sm:$0x1] }
  0xe2   : > { %9891 = vmatpush3.bf16.msra.mxu0 %v10657_v47  ;;  %9894 = vmatprep.mubr.msk.bf16.mxu0 %vm1017_vm5, %v11381_v26  ;;  %v448_v47 = vmul.f32 0.2, %v8424_v36  ;;  %v3107_v26 = vld [vmem:[#allocation2 + $0x80] sm:$0xf]  ;;  %v3174_v54 = vor.u32 %v3173_v46, %v3170_v37  ;;  %v829_v40 = vsel %vm793_vm12, %v8495_v22, %v811_v42  ;;  %v10671_v42 = vld [vmem:[%s12773_s1 + $0x1a8] sm:$0xff]  }
  0xe3   : > { %9892 = vmatprep.subr.bf16.mxu0 %v10659_v18  ;;  %v3196_v62 = vshrl.u32 %v3107_v26, 16  ;;  %v3199_v63 = vshll.u32 %v3107_v26, 16  ;;  %v3649_v46 = vld [vmem:[#allocation2 + $0xa0] sm:$0xf]  ;;  %v9396_v26 = vpack.c.bf16 %v829_v40, %v829_v40 }
  0xe4   : > { %v466_v57 = vsel %vm430_vm10, %v8424_v36, %v448_v47  ;;  %v3175_v12 = vrot.slane %v3174_v54, 4  ;;  %v10665_v47 = vld [vmem:[%s12773_s1 + $0x188] sm:$0xff]   ;;  %v3678_v51 = vshrl.u32 %v3649_v46, 16  ;;  %v3681_v52 = vshll.u32 %v3649_v46, 16  ;;  %v3650_v54 = vld [vmem:[#allocation2 + $0xa4] sm:$0x1] }
  0xe5   : > { %v9361_v61 = vpack.c.bf16 %v466_v57, %v466_v57  ;;  %v3198_v10 = vrot.slane %v3196_v62, 4  ;;  %v3201_v11 = vrot.slane %v3199_v63, 5  ;;  %936 = vst.msk [vmem:[#allocation2 + $0x118] sm:$0xf] %vm354_vm0, %v9396_v26  ;;  %v3651_v63 = vld [vmem:[#allocation2 + $0xa8] sm:$0xf] }
  0xe6   : > { %9893 = vmatpush3.bf16.msra.mxu0 %v10659_v18  ;;  %v629_v18 = vmul.f32 0.2, %v11430_v38  ;;  %v3683_v62 = vrot.slane %v3681_v52, 5  ;;  %v3695_v1 = vshll.u32 %v3651_v63, 16  ;;  %v10669_v22 = vld [vmem:[%s12773_s1 + $0x1a0] sm:$0xff]   ;;  %v3743_v46 = vshll.u32 %v3658_v34, 16 }
  0xe7   : > { %9902 = vmatprep.subr.bf16.mxu0 %v10660_v41  ;;  %v574_v2 = vsel %vm10954_vm8, %v9361_v61, %v573_v60  ;;  %v3202_v25 = vor.u32 %v3201_v11, %v3198_v10  ;;  %v3648_v60 = vld [vmem:[#allocation2 + $0x9c] sm:$0x1]  ;;  %v3680_v61 = vrot.slane %v3678_v51, 4  ;;  %v3687_v10 = vshll.u32 %v3650_v54, 16  ;;  %v3655_v11 = vld [vmem:[#allocation2 + $0xb8] sm:$0xf] }
  0xe8   : > { %575 = vst [vmem:[#allocation2 + $0x8c] sm:$0x1] %v574_v2  ;;  %v647_v28 = vsel %vm611_vm11, %v11430_v38, %v629_v18  ;;  %v3180_v38 = vsel %vm10991_vm14, %v3175_v12, %v3179_v5  ;;  %v3673_v3 = vshll.u32 %v3648_v60, 16  ;;  %v3709_v5 = vshll.u32 %v3653_v20, 16  ;;  %v10667_v12 = vld [vmem:[%s12773_s1 + $0x198] sm:$0xff]  }
  0xe9   : > { %9895 = vmatmul.mubr.msk.bf16.vlgmr.msra.gmra.mrb[0].mxu0 %vm1017_vm5, %v8716_v49  ;;  %v9378_v30 = vpack.c.bf16 %v647_v28, %v647_v28  ;;  %v3203_v37 = vrot.slane %v3202_v25, 4  ;;  %v8737_v44 = vcombine.low %v3180_v38, %v3194_v27  ;;  %v3664_v49 = vshrl.u32 %v3647_v45, 16  ;;  %v10672_v38 = vld [vmem:[#allocation2 + $0xb8] ss:$8 sps:$4 sm:$0xff]   ;;  %v3659_v45 = vld [vmem:[#allocation2 + $0xc8] sm:$0xf] }
  0xea   : > { %9903 = vmatpush3.bf16.msra.mxu0 %v10660_v41  ;;  %9898 = vmatprep.mubr.msk.bf16.mxu0 %vm1017_vm5, %v8717_v56  ;;  %v3217_v41 = vrot.slane %v3216_v29, 4  ;;  %v3684_v8 = vor.u32 %v3683_v62, %v3680_v61  ;;  %v3697_v14 = vrot.slane %v3695_v1, 5  ;;  %v3711_v18 = vrot.slane %v3709_v5, 5  ;;  %v755_v60 = vld [vmem:[#allocation2 + $0xd4] sm:$0x1] }
  0xeb   : > { %9904 = vmatprep.subr.bf16.mxu0 %v10661_v55  ;;  %754 = vst.msk [vmem:[#allocation2 + $0xd0] sm:$0xf] %vm354_vm0, %v9378_v30  ;;  %v3208_v56 = vsel %vm10991_vm14, %v3203_v37, %v3207_v35  ;;  %v11526_v23 = vrot.slane %v3673_v3, 5  ;;  %v3720_v24 = vshrl.u32 %v3655_v11, 16  ;;  %v3723_v25 = vshll.u32 %v3655_v11, 16 }
  0xec   : > { %v11531_v29 = vrot.slane %v3687_v10, 5  ;;  %v3656_v30 = vld [vmem:[#allocation2 + $0xbc] sm:$0x1]  ;;  %v11536_v27 = vrot.slane %v3701_v15, 5  ;;  %v3751_v52 = vshll.u32 %v3659_v45, 16  ;;  %v11551_v20 = vrot.slane %v3743_v46, 5 }
  0xed   : > { %v3729_v40 = vshll.u32 %v3656_v30, 16  ;;  %v3905_v54 = vld [vmem:[#allocation2 + $0xe0] sm:$0xf]  ;;  %v3907_v1 = vld [vmem:[#allocation2 + $0xe8] sm:$0xf] }
  0xee   : > { %9905 = vmatpush3.bf16.msra.mxu0 %v10661_v55  ;;  %v3666_v55 = vrot.slane %v3664_v49, 4  ;;  %v3748_v49 = vshrl.u32 %v3659_v45, 16  ;;  %v3906_v15 = vld [vmem:[#allocation2 + $0xe4] sm:$0x1] }
  0xef   : > { %9906 = vmatprep.subr.bf16.mxu0 %v10662_v0  ;;  %v3110_v32 = vld [vmem:[#allocation2 + $0x8c] sm:$0x1]  ;;  %v11548_v61 = vrot.slane %v3729_v40, 5  ;;  %v3913_v40 = vld [vmem:[#allocation2 + $0x100] sm:$0xf] }
  0xf0   : > { %v3219_v36 = vshll.u32 %v3110_v32, 16  ;;  %v3670_v6 = vor.u32 %v3669_v59, %v3666_v55  ;;  %v11533_v32 = vrot.slane %v3684_v8, 4  ;;  %v10676_v8 = vld [vmem:[#allocation2 + $0xe0] ss:$8 sps:$4 sm:$0xff]  }
  0xf1   : > { %9899 = vmatmul.mubr.msk.bf16.gmra.mrb[4].mxu0 %vm1017_vm5, %v8718_v17  ;;  %v3715_v17 = vshll.u32 %v3654_v48, 16  ;;  %v3750_v48 = vrot.slane %v3748_v49, 4  ;;  %v10677_v49 = vld [vmem:[%s12773_s1 + $0x1c0] sm:$0xff]  }
  0xf2   : > { %9907 = vmatpush3.bf16.msra.mxu0 %v10662_v0  ;;  %9910 = vmatprep.mubr.msk.bf16.mxu0 %vm1017_vm5, %v8735_v21  ;;  %v3221_v39 = vrot.slane %v3219_v36, 5  ;;  %v3692_v0 = vshrl.u32 %v3651_v63, 16  ;;  %v3657_v21 = vld [vmem:[#allocation2 + $0xc0] sm:$0xf]  ;;  %v11529_v28 = vrot.slane %v3670_v6, 4  ;;  %v3922_v6 = vshrl.u32 %v3905_v54, 16 }
  0xf3   : > { %9908 = vmatprep.subr.bf16.mxu0 %v10663_v19  ;;  %v3734_v35 = vshrl.u32 %v3657_v21, 16  ;;  %v8460_v36 = vld [vmem:[%s10892_s28 + $0x1a8] sm:$0x1]  ;;  %v3661_v26 = vld [vmem:[#allocation2 + $0xd0] sm:$0xf] }
  0xf4   : > { %v3222_v57 = vsel %vm10991_vm14, %v3217_v41, %v3221_v39  ;;  %v3694_v13 = vrot.slane %v3692_v0, 4  ;;  %v11538_v41 = vrot.slane %v3715_v17, 5  ;;  %v3737_v39 = vshll.u32 %v3657_v21, 16  ;;  %v3660_v63 = vld [vmem:[#allocation2 + $0xcc] sm:$0x1] }
  0xf5   : > { %v8738_v2 = vcombine.low %v3208_v56, %v3222_v57  ;;  %vm612_vm0 = vcmp.ge.f32.partialorder %v8460_v36, 0.0  ;;  %v3736_v51 = vrot.slane %v3734_v35, 4  ;;  %v3765_v55 = vshll.u32 %v3661_v26, 16  ;;  %v10674_v3 = vld [vmem:[#allocation2 + $0xc8] ss:$8 sps:$4 sm:$0xff]  }
  0xf6   : > { %9909 = vmatpush3.bf16.msra.mxu0 %v10663_v19  ;;  %v3708_v19 = vrot.slane %v3706_v4, 4  ;;  %v3698_v33 = vor.u32 %v3697_v14, %v3694_v13  ;;  %v3739_v56 = vrot.slane %v3737_v39, 5  ;;  %v3753_v0 = vrot.slane %v3751_v52, 5  ;;  %v3909_v14 = vld [vmem:[#allocation2 + $0xf0] sm:$0xf] }
  0xf7   : > { %9918 = vmatprep.subr.bf16.mxu0 %v10664_v31  ;;  %v3757_v11 = vshll.u32 %v3660_v63, 16  ;;  %v3936_v13 = vshrl.u32 %v3907_v1, 16  ;;  %v3924_v17 = vrot.slane %v3922_v6, 4  ;;  %v3676_v21 = vsel %vm10991_vm14, %v11529_v28, %v11526_v23 }
  0xf8   : > { %v3712_v37 = vor.u32 %v3711_v18, %v3708_v19  ;;  %v11543_v50 = vrot.slane %v3698_v33, 4  ;;  %v3740_v10 = vor.u32 %v3739_v56, %v3736_v51  ;;  %v3939_v19 = vshll.u32 %v3907_v1, 16  ;;  %v3911_v18 = vld [vmem:[#allocation2 + $0xf8] sm:$0xf] }
  0xf9   : > { %9911 = vmatmul.mubr.msk.bf16.vlgmr.msra.gmra.mrb[0].mxu0 %vm1017_vm5, %v8736_v43  ;;  %v3722_v43 = vrot.slane %v3720_v24, 4  ;;  %v3908_v24 = vld [vmem:[#allocation2 + $0xec] sm:$0x1]  ;;  %v3938_v30 = vrot.slane %v3936_v13, 4  ;;  %v10675_v33 = vld [vmem:[%s12773_s1 + $0x1b8] sm:$0xff]   ;;  %v11576_v52 = vrot.slane %v3757_v11, 5 }
  0xfa   : > { %9919 = vmatpush3.bf16.msra.mxu0 %v10664_v31  ;;  %9914 = vmatprep.mubr.msk.bf16.mxu0 %vm1017_vm5, %v8737_v44  ;;  %v10670_v31 = vld [vmem:[#allocation2 + $0xa8] ss:$8 sps:$4 sm:$0xff]   ;;  %v3725_v44 = vrot.slane %v3723_v25, 5  ;;  %v11546_v59 = vrot.slane %v3712_v37, 4  ;;  %v3950_v37 = vshrl.u32 %v3909_v14, 16  ;;  %v11567_v39 = vrot.slane %v3740_v10, 4 }
  0xfb   : > { %9920 = vmatprep.subr.bf16.mxu0 %v10665_v47  ;;  %v3945_v46 = vshll.u32 %v3908_v24, 16 }
  0xfc   : > { %v3726_v58 = vor.u32 %v3725_v44, %v3722_v43  ;;  %v3953_v43 = vshll.u32 %v3909_v14, 16  ;;  %v3964_v44 = vshrl.u32 %v3911_v18, 16  ;;  %v3952_v63 = vrot.slane %v3950_v37, 4 }
  0xfd   : > { %v3718_v16 = vsel %vm10991_vm14, %v11546_v59, %v11538_v41 }
  0xfe   : > { %9921 = vmatpush3.bf16.msra.mxu0 %v10665_v47  ;;  %v630_v47 = vmul.f32 0.2, %v8460_v36  ;;  %v11565_v34 = vrot.slane %v3726_v58, 4  ;;  %v3914_v58 = vld [vmem:[#allocation2 + $0x104] sm:$0x1] }
  0xff   : > { %9922 = vmatprep.subr.bf16.mxu0 %v10666_v53 }
 0x100   : > { %v648_v57 = vsel %vm612_vm0, %v8460_v36, %v630_v47  ;;  %v3941_v36 = vrot.slane %v3939_v19, 5  ;;  %v3690_v19 = vsel %vm10991_vm14, %v11533_v32, %v11531_v29 }
 0x101   : > { %9915 = vmatmul.mubr.msk.bf16.gmra.mrb[4].mxu0 %vm1017_vm5, %v8738_v2  ;;  %v9379_v62 = vpack.c.bf16 %v648_v57, %v648_v57  ;;  %v10673_v2 = vld [vmem:[%s12773_s1 + $0x1b0] sm:$0xff]   ;;  %v3915_v57 = vld [vmem:[#allocation2 + $0x108] sm:$0xf]  ;;  %v8795_v29 = vcombine.low %v3676_v21, %v3690_v19 }
 0x102   : > { %9923 = vmatpush3.bf16.msra.mxu0 %v10666_v53  ;;  %9926 = vmatprep.mubr.msk.bf16.mxu0 %vm1017_vm5, %v10668_v7  ;;  %v3762_v53 = vshrl.u32 %v3661_v26, 16  ;;  %v3767_v7 = vrot.slane %v3765_v55, 5  ;;  %v3967_v26 = vshll.u32 %v3911_v18, 16  ;;  %v3995_v24 = vshll.u32 %v3915_v57, 16 }
 0x103   : > { %9924 = vmatprep.subr.bf16.mxu0 %v10667_v12  ;;  %v756_v4 = vsel %vm10954_vm8, %v9379_v62, %v755_v60  ;;  %v10678_v60 = vld [vmem:[#allocation2 + $0xf0] ss:$8 sps:$4 sm:$0xff]  }
 0x104   : > { %v3764_v5 = vrot.slane %v3762_v53, 4  ;;  %757 = vst [vmem:[#allocation2 + $0xd4] sm:$0x1] %v756_v4  ;;  %v3942_v53 = vor.u32 %v3941_v36, %v3938_v30  ;;  %v3916_v4 = vld [vmem:[#allocation2 + $0x10c] sm:$0x1] }
 0x105   : > { %v3918_v36 = vld [vmem:[#allocation2 + $0x114] sm:$0x1] }
 0x106   : > { %9925 = vmatpush3.bf16.msra.mxu0 %v10667_v12  ;;  %v3925_v12 = vshll.u32 %v3905_v54, 16  ;;  %v3768_v35 = vor.u32 %v3767_v7, %v3764_v5  ;;  %v3955_v54 = vrot.slane %v3953_v43, 5  ;;  %v3981_v5 = vshll.u32 %v3913_v40, 16  ;;  %v10679_v7 = vld [vmem:[%s12773_s1 + $0x1c8] sm:$0xff]   ;;  %v3919_v43 = vld [vmem:[#allocation2 + $0x118] sm:$0xf] }
 0x107   : > { %9934 = vmatprep.subr.bf16.mxu0 %v10669_v22  ;;  %v11592_v14 = vrot.slane %v3942_v53, 4  ;;  %v4015_v21 = vshll.u32 %v3918_v36, 16  ;;  %v10688_v36 = vld [vmem:[%s12774_s2 + $0x40] sm:$0xff]  }
 0x108   : > { %v3927_v25 = vrot.slane %v3925_v12, 5  ;;  %v11578_v62 = vrot.slane %v3768_v35, 4  ;;  %v8496_v12 = vld [vmem:[%s10892_s28 + $0x238] sm:$0x1]  ;;  %v3956_v18 = vor.u32 %v3955_v54, %v3952_v63  ;;  %v3987_v35 = vshll.u32 %v3914_v58, 16  ;;  %9982 = vmatprep.subr.bf16.mxu1 %v10688_v36 }
 0x109   : > { %9927 = vmatmul.mubr.msk.bf16.vlgmr.msra.gmra.mrb[0].mxu0 %vm1017_vm5, %v10670_v31  ;;  %v3910_v31 = vld [vmem:[#allocation2 + $0xf4] sm:$0x1]  ;;  %vm794_vm13 = vcmp.ge.f32.partialorder %v8496_v12, 0.0  ;;  %9983 = vmatpush3.bf16.msra.mxu1 %v10688_v36 }
 0x10a   : > { %9935 = vmatpush3.bf16.msra.mxu0 %v10669_v22  ;;  %9930 = vmatprep.mubr.msk.bf16.mxu0 %vm1017_vm5, %v10672_v38  ;;  %v3754_v22 = vor.u32 %v3753_v0, %v3750_v48  ;;  %v3912_v38 = vld [vmem:[#allocation2 + $0xfc] sm:$0x1]  ;;  %v3928_v45 = vor.u32 %v3927_v25, %v3924_v17  ;;  %v3959_v47 = vshll.u32 %v3910_v31, 16  ;;  %v3978_v48 = vshrl.u32 %v3913_v40, 16  ;;  %v10680_v0 = vld [vmem:[#allocation2 + $0x100] ss:$8 sps:$4 sm:$0xff]  }
 0x10b   : > { %9936 = vmatprep.subr.bf16.mxu0 %v10671_v42  ;;  %v3973_v56 = vshll.u32 %v3912_v38, 16  ;;  %v3662_v55 = vld [vmem:[#allocation2 + $0xd4] sm:$0x1]  ;;  %v3983_v17 = vrot.slane %v3981_v5, 5  ;;  %v3917_v25 = vld [vmem:[#allocation2 + $0x110] sm:$0xf]  ;;  %v3704_v5 = vsel %vm10991_vm14, %v11543_v50, %v11536_v27 }
 0x10c   : > { %v11574_v51 = vrot.slane %v3754_v22, 4  ;;  %v11585_v6 = vrot.slane %v3928_v45, 4  ;;  %v11589_v10 = vrot.slane %v3959_v47, 5  ;;  %v3980_v11 = vrot.slane %v3978_v48, 4  ;;  %v10681_v38 = vld [vmem:[%s12773_s1 + $0x1d0] sm:$0xff]   ;;  %v10685_v27 = vld [vmem:[%s12773_s1 + $0x1e8] sm:$0xff]  }
 0x10d   : > { %v3771_v13 = vshll.u32 %v3662_v55, 16  ;;  %v3992_v22 = vshrl.u32 %v3915_v57, 16  ;;  %v11610_v40 = vrot.slane %v3956_v18, 4  ;;  %v937_v47 = vld [vmem:[#allocation2 + $0x11c] sm:$0x1]  ;;  %v4009_v28 = vshll.u32 %v3917_v25, 16 }
 0x10e   : > { %9937 = vmatpush3.bf16.msra.mxu0 %v10671_v42  ;;  %v3931_v42 = vshll.u32 %v3906_v15, 16  ;;  %v11594_v15 = vrot.slane %v3973_v56, 5  ;;  %v3984_v31 = vor.u32 %v3983_v17, %v3980_v11  ;;  %v11616_v56 = vrot.slane %v3987_v35, 5  ;;  %v10683_v55 = vld [vmem:[%s12773_s1 + $0x1d8] sm:$0xff]  }
 0x10f   : > { %9938 = vmatprep.subr.bf16.mxu0 %v10673_v2  ;;  %v3994_v37 = vrot.slane %v3992_v22, 4  ;;  %v3773_v32 = vrot.slane %v3771_v13, 5  ;;  %v4023_v48 = vshll.u32 %v3919_v43, 16  ;;  %v3746_v13 = vsel %vm10991_vm14, %v11567_v39, %v11551_v20 }
 0x110   : > { %v11580_v1 = vrot.slane %v3931_v42, 5  ;;  %v3997_v42 = vrot.slane %v3995_v24, 5  ;;  %v11614_v53 = vrot.slane %v3984_v31, 4  ;;  %v8796_v17 = vcombine.low %v3704_v5, %v3718_v16 }
 0x111   : > { %9931 = vmatmul.mubr.msk.bf16.gmra.mrb[4].mxu0 %vm1017_vm5, %v10674_v3  ;;  %v3969_v3 = vrot.slane %v3967_v26, 5  ;;  %v4006_v26 = vshrl.u32 %v3917_v25, 16  ;;  %v4025_v11 = vrot.slane %v4023_v48, 5  ;;  %v3760_v20 = vsel %vm10991_vm14, %v11574_v51, %v11576_v52  ;;  %v10687_v51 = vld [vmem:[%s12773_s1 + $0x1f8] sm:$0xff]  }
 0x112   : > { %9939 = vmatpush3.bf16.msra.mxu0 %v10673_v2  ;;  %9942 = vmatprep.mubr.msk.bf16.mxu0 %vm1017_vm5, %v10676_v8  ;;  %v3966_v2 = vrot.slane %v3964_v44, 4  ;;  %v11587_v8 = vrot.slane %v3945_v46, 5  ;;  %v10682_v44 = vld [vmem:[#allocation2 + $0x110] ss:$8 sps:$4 sm:$0xff]   ;;  %v3998_v45 = vor.u32 %v3997_v42, %v3994_v37  ;;  %v812_v46 = vmul.f32 0.2, %v8496_v12 }
 0x113   : > { %9940 = vmatprep.subr.bf16.mxu0 %v10675_v33  ;;  %v4008_v58 = vrot.slane %v4006_v26, 4  ;;  %v3774_v39 = vsel %vm10991_vm14, %v11578_v62, %v3773_v32  ;;  %v3934_v22 = vsel %vm10991_vm14, %v11585_v6, %v11580_v1  ;;  %v3962_v62 = vsel %vm10991_vm14, %v11610_v40, %v11589_v10  ;;  %v10690_v42 = vld [vmem:[%s12774_s2 + $0x48] sm:$0xff]   ;;  %v10692_v32 = vld [vmem:[%s12774_s2 + $0x50] sm:$0xff]   ;;  %v10695_v40 = vld [vmem:[%s12774_s2 + $0x258] sm:$0xff]  }
 0x114   : > { %v3970_v30 = vor.u32 %v3969_v3, %v3966_v2  ;;  %v830_v23 = vsel %vm794_vm13, %v8496_v12, %v812_v46  ;;  %v3999_v63 = vrot.slane %v3998_v45, 4  ;;  %v10684_v2 = vld [vmem:[%s12773_s1 + $0x1e0] sm:$0xff]   ;;  %v4011_v3 = vrot.slane %v4009_v28, 5  ;;  %9984 = vmatprep.subr.bf16.mxu1 %v10690_v42  ;;  %v10699_v26 = vld [vmem:[%s12774_s2 + $0x268] sm:$0xff]  }
 0x115   : > { %v9397_v54 = vpack.c.bf16 %v830_v23, %v830_v23  ;;  %v3732_v12 = vsel %vm10991_vm14, %v11565_v34, %v11548_v61  ;;  %v10686_v61 = vld [vmem:[%s12773_s1 + $0x1f0] sm:$0xff]   ;;  %v3948_v24 = vsel %vm10991_vm14, %v11592_v14, %v11587_v8  ;;  %v8798_v31 = vcombine.low %v3760_v20, %v3774_v39  ;;  %9985 = vmatpush3.bf16.msra.mxu1 %v10690_v42  ;;  %v10696_v45 = vld [vmem:[%s12774_s2 + $0x60] sm:$0xff]  }
 0x116   : > { %9941 = vmatpush3.bf16.msra.mxu0 %v10675_v33  ;;  %v4001_v33 = vshll.u32 %v3916_v4, 16  ;;  %v4017_v4 = vrot.slane %v4015_v21, 5  ;;  %v4012_v50 = vor.u32 %v4011_v3, %v4008_v58  ;;  %v8797_v41 = vcombine.low %v3732_v12, %v3746_v13  ;;  %9986 = vmatprep.subr.bf16.mxu1 %v10692_v32  ;;  %v10697_v46 = vld [vmem:[%s12774_s2 + $0x260] sm:$0xff]  }
 0x117   : > { %9950 = vmatprep.subr.bf16.mxu0 %v10677_v49  ;;  %v8815_v52 = vcombine.low %v3934_v22, %v3948_v24  ;;  %v3990_v6 = vsel %vm10991_vm14, %v11614_v53, %v11616_v56  ;;  %v10840_v37 = vmov 0   ;;  %v10701_v53 = vld [vmem:[%s12774_s2 + $0x270] sm:$0xff]   ;;  %v10702_v56 = vld [vmem:[%s12774_s2 + $0x78] sm:$0xff]   ;;  %v11747_v23 = vld [vmem:[%s12774_s2] sm:$0xff]  }
 0x118   : > { %v11618_v57 = vrot.slane %v4001_v33, 5  ;;  %v4013_v34 = vrot.slane %v4012_v50, 4  ;;  %4169 = vst [vmem:[#allocation3 + $0x18] sm:$0xf] %v10840_v37  ;;  %4170 = vst [vmem:[#allocation3 + $0x1c] sm:$0x1] %v10840_v37 }
 0x119   : > { %9943 = vmatmul.mubr.msk.bf16.vlgmr.msra.gmra.mrb[0].mxu0 %vm1017_vm5, %v10678_v60  ;;  %v4020_v60 = vshrl.u32 %v3919_v43, 16  ;;  %4163 = vst [vmem:[#allocation3] sm:$0xf] %v10840_v37  ;;  %4164 = vst [vmem:[#allocation3 + $0x4] sm:$0x1] %v10840_v37  ;;  %v10693_v43 = vld [vmem:[%s12774_s2 + $0x250] sm:$0xff]   ;;  %9987 = vmatpush3.bf16.msra.mxu1 %v10692_v32 }
 0x11a   : > { %9951 = vmatpush3.bf16.msra.mxu0 %v10677_v49  ;;  %9946 = vmatprep.mubr.msk.bf16.mxu0 %vm1017_vm5, %v10680_v0  ;;  %v11612_v49 = vrot.slane %v3970_v30, 4  ;;  %v938_v0 = vsel %vm10954_vm8, %v9397_v54, %v937_v47  ;;  %v4004_v8 = vsel %vm10991_vm14, %v3999_v63, %v11618_v57  ;;  %v4018_v10 = vsel %vm10991_vm14, %v4013_v34, %v4017_v4  ;;  %v10698_v47 = vld [vmem:[%s12774_s2 + $0x68] sm:$0xff]   ;;  %v10703_v57 = vld [vmem:[%s12774_s2 + $0x278] sm:$0xff]   ;;  %v11753_v28 = vld [vmem:[%s12774_s2 + $0x200] sm:$0xff]  }
 0x11b   : > { %9952 = vmatprep.subr.bf16.mxu0 %v10679_v7  ;;  %939 = vst [vmem:[#allocation2 + $0x11c] sm:$0x1] %v938_v0  ;;  %v8817_v35 = vcombine.low %v3990_v6, %v4004_v8  ;;  %4165 = vst [vmem:[#allocation3 + $0x8] sm:$0xf] %v10840_v37  ;;  %vm4296_vm8 = vcmask 1043456  }
 0x11c   : > { %v3976_v1 = vsel %vm10991_vm14, %v11612_v49, %v11594_v15  ;;  %4166 = vst [vmem:[#allocation3 + $0xc] sm:$0x1] %v10840_v37  ;;  %4167 = vst [vmem:[#allocation3 + $0x10] sm:$0xf] %v10840_v37  ;;  %v10700_v49 = vld [vmem:[%s12774_s2 + $0x70] sm:$0xff]  }
 0x11d   : > { %v8816_v14 = vcombine.low %v3962_v62, %v3976_v1  ;;  %4168 = vst [vmem:[#allocation3 + $0x14] sm:$0x1] %v10840_v37  ;;  %4171 = vst [vmem:[#allocation3 + $0x20] sm:$0xf] %v10840_v37 }
 0x11e   : > { %9953 = vmatpush3.bf16.msra.mxu0 %v10679_v7  ;;  %v4022_v7 = vrot.slane %v4020_v60, 4  ;;  %4172 = vst [vmem:[#allocation3 + $0x24] sm:$0x1] %v10840_v37  ;;  %4173 = vst [vmem:[#allocation3 + $0x28] sm:$0xf] %v10840_v37 }
 0x11f   : > { %9954 = vmatprep.subr.bf16.mxu0 %v10681_v38  ;;  %4174 = vst [vmem:[#allocation3 + $0x2c] sm:$0x1] %v10840_v37  ;;  %4175 = vst [vmem:[#allocation3 + $0x30] sm:$0xf] %v10840_v37  ;;  %v4316_v50 = vld [vmem:[#allocation3 + $0x1c] sm:$0x1] }
 0x120   : > { %v4026_v59 = vor.u32 %v4025_v11, %v4022_v7  ;;  %4176 = vst [vmem:[#allocation3 + $0x34] sm:$0x1] %v10840_v37  ;;  %4177 = vst [vmem:[#allocation3 + $0x38] sm:$0xf] %v10840_v37  ;;  %v11756_v21 = vld [vmem:[#allocation3] sm:$0xf] }
 0x121   : > { %9947 = vmatmul.mubr.msk.bf16.gmra.mrb[4].mxu0 %vm1017_vm5, %v10682_v44  ;;  %4178 = vst [vmem:[#allocation3 + $0x3c] sm:$0x1] %v10840_v37  ;;  %4179 = vst [vmem:[#allocation3 + $0x40] sm:$0xf] %v10840_v37  ;;  %v10694_v44 = vld [vmem:[%s12774_s2 + $0x58] sm:$0xff]   ;;  %v4382_v60 = vshrl.u32 %v11756_v21, 16 }
 0x122   : > { %9955 = vmatpush3.bf16.msra.mxu0 %v10681_v38  ;;  %9958 = vmatprep.mubr.msk.bf16.mxu0 %vm1017_vm5, %v8795_v29  ;;  %v3920_v19 = vld [vmem:[#allocation2 + $0x11c] sm:$0x1]  ;;  %v4027_v25 = vrot.slane %v4026_v59, 4  ;;  %v10689_v38 = vld [vmem:[%s12774_s2 + $0x240] sm:$0xff]   ;;  %4180 = vst [vmem:[#allocation3 + $0x44] sm:$0x1] %v10840_v37  ;;  %vm11770_vm2 = vmand %vm4296_vm8, %vm4297_vm15 }
 0x123   : > { %9956 = vmatprep.subr.bf16.mxu0 %v10683_v55  ;;  %v4029_v18 = vshll.u32 %v3920_v19, 16  ;;  %4181 = vst [vmem:[#allocation3 + $0x48] sm:$0xf] %v10840_v37  ;;  %4182 = vst [vmem:[#allocation3 + $0x4c] sm:$0x1] %v10840_v37  ;;  %v10691_v29 = vld [vmem:[%s12774_s2 + $0x248] sm:$0xff]   ;;  %9988 = vmatprep.subr.bf16.mxu1 %v10694_v44 }
 0x124   : > { %9989 = vmatpush3.bf16.msra.mxu1 %v10694_v44  ;;  %v11764_v7 = vld [vmem:[#allocation3 + $0x4] sm:$0x1]  ;;  %v4299_v22 = vld [vmem:[#allocation3 + $0x8] sm:$0xf]  ;;  %v4304_v24 = vld [vmem:[#allocation3 + $0xc] sm:$0x1] }
 0x125   : > { %v4031_v30 = vrot.slane %v4029_v18, 5  ;;  %9990 = vmatprep.subr.bf16.mxu1 %v10696_v45 }
 0x126   : > { %9957 = vmatpush3.bf16.msra.mxu0 %v10683_v55  ;;  %v4385_v55 = vshll.u32 %v11756_v21, 16 }
 0x127   : > { %9966 = vmatprep.subr.bf16.mxu0 %v10684_v2  ;;  %v4032_v15 = vsel %vm10991_vm14, %v4027_v25, %v4031_v30 }
 0x128   : > { %v8818_v33 = vcombine.low %v4018_v10, %v4032_v15  ;;  %9991 = vmatpush3.bf16.msra.mxu1 %v10696_v45  ;;  %v11762_v3 = vrot.slane %v4385_v55, 5  ;;  %v4307_v45 = vld [vmem:[#allocation3 + $0x10] sm:$0xf] }
 0x129   : > { %9959 = vmatmul.mubr.msk.bf16.vlgmr.msra.gmra.mrb[0].mxu0 %vm1017_vm5, %v8796_v17  ;;  %9992 = vmatprep.subr.bf16.mxu1 %v10698_v47 }
 0x12a   : > { %9967 = vmatpush3.bf16.msra.mxu0 %v10684_v2  ;;  %9962 = vmatprep.mubr.msk.bf16.mxu0 %vm1017_vm5, %v8797_v41  ;;  %v11760_v2 = vrot.slane %v4382_v60, 4 }
 0x12b   : > { %9968 = vmatprep.subr.bf16.mxu0 %v10685_v27 }
 0x12c   : > { %9993 = vmatpush3.bf16.msra.mxu1 %v10698_v47  ;;  %v4388_v19 = vor.u32 %v11762_v3, %v11760_v2 }
 0x12d   : > { %9994 = vmatprep.subr.bf16.mxu1 %v10700_v49 }
 0x12e   : > { %9969 = vmatpush3.bf16.msra.mxu0 %v10685_v27  ;;  %v4313_v27 = vld [vmem:[#allocation3 + $0x18] sm:$0xf] }
 0x12f   : > { %9970 = vmatprep.subr.bf16.mxu0 %v10686_v61 }
 0x130   : > { %9995 = vmatpush3.bf16.msra.mxu1 %v10700_v49 }
 0x131   : > { %9963 = vmatmul.mubr.msk.bf16.gmra.mrb[4].mxu0 %vm1017_vm5, %v8798_v31  ;;  %9996 = vmatprep.subr.bf16.mxu1 %v10702_v56 }
 0x132   : > { %9971 = vmatpush3.bf16.msra.mxu0 %v10686_v61  ;;  %9974 = vmatprep.mubr.msk.bf16.mxu0 %vm1017_vm5, %v8815_v52  ;;  %v4391_v61 = vshll.u32 %v11764_v7, 16 }
 0x133   : > { %9972 = vmatprep.subr.bf16.mxu0 %v10687_v51 }
 0x134   : > { %9997 = vmatpush3.bf16.msra.mxu1 %v10702_v56 }
 0x135   : > { %10006 = vmatprep.subr.bf16.mxu1 %v11747_v23 }
 0x136   : > { %9973 = vmatpush3.bf16.msra.mxu0 %v10687_v51 }
 0x137   : > { %10174 = vmatprep.subr.bf16.mxu0 %v10689_v38 }
 0x139   : > { %9975 = vmatmul.mubr.msk.bf16.vlgmr.msra.gmra.mrb[0].mxu0 %vm1017_vm5, %v8816_v14 }
 0x13a   : > { %9978 = vmatprep.mubr.msk.bf16.mxu0 %vm1017_vm5, %v8817_v35  ;;  %10175 = vmatpush3.bf16.msra.mxu0 %v10689_v38  ;;  %v4319_v35 = vld [vmem:[#allocation3 + $0x20] sm:$0xf]  ;;  %v4322_v38 = vld [vmem:[#allocation3 + $0x24] sm:$0x1] }
 0x13b   : > { %10176 = vmatprep.subr.bf16.mxu0 %v10691_v29 }
 0x13e   : > { %10177 = vmatpush3.bf16.msra.mxu0 %v10691_v29 }
 0x13f   : > { %10178 = vmatprep.subr.bf16.mxu0 %v10693_v43 }
 0x141   : > { %9979 = vmatmul.mubr.msk.bf16.gmra.mrb[4].mxu0 %vm1017_vm5, %v8818_v33 }
 0x142   : > { %10179 = vmatpush3.bf16.msra.mxu0 %v10693_v43 }
 0x143   : > { %10180 = vmatprep.subr.bf16.mxu0 %v10695_v40 }
 0x146   : > { %10181 = vmatpush3.bf16.msra.mxu0 %v10695_v40 }
 0x147   : > { %10182 = vmatprep.subr.bf16.mxu0 %v10697_v46 }
 0x14a   : > { %10183 = vmatpush3.bf16.msra.mxu0 %v10697_v46  ;;  %v4310_v46 = vld [vmem:[#allocation3 + $0x14] sm:$0x1] }
 0x14b   : > { %10184 = vmatprep.subr.bf16.mxu0 %v10699_v26 }
 0x14e   : > { %10185 = vmatpush3.bf16.msra.mxu0 %v10699_v26 }
 0x14f   : > { %10186 = vmatprep.subr.bf16.mxu0 %v10701_v53 }
 0x152   : > { %10187 = vmatpush3.bf16.msra.mxu0 %v10701_v53 }
 0x153   : > { %10188 = vmatprep.subr.bf16.mxu0 %v10703_v57 }
 0x156   : > { %10189 = vmatpush3.bf16.msra.mxu0 %v10703_v57 }
 0x157   : > { %10198 = vmatprep.subr.bf16.mxu0 %v11753_v28 }
 0x20c   : > { %v9976_v63 = vpop.f32.mrb[0].mxu0 }
 0x20d   : > { %v4185_v54 = vmax.f32 %v9976_v63, 0.0  ;;  %v4124_v58 = vpop.f32.mrb[1].mxu0 }
 0x20e   : > { %v4183_v48 = vmax.f32 %v4124_v58, 0.0  ;;  %v9977_v0 = vpop.f32.mrb[2].mxu0 }
 0x20f   : > { %v9400_v4 = vpack.c.bf16 %v4185_v54, %v4185_v54  ;;  %v4186_v5 = vmax.f32 %v9977_v0, 0.0  ;;  %v4127_v16 = vpop.f32.mrb[3].mxu0 }
 0x210   : > { %v9398_v11 = vpack.c.bf16 %v4183_v48, %v4183_v48  ;;  %v4184_v12 = vmax.f32 %v4127_v16, 0.0 }
 0x211   : > { %v4232_v13 = vshrl.u32 %v9400_v4, 16  ;;  %v9401_v17 = vpack.c.bf16 %v4186_v5, %v4186_v5  ;;  %v4235_v18 = vshll.u32 %v9400_v4, 16  ;;  %v4337_v4 = vld [vmem:[#allocation3 + $0x38] sm:$0xf]  ;;  %v4340_v5 = vld [vmem:[#allocation3 + $0x3c] sm:$0x1] }
 0x212   : > { %v4216_v41 = vshrl.u32 %v9398_v11, 16  ;;  %v9399_v59 = vpack.c.bf16 %v4184_v12, %v4184_v12  ;;  %v4219_v39 = vshll.u32 %v9398_v11, 16  ;;  %v11796_v11 = vrot.slane %v4388_v19, 4 }
 0x213   : > { %v4234_v34 = vrot.slane %v4232_v13, 7  ;;  %v4240_v25 = vshrl.u32 %v9401_v17, 16  ;;  %v4243_v51 = vshll.u32 %v9401_v17, 16  ;;  %v11798_v12 = vrot.slane %v4391_v61, 5 }
 0x214   : > { %v4218_v31 = vrot.slane %v4216_v41, 7  ;;  %v4224_v52 = vshrl.u32 %v9399_v59, 16  ;;  %v4227_v62 = vshll.u32 %v9399_v59, 16  ;;  %v9980_v1 = vpop.f32.mrb[4].mxu0  ;;  %v4325_v41 = vld [vmem:[#allocation3 + $0x28] sm:$0xf] }
 0x215   : > { %v4237_v6 = vor.u32 %v4235_v18, %v4234_v34  ;;  %v4238_v8 = vrot.slane %v4234_v34, 4  ;;  %v4242_v14 = vrot.slane %v4240_v25, 7  ;;  %v4189_v10 = vmax.f32 %v9980_v1, 0.0  ;;  %v4140_v15 = vpop.f32.mrb[5].mxu0  ;;  %v4328_v59 = vld [vmem:[#allocation3 + $0x2c] sm:$0x1] }
 0x216   : > { %v4221_v33 = vor.u32 %v4219_v39, %v4218_v31  ;;  %v4222_v36 = vrot.slane %v4218_v31, 4  ;;  %v4226_v37 = vrot.slane %v4224_v52, 7  ;;  %v4187_v42 = vmax.f32 %v4140_v15, 0.0  ;;  %v9981_v29 = vpop.f32.mrb[6].mxu0  ;;  %v4343_v52 = vld [vmem:[#allocation3 + $0x40] sm:$0xf] }
 0x217   : > { %v4314_v32 = vsel %vm11770_vm2, %v4237_v6, %v4313_v27  ;;  %v4317_v43 = vsel %vm11776_vm6, %v4238_v8, %v4316_v50  ;;  %v4245_v44 = vor.u32 %v4243_v51, %v4242_v14  ;;  %v4246_v40 = vrot.slane %v4242_v14, 4  ;;  %v4143_v47 = vpop.f32.mrb[7].mxu0  ;;  %v4331_v15 = vld [vmem:[#allocation3 + $0x30] sm:$0xf] }
 0x218   : > { %4315 = vst [vmem:[#allocation3 + $0x18] sm:$0xf] %v4314_v32  ;;  %4318 = vst [vmem:[#allocation3 + $0x1c] sm:$0x1] %v4317_v43  ;;  %v4300_v26 = vsel %vm11770_vm2, %v4221_v33, %v4299_v22  ;;  %v4305_v49 = vsel %vm11776_vm6, %v4222_v36, %v4304_v24  ;;  %v4229_v53 = vor.u32 %v4227_v62, %v4226_v37  ;;  %v4230_v56 = vrot.slane %v4226_v37, 4 }
 0x219   : > { %4301 = vst [vmem:[#allocation3 + $0x8] sm:$0xf] %v4300_v26  ;;  %4306 = vst [vmem:[#allocation3 + $0xc] sm:$0x1] %v4305_v49  ;;  %v4320_v57 = vsel %vm11770_vm2, %v4245_v44, %v4319_v35  ;;  %v4323_v60 = vsel %vm11776_vm6, %v4246_v40, %v4322_v38  ;;  %v9404_v55 = vpack.c.bf16 %v4189_v10, %v4189_v10  ;;  %v4190_v48 = vmax.f32 %v9981_v29, 0.0 }
 0x21a   : > { %v9402_v63 = vpack.c.bf16 %v4187_v42, %v4187_v42  ;;  %4321 = vst [vmem:[#allocation3 + $0x20] sm:$0xf] %v4320_v57  ;;  %4324 = vst [vmem:[#allocation3 + $0x24] sm:$0x1] %v4323_v60  ;;  %v4308_v54 = vsel %vm11770_vm2, %v4229_v53, %v4307_v45  ;;  %v4311_v58 = vsel %vm11776_vm6, %v4230_v56, %v4310_v46  ;;  %v4188_v0 = vmax.f32 %v4143_v47, 0.0 }
 0x21b   : > { %4309 = vst [vmem:[#allocation3 + $0x10] sm:$0xf] %v4308_v54  ;;  %4312 = vst [vmem:[#allocation3 + $0x14] sm:$0x1] %v4311_v58  ;;  %v4264_v2 = vshrl.u32 %v9404_v55, 16  ;;  %v9405_v16 = vpack.c.bf16 %v4190_v48, %v4190_v48  ;;  %v4267_v17 = vshll.u32 %v9404_v55, 16  ;;  %v4394_v60 = vsel %vm10991_vm14, %v11796_v11, %v11798_v12 }
 0x21c   : > { %v4248_v3 = vshrl.u32 %v9402_v63, 16  ;;  %v9403_v7 = vpack.c.bf16 %v4188_v0, %v4188_v0  ;;  %v4251_v50 = vshll.u32 %v9402_v63, 16  ;;  %v4346_v10 = vld [vmem:[#allocation3 + $0x44] sm:$0x1]  ;;  %v4334_v33 = vld [vmem:[#allocation3 + $0x34] sm:$0x1] }
 0x21d   : > { %v4266_v13 = vrot.slane %v4264_v2, 7  ;;  %v4272_v34 = vshrl.u32 %v9405_v16, 16  ;;  %v4275_v18 = vshll.u32 %v9405_v16, 16 }
 0x21e   : > { %v4250_v27 = vrot.slane %v4248_v3, 7  ;;  %v4256_v39 = vshrl.u32 %v9403_v7, 16  ;;  %v4259_v22 = vshll.u32 %v9403_v7, 16 }
 0x21f   : > { %v4269_v24 = vor.u32 %v4267_v17, %v4266_v13  ;;  %v4270_v25 = vrot.slane %v4266_v13, 4  ;;  %v4274_v62 = vrot.slane %v4272_v34, 7  ;;  %v11812_v32 = vld [vmem:[#allocation3 + $0x18] sm:$0xf]  ;;  %v4376_v56 = vld [vmem:[#allocation3 + $0x1c] sm:$0x1] }
 0x220   : > { %v4253_v31 = vor.u32 %v4251_v50, %v4250_v27  ;;  %v4254_v51 = vrot.slane %v4250_v27, 4  ;;  %v4258_v19 = vrot.slane %v4256_v39, 7  ;;  %v11800_v1 = vld [vmem:[#allocation3 + $0x8] sm:$0xf]  ;;  %v4374_v61 = vld [vmem:[#allocation3 + $0xc] sm:$0x1] }
 0x221   : > { %v4338_v6 = vsel %vm11770_vm2, %v4269_v24, %v4337_v4  ;;  %v4341_v8 = vsel %vm11776_vm6, %v4270_v25, %v4340_v5  ;;  %v4277_v36 = vor.u32 %v4275_v18, %v4274_v62  ;;  %v4278_v38 = vrot.slane %v4274_v62, 4  ;;  %v11825_v57 = vld [vmem:[#allocation3 + $0x8] sm:$0xf]  ;;  %v6345_v20 = vld [vmem:[#allocation3 + $0xc] sm:$0x1] }
 0x222   : > { %v4326_v14 = vsel %vm11770_vm2, %v4253_v31, %v4325_v41  ;;  %v4329_v35 = vsel %vm11776_vm6, %v4254_v51, %v4328_v59  ;;  %4339 = vst [vmem:[#allocation3 + $0x38] sm:$0xf] %v4338_v6  ;;  %4342 = vst [vmem:[#allocation3 + $0x3c] sm:$0x1] %v4341_v8  ;;  %v4261_v37 = vor.u32 %v4259_v22, %v4258_v19  ;;  %v4262_v42 = vrot.slane %v4258_v19, 4 }
 0x223   : > { %4327 = vst [vmem:[#allocation3 + $0x28] sm:$0xf] %v4326_v14  ;;  %4330 = vst [vmem:[#allocation3 + $0x2c] sm:$0x1] %v4329_v35  ;;  %v11810_v29 = vld [vmem:[#allocation3 + $0x10] sm:$0xf]  ;;  %v4344_v47 = vsel %vm11770_vm2, %v4277_v36, %v4343_v52  ;;  %v4347_v26 = vsel %vm11776_vm6, %v4278_v38, %v4346_v10 }
 0x224   : > { %v4396_v43 = vshrl.u32 %v11800_v1, 16  ;;  %v4399_v44 = vshll.u32 %v11800_v1, 16  ;;  %v4405_v40 = vshll.u32 %v4374_v61, 16  ;;  %v4375_v45 = vld [vmem:[#allocation3 + $0x14] sm:$0x1]  ;;  %v4410_v46 = vshrl.u32 %v11810_v29, 16 }
 0x225   : > { %v4332_v49 = vsel %vm11770_vm2, %v4261_v37, %v4331_v15  ;;  %v4335_v53 = vsel %vm11776_vm6, %v4262_v42, %v4334_v33  ;;  %4345 = vst [vmem:[#allocation3 + $0x40] sm:$0xf] %v4344_v47  ;;  %4348 = vst [vmem:[#allocation3 + $0x44] sm:$0x1] %v4347_v26  ;;  %v4413_v58 = vshll.u32 %v11810_v29, 16  ;;  %v4419_v30 = vshll.u32 %v4375_v45, 16 }
 0x226   : > { %4333 = vst [vmem:[#allocation3 + $0x30] sm:$0xf] %v4332_v49  ;;  %4336 = vst [vmem:[#allocation3 + $0x34] sm:$0x1] %v4335_v53  ;;  %v4398_v55 = vrot.slane %v4396_v43, 4  ;;  %v4401_v63 = vrot.slane %v4399_v44, 5 }
 0x227   : > { %v4412_v54 = vrot.slane %v4410_v46, 4  ;;  %v4424_v48 = vshrl.u32 %v11812_v32, 16  ;;  %v4427_v0 = vshll.u32 %v11812_v32, 16  ;;  %v11834_v2 = vld [vmem:[#allocation3 + $0x10] sm:$0xf]  ;;  %v4407_v4 = vrot.slane %v4405_v40, 5 }
 0x228   : > { %v4402_v3 = vor.u32 %v4401_v63, %v4398_v55  ;;  %v6346_v5 = vld [vmem:[#allocation3 + $0x14] sm:$0x1]  ;;  %v6354_v16 = vshrl.u32 %v11825_v57, 16  ;;  %v6357_v7 = vshll.u32 %v11825_v57, 16  ;;  %v4415_v11 = vrot.slane %v4413_v58, 5  ;;  %v10706_v47 = vld [vmem:[%s12774_s2 + $0x8] sm:$0xff]  }
 0x229   : > { %v4426_v12 = vrot.slane %v4424_v48, 4  ;;  %v4429_v13 = vrot.slane %v4427_v0, 5  ;;  %v4433_v17 = vshll.u32 %v4376_v56, 16  ;;  %v4421_v50 = vrot.slane %v4419_v30, 5  ;;  %v11842_v52 = vld [vmem:[#allocation3 + $0x18] sm:$0xf] }
 0x22a   : > { %v4403_v27 = vrot.slane %v4402_v3, 4  ;;  %v6356_v41 = vrot.slane %v6354_v16, 4  ;;  %v6359_v59 = vrot.slane %v6357_v7, 5  ;;  %v4416_v34 = vor.u32 %v4415_v11, %v4412_v54  ;;  %v11844_v8 = vld [vmem:[#allocation3 + $0x20] sm:$0xf] }
 0x22b   : > { %v4430_v18 = vor.u32 %v4429_v13, %v4426_v12  ;;  %v6363_v39 = vshll.u32 %v6345_v20, 16  ;;  %v6368_v22 = vshrl.u32 %v11834_v2, 16  ;;  %v6371_v31 = vshll.u32 %v11834_v2, 16  ;;  %v6347_v15 = vld [vmem:[#allocation3 + $0x1c] sm:$0x1] }
 0x22c   : > { %v4408_v24 = vsel %vm10991_vm14, %v4403_v27, %v4407_v4  ;;  %v6360_v25 = vor.u32 %v6359_v59, %v6356_v41  ;;  %v6377_v51 = vshll.u32 %v6346_v5, 16  ;;  %v4417_v19 = vrot.slane %v4416_v34, 4  ;;  %v6348_v38 = vld [vmem:[#allocation3 + $0x24] sm:$0x1]  ;;  %v11852_v43 = vld [vmem:[#allocation3 + $0x20] sm:$0xf] }
 0x22d   : > { %v8851_v62 = vcombine.low %v4394_v60, %v4408_v24  ;;  %v4431_v61 = vrot.slane %v4430_v18, 4  ;;  %v4435_v6 = vrot.slane %v4433_v17, 5  ;;  %v6365_v14 = vrot.slane %v6363_v39, 5  ;;  %v4377_v60 = vld [vmem:[#allocation3 + $0x24] sm:$0x1]  ;;  %v10708_v5 = vld [vmem:[%s12774_s2 + $0x10] sm:$0xff]  }
 0x22e   : > { %v6370_v35 = vrot.slane %v6368_v22, 4  ;;  %v6373_v10 = vrot.slane %v6371_v31, 5  ;;  %v4422_v33 = vsel %vm10991_vm14, %v4417_v19, %v4421_v50  ;;  %v6382_v37 = vshrl.u32 %v11842_v52, 16  ;;  %v11859_v20 = vld [vmem:[#allocation3 + $0x28] sm:$0xf]  ;;  %v10712_v19 = vld [vmem:[%s12774_s2 + $0x18] sm:$0xff]  }
 0x22f   : > { %9998 = vmatprep.mubr.bf16.mxu1 %v8851_v62  ;;  %v4436_v36 = vsel %vm10991_vm14, %v4431_v61, %v4435_v6  ;;  %v6385_v42 = vshll.u32 %v11842_v52, 16  ;;  %v6361_v40 = vrot.slane %v6360_v25, 4  ;;  %v6379_v46 = vrot.slane %v6377_v51, 5  ;;  %v4378_v3 = vld [vmem:[#allocation3 + $0x2c] sm:$0x1] }
 0x230   : > { %v8852_v44 = vcombine.low %v4422_v33, %v4436_v36  ;;  %v6374_v45 = vor.u32 %v6373_v10, %v6370_v35  ;;  %v6384_v26 = vrot.slane %v6382_v37, 4  ;;  %v6396_v53 = vshrl.u32 %v11844_v8, 16  ;;  %v11873_v41 = vld [vmem:[#allocation3 + $0x38] sm:$0xf]  ;;  %v4379_v22 = vld [vmem:[#allocation3 + $0x34] sm:$0x1] }
 0x231   : > { %v6387_v49 = vrot.slane %v6385_v42, 5  ;;  %v6399_v56 = vshll.u32 %v11844_v8, 16  ;;  %v6391_v63 = vshll.u32 %v6347_v15, 16  ;;  %v6405_v54 = vshll.u32 %v6348_v38, 16  ;;  %v4380_v24 = vld [vmem:[#allocation3 + $0x3c] sm:$0x1] }
 0x232   : > { %9999 = vmatmul.mubr.bf16.vlgmr.msra.gmra.mrb[0].mxu1 %v8852_v44  ;;  %v6375_v55 = vrot.slane %v6374_v45, 4  ;;  %v4438_v58 = vshrl.u32 %v11852_v43, 16  ;;  %v6398_v48 = vrot.slane %v6396_v53, 4  ;;  %v4441_v4 = vshll.u32 %v11852_v43, 16  ;;  %v10707_v33 = vld [vmem:[%s12774_s2 + $0x208] sm:$0xff]  }
 0x233   : > { %10007 = vmatpush3.bf16.msra.mxu1 %v11747_v23  ;;  %v6388_v30 = vor.u32 %v6387_v49, %v6384_v26  ;;  %v6401_v0 = vrot.slane %v6399_v56, 5  ;;  %v6366_v16 = vsel %vm10991_vm14, %v6361_v40, %v6365_v14  ;;  %v4447_v12 = vshll.u32 %v4377_v60, 16  ;;  %v11871_v23 = vld [vmem:[#allocation3 + $0x30] sm:$0xf]  ;;  %v11889_v37 = vld [vmem:[#allocation3 + $0x28] sm:$0xf] }
 0x234   : > { %v6380_v7 = vsel %vm10991_vm14, %v6375_v55, %v6379_v46  ;;  %10008 = vmatprep.subr.bf16.mxu1 %v10706_v47  ;;  %v4440_v11 = vrot.slane %v4438_v58, 4  ;;  %v4443_v50 = vrot.slane %v4441_v4, 5  ;;  %v6393_v59 = vrot.slane %v6391_v63, 5  ;;  %v11893_v53 = vld [vmem:[#allocation3 + $0x30] sm:$0xf] }
 0x235   : > { %v9099_v13 = vcombine.low %v6366_v16, %v6380_v7  ;;  %v6389_v17 = vrot.slane %v6388_v30, 4  ;;  %v6402_v27 = vor.u32 %v6401_v0, %v6398_v48  ;;  %v6407_v34 = vrot.slane %v6405_v54, 5  ;;  %v10714_v54 = vld [vmem:[%s12774_s2 + $0x20] sm:$0xff]   ;;  %v6349_v48 = vld [vmem:[#allocation3 + $0x2c] sm:$0x1] }
 0x236   : > { %v4452_v18 = vshrl.u32 %v11859_v20, 16  ;;  %v4455_v39 = vshll.u32 %v11859_v20, 16  ;;  %v4444_v31 = vor.u32 %v4443_v50, %v4440_v11  ;;  %v4461_v51 = vshll.u32 %v4378_v3, 16  ;;  %v6350_v0 = vld [vmem:[#allocation3 + $0x34] sm:$0x1] }
 0x237   : > { %10190 = vmatprep.mubr.bf16.mxu0 %v9099_v13  ;;  %v6403_v25 = vrot.slane %v6402_v27, 4  ;;  %10009 = vmatpush3.bf16.msra.mxu1 %v10706_v47  ;;  %v4466_v62 = vshrl.u32 %v11871_v23, 16  ;;  %v4449_v61 = vrot.slane %v4447_v12, 5  ;;  %v4469_v35 = vshll.u32 %v11871_v23, 16  ;;  %v11909_v11 = vld [vmem:[#allocation3 + $0x38] sm:$0xf] }
 0x238   : > { %v4454_v6 = vrot.slane %v4452_v18, 4  ;;  %v4457_v14 = vrot.slane %v4455_v39, 5  ;;  %10010 = vmatprep.subr.bf16.mxu1 %v10708_v5  ;;  %v6394_v10 = vsel %vm10991_vm14, %v6389_v17, %v6393_v59  ;;  %v4445_v36 = vrot.slane %v4444_v31, 4  ;;  %v11912_v18 = vld [vmem:[#allocation3 + $0x40] sm:$0xf]  ;;  %v10716_v39 = vld [vmem:[%s12774_s2 + $0x28] sm:$0xff]  }
 0x239   : > { %v6408_v15 = vsel %vm10991_vm14, %v6403_v25, %v6407_v34  ;;  %v4468_v38 = vrot.slane %v4466_v62, 4  ;;  %v4471_v40 = vrot.slane %v4469_v35, 5  ;;  %v4480_v45 = vshrl.u32 %v11873_v41, 16 }
 0x23a   : > { %v9100_v42 = vcombine.low %v6394_v10, %v6408_v15  ;;  %v4458_v44 = vor.u32 %v4457_v14, %v4454_v6  ;;  %v4463_v46 = vrot.slane %v4461_v51, 5  ;;  %v4475_v47 = vshll.u32 %v4379_v22, 16  ;;  %v10713_v6 = vld [vmem:[%s12774_s2 + $0x218] sm:$0xff]   ;;  %v10718_v15 = vld [vmem:[%s12774_s2 + $0x30] sm:$0xff]  }
 0x23b   : > { %v4483_v26 = vshll.u32 %v11873_v41, 16  ;;  %v4489_v49 = vshll.u32 %v4380_v24, 16  ;;  %10011 = vmatpush3.bf16.msra.mxu1 %v10708_v5  ;;  %v4472_v60 = vor.u32 %v4471_v40, %v4468_v38  ;;  %v4482_v55 = vrot.slane %v4480_v45, 4 }
 0x23c   : > { %10191 = vmatmul.mubr.bf16.vlgmr.msra.gmra.mrb[8].mxu0 %v9100_v42  ;;  %v4459_v56 = vrot.slane %v4458_v44, 4  ;;  %v6410_v63 = vshrl.u32 %v11889_v37, 16  ;;  %10012 = vmatprep.subr.bf16.mxu1 %v10712_v19  ;;  %v4450_v58 = vsel %vm10991_vm14, %v4445_v36, %v4449_v61  ;;  %v6413_v3 = vshll.u32 %v11889_v37, 16  ;;  %v6351_v42 = vld [vmem:[#allocation3 + $0x3c] sm:$0x1] }
 0x23d   : > { %10199 = vmatpush3.bf16.msra.mxu0 %v11753_v28  ;;  %v4485_v30 = vrot.slane %v4483_v26, 5  ;;  %v4473_v5 = vrot.slane %v4472_v60, 4  ;;  %v6424_v7 = vshrl.u32 %v11893_v53, 16  ;;  %v10709_v28 = vld [vmem:[%s12774_s2 + $0x210] sm:$0xff]   ;;  %v4477_v13 = vrot.slane %v4475_v47, 5 }
 0x23e   : > { %10200 = vmatprep.subr.bf16.mxu0 %v10707_v33  ;;  %v4464_v4 = vsel %vm10991_vm14, %v4459_v56, %v4463_v46  ;;  %v6412_v16 = vrot.slane %v6410_v63, 4  ;;  %v6415_v27 = vrot.slane %v6413_v3, 5  ;;  %v4491_v50 = vrot.slane %v4489_v49, 5  ;;  %v6352_v44 = vld [vmem:[#allocation3 + $0x44] sm:$0x1] }
 0x23f   : > { %v8853_v12 = vcombine.low %v4450_v58, %v4464_v4  ;;  %v4486_v17 = vor.u32 %v4485_v30, %v4482_v55  ;;  %10013 = vmatpush3.bf16.msra.mxu1 %v10712_v19  ;;  %v6426_v59 = vrot.slane %v6424_v7, 4  ;;  %v6427_v34 = vshll.u32 %v11893_v53, 16  ;;  %v10715_v55 = vld [vmem:[%s12774_s2 + $0x220] sm:$0xff]   ;;  %v10720_v30 = vld [vmem:[%s12774_s2 + $0x38] sm:$0xff]   ;;  %v10717_v4 = vld [vmem:[%s12774_s2 + $0x228] sm:$0xff]  }
 0x240   : > { %10014 = vmatprep.subr.bf16.mxu1 %v10714_v54  ;;  %v4478_v22 = vsel %vm10991_vm14, %v4473_v5, %v4477_v13  ;;  %v6416_v25 = vor.u32 %v6415_v27, %v6412_v16  ;;  %v6438_v31 = vshrl.u32 %v11909_v11, 16  ;;  %v6419_v51 = vshll.u32 %v6349_v48, 16  ;;  %v10719_v27 = vld [vmem:[%s12774_s2 + $0x230] sm:$0xff]  }
 0x241   : > { %10201 = vmatpush3.bf16.msra.mxu0 %v10707_v33  ;;  %10002 = vmatprep.mubr.bf16.mxu1 %v8853_v12  ;;  %v4487_v24 = vrot.slane %v4486_v17, 4  ;;  %v6429_v62 = vrot.slane %v6427_v34, 5  ;;  %v6433_v19 = vshll.u32 %v6350_v0, 16  ;;  %v6441_v61 = vshll.u32 %v11909_v11, 16  ;;  %v10728_v34 = vld [vmem:[%s12774_s2 + $0x88] sm:$0xff]  }
 0x242   : > { %10202 = vmatprep.subr.bf16.mxu0 %v10709_v28  ;;  %v6440_v35 = vrot.slane %v6438_v31, 4  ;;  %v6452_v10 = vshrl.u32 %v11912_v18, 16  ;;  %v6417_v36 = vrot.slane %v6416_v25, 4  ;;  %v8863_v45 = vcombine.low %v11756_v21, %v11800_v1  ;;  %v4948_v31 = vld [vmem:[#allocation3 + $0x10] sm:$0xf] }
 0x243   : > { %v4492_v14 = vsel %vm10991_vm14, %v4487_v24, %v4491_v50  ;;  %10015 = vmatpush3.bf16.msra.mxu1 %v10714_v54  ;;  %v6430_v38 = vor.u32 %v6429_v62, %v6426_v59  ;;  %v6443_v40 = vrot.slane %v6441_v61, 5  ;;  %v6455_v47 = vshll.u32 %v11912_v18, 16  ;;  %v10729_v24 = vld [vmem:[%s12774_s2 + $0x288] sm:$0xff]   ;;  %v10744_v61 = vld [vmem:[%s12774_s2 + $0xb8] sm:$0xff]  }
 0x244   : > { %v8854_v33 = vcombine.low %v4478_v22, %v4492_v14  ;;  %10016 = vmatprep.subr.bf16.mxu1 %v10716_v39  ;;  %v6454_v46 = vrot.slane %v6452_v10, 4  ;;  %v6421_v26 = vrot.slane %v6419_v51, 5  ;;  %v6435_v56 = vrot.slane %v6433_v19, 5  ;;  %v10742_v51 = vld [vmem:[%s12774_s2 + $0xb0] sm:$0xff]   ;;  %v4946_v62 = vld [vmem:[#allocation3 + $0x8] sm:$0xf] }
 0x245   : > { %10203 = vmatpush3.bf16.msra.mxu0 %v10709_v28  ;;  %v6431_v49 = vrot.slane %v6430_v38, 4  ;;  %v6444_v60 = vor.u32 %v6443_v40, %v6440_v35  ;;  %v6447_v63 = vshll.u32 %v6351_v42, 16  ;;  %v6457_v54 = vrot.slane %v6455_v47, 5  ;;  %v10723_v28 = vld [vmem:[%s12774_s2 + $0x80] sm:$0xff]   ;;  %v10741_v35 = vld [vmem:[%s12774_s2 + $0x2a8] sm:$0xff]   ;;  %v10743_v40 = vld [vmem:[%s12774_s2 + $0x2b0] sm:$0xff]  }
 0x246   : > { %10003 = vmatmul.mubr.bf16.gmra.mrb[4].mxu1 %v8854_v33  ;;  %10204 = vmatprep.subr.bf16.mxu0 %v10713_v6  ;;  %v6461_v58 = vshll.u32 %v6352_v44, 16  ;;  %v6422_v21 = vsel %vm10991_vm14, %v6417_v36, %v6421_v26  ;;  %v9111_v50 = vcombine.low %v11825_v57, %v11834_v2  ;;  %v8864_v59 = vcombine.low %v11810_v29, %v11812_v32  ;;  %v10721_v57 = vld [vmem:[%s12774_s2 + $0x238] sm:$0xff]   ;;  %v10731_v29 = vld [vmem:[%s12774_s2 + $0x90] sm:$0xff]   ;;  %v10726_v32 = vld [vmem:[%s12774_s2 + $0x280] sm:$0xff]  }
 0x247   : > { %10022 = vmatprep.mubr.bf16.mxu1 %v8863_v45  ;;  %10017 = vmatpush3.bf16.msra.mxu1 %v10716_v39  ;;  %v6436_v1 = vsel %vm10991_vm14, %v6431_v49, %v6435_v56  ;;  %v6445_v0 = vrot.slane %v6444_v60, 4  ;;  %v6458_v3 = vor.u32 %v6457_v54, %v6454_v46  ;;  %v6449_v5 = vrot.slane %v6447_v63, 5  ;;  %v10747_v33 = vld [vmem:[%s12774_s2 + $0xc0] sm:$0xff]   ;;  %v4949_v42 = vld [vmem:[#allocation3 + $0x14] sm:$0x1]  ;;  %v10752_v49 = vld [vmem:[%s12774_s2 + $0xc8] sm:$0xff]  }
 0x248   : > { %10018 = vmatprep.subr.bf16.mxu1 %v10718_v15  ;;  %v9101_v48 = vcombine.low %v6422_v21, %v6436_v1  ;;  %v6463_v7 = vrot.slane %v6461_v58, 5  ;;  %v8865_v39 = vcombine.low %v11852_v43, %v11859_v20  ;;  %v8866_v2 = vcombine.low %v11871_v23, %v11873_v41  ;;  %v10736_v43 = vld [vmem:[%s12774_s2 + $0x98] sm:$0xff]   ;;  %v10732_v20 = vld [vmem:[#allocation3 + $0x8] ss:$8 sps:$4 sm:$0xff]   ;;  %v10738_v23 = vld [vmem:[%s12774_s2 + $0xa0] sm:$0xff]  }
 0x249   : > { %10205 = vmatpush3.bf16.msra.mxu0 %v10713_v6  ;;  %v6459_v16 = vrot.slane %v6458_v3, 4  ;;  %v6450_v12 = vsel %vm10991_vm14, %v6445_v0, %v6449_v5  ;;  %v9112_v22 = vcombine.low %v11842_v52, %v11844_v8  ;;  %v9113_v25 = vcombine.low %v11889_v37, %v11893_v53  ;;  %v10734_v52 = vld [vmem:[%s12774_s2 + $0x290] sm:$0xff]   ;;  %v10740_v8 = vld [vmem:[%s12774_s2 + $0xa8] sm:$0xff]   ;;  %v10737_v37 = vld [vmem:[%s12774_s2 + $0x298] sm:$0xff]  }
 0x24a   : > { %10206 = vmatprep.subr.bf16.mxu0 %v10715_v55  ;;  %10194 = vmatprep.mubr.bf16.mxu0 %v9101_v48  ;;  %v9114_v41 = vcombine.low %v11909_v11, %v11912_v18  ;;  %v10735_v53 = vld [vmem:[#allocation3 + $0x10] ss:$8 sps:$4 sm:$0xff]   ;;  %v10739_v11 = vld [vmem:[%s12774_s2 + $0x2a0] sm:$0xff]   ;;  %v4977_v18 = vshrl.u32 %v4948_v31, 16  ;;  %v4980_v19 = vshll.u32 %v4948_v31, 16  ;;  %v4963_v6 = vshrl.u32 %v4946_v62, 16 }
 0x24b   : > { %10019 = vmatpush3.bf16.msra.mxu1 %v10718_v15  ;;  %v6464_v13 = vsel %vm10991_vm14, %v6459_v16, %v6463_v7  ;;  %v4966_v14 = vshll.u32 %v4946_v62, 16  ;;  %v6919_v44 = vld [vmem:[#allocation3 + $0x10] sm:$0xf]  ;;  %v4947_v45 = vld [vmem:[#allocation3 + $0xc] sm:$0x1]  ;;  %v4986_v60 = vshll.u32 %v4949_v42, 16 }
 0x24c   : > { %10020 = vmatprep.subr.bf16.mxu1 %v10720_v30  ;;  %v9102_v17 = vcombine.low %v6450_v12, %v6464_v13  ;;  %v4979_v10 = vrot.slane %v4977_v18, 4  ;;  %v4982_v15 = vrot.slane %v4980_v19, 5  ;;  %v4965_v36 = vrot.slane %v4963_v6, 4  ;;  %v6921_v47 = vld [vmem:[#allocation3 + $0x18] sm:$0xf]  ;;  %v10755_v3 = vld [vmem:[%s12774_s2 + $0xd0] sm:$0xff]  }
 0x24d   : > { %10207 = vmatpush3.bf16.msra.mxu0 %v10715_v55  ;;  %v4968_v38 = vrot.slane %v4966_v14, 5  ;;  %v10746_v26 = vld [vmem:[#allocation3 + $0x18] ss:$8 sps:$4 sm:$0xff]   ;;  %v6936_v55 = vshrl.u32 %v6919_v44, 16  ;;  %v6939_v63 = vshll.u32 %v6919_v44, 16  ;;  %v4972_v58 = vshll.u32 %v4947_v45, 16 }
 0x24e   : > { %10208 = vmatprep.subr.bf16.mxu0 %v10717_v4  ;;  %10195 = vmatmul.mubr.bf16.gmra.mrb[12].mxu0 %v9102_v17  ;;  %v4983_v46 = vor.u32 %v4982_v15, %v4979_v10  ;;  %v10748_v54 = vld [vmem:[#allocation3 + $0x28] ss:$8 sps:$4 sm:$0xff]   ;;  %v10745_v21 = vld [vmem:[%s12774_s2 + $0x2b8] sm:$0xff]   ;;  %v6953_v48 = vshll.u32 %v6921_v47, 16  ;;  %v4988_v5 = vrot.slane %v4986_v60, 5  ;;  %v10750_v13 = vld [vmem:[%s12774_s2 + $0x2c0] sm:$0xff]  }
 0x24f   : > { %10021 = vmatpush3.bf16.msra.mxu1 %v10720_v30  ;;  %10214 = vmatprep.mubr.bf16.mxu0 %v9111_v50  ;;  %v4969_v56 = vor.u32 %v4968_v38, %v4965_v36  ;;  %v6950_v30 = vshrl.u32 %v6921_v47, 16  ;;  %v4950_v0 = vld [vmem:[#allocation3 + $0x18] sm:$0xf]  ;;  %v6938_v16 = vrot.slane %v6936_v55, 4  ;;  %v6941_v7 = vrot.slane %v6939_v63, 5  ;;  %v10760_v14 = vld [vmem:[%s12774_s2 + $0xe0] sm:$0xff]  }
 0x250   : > { %10030 = vmatprep.subr.bf16.mxu1 %v10723_v28  ;;  %v4984_v1 = vrot.slane %v4983_v46, 4  ;;  %v4991_v12 = vshrl.u32 %v4950_v0, 16  ;;  %v6955_v50 = vrot.slane %v6953_v48, 5  ;;  %v12044_v62 = vld [vmem:[#allocation3 + $0x4] sm:$0x1]  ;;  %v10757_v44 = vld [vmem:[%s12774_s2 + $0x2d0] sm:$0xff]  }
 0x251   : > { %10209 = vmatpush3.bf16.msra.mxu0 %v10717_v4  ;;  %v4970_v4 = vrot.slane %v4969_v56, 4  ;;  %v4953_v10 = vld [vmem:[#allocation3 + $0x24] sm:$0x1]  ;;  %v4954_v36 = vld [vmem:[#allocation3 + $0x28] sm:$0xf]  ;;  %v5462_v56 = vrot.slane %v12044_v62, 5 }
 0x252   : > { %10210 = vmatprep.subr.bf16.mxu0 %v10719_v27  ;;  %10023 = vmatmul.mubr.bf16.vlgmr.msra.gmra.mrb[0].mxu1 %v8864_v59  ;;  %v4989_v17 = vsel %vm10991_vm14, %v4984_v1, %v4988_v5  ;;  %v4952_v59 = vld [vmem:[#allocation3 + $0x20] sm:$0xf]  ;;  %v10762_v63 = vld [vmem:[%s12774_s2 + $0xe8] sm:$0xff]  }
 0x253   : > { %10026 = vmatprep.mubr.bf16.mxu1 %v8865_v39  ;;  %10031 = vmatpush3.bf16.msra.mxu1 %v10723_v28  ;;  %v4974_v28 = vrot.slane %v4972_v58, 5  ;;  %v6920_v39 = vld [vmem:[#allocation3 + $0x14] sm:$0x1]  ;;  %v5019_v58 = vshrl.u32 %v4954_v36, 16  ;;  %v10756_v1 = vld [vmem:[#allocation3 + $0x40] ss:$8 sps:$4 sm:$0xff]  }
 0x254   : > { %10032 = vmatprep.subr.bf16.mxu1 %v10728_v34 }
 0x255   : > { %10211 = vmatpush3.bf16.msra.mxu0 %v10719_v27  ;;  %v6952_v27 = vrot.slane %v6950_v30, 4  ;;  %v10759_v30 = vld [vmem:[%s12774_s2 + $0x2d8] sm:$0xff]  }
 0x256   : > { %10212 = vmatprep.subr.bf16.mxu0 %v10721_v57 }
 0x257   : > { %10033 = vmatpush3.bf16.msra.mxu1 %v10728_v34  ;;  %v4994_v34 = vshll.u32 %v4950_v0, 16 }
 0x258   : > { %10034 = vmatprep.subr.bf16.mxu1 %v10731_v29 }
 0x259   : > { %10213 = vmatpush3.bf16.msra.mxu0 %v10721_v57  ;;  %v12032_v57 = vld [vmem:[#allocation3 + $0x48] sm:$0xf]  ;;  %v4996_v31 = vrot.slane %v4994_v34, 5 }
 0x25a   : > { %10222 = vmatprep.subr.bf16.mxu0 %v10726_v32  ;;  %10027 = vmatmul.mubr.bf16.gmra.mrb[4].mxu1 %v8866_v2  ;;  %v6922_v2 = vld [vmem:[#allocation3 + $0x1c] sm:$0x1]  ;;  %v7034_v19 = vshrl.u32 %v12032_v57, 16 }
 0x25b   : > { %10035 = vmatpush3.bf16.msra.mxu1 %v10731_v29  ;;  %10046 = vmatprep.mubr.bf16.mxu1 %v10732_v20  ;;  %v10754_v29 = vld [vmem:[#allocation3 + $0x38] ss:$8 sps:$4 sm:$0xff]   ;;  %v6959_v18 = vshll.u32 %v6922_v2, 16 }
 0x25c   : > { %10215 = vmatmul.mubr.bf16.vlgmr.msra.gmra.mrb[8].mxu0 %v9112_v22  ;;  %10036 = vmatprep.subr.bf16.mxu1 %v10736_v43  ;;  %v10758_v20 = vld [vmem:[%s12774_s2 + $0xd8] sm:$0xff]   ;;  %v10749_v22 = vld [vmem:[#allocation3 + $0x20] ss:$8 sps:$4 sm:$0xff]   ;;  %v12056_v60 = vrot.slane %v7034_v19, 4 }
 0x25d   : > { %10218 = vmatprep.mubr.bf16.mxu0 %v9113_v25  ;;  %10223 = vmatpush3.bf16.msra.mxu0 %v10726_v32  ;;  %v4975_v32 = vsel %vm10991_vm14, %v4970_v4, %v4974_v28  ;;  %v5005_v25 = vshrl.u32 %v4952_v59, 16  ;;  %v12075_v28 = vld [vmem:[#allocation3 + $0x2c] sm:$0x1] }
 0x25e   : > { %10224 = vmatprep.subr.bf16.mxu0 %v10729_v24 }
 0x25f   : > { %10037 = vmatpush3.bf16.msra.mxu1 %v10736_v43  ;;  %v6942_v43 = vor.u32 %v6941_v7, %v6938_v16  ;;  %v5007_v15 = vrot.slane %v5005_v25, 4  ;;  %v10764_v16 = vld [vmem:[%s12774_s2 + $0xf0] sm:$0xff]  }
 0x260   : > { %10038 = vmatprep.subr.bf16.mxu1 %v10738_v23 }
 0x261   : > { %10225 = vmatpush3.bf16.msra.mxu0 %v10729_v24  ;;  %v8919_v24 = vcombine.low %v4975_v32, %v4989_v17  ;;  %v6943_v6 = vrot.slane %v6942_v43, 4  ;;  %v4957_v17 = vld [vmem:[#allocation3 + $0x34] sm:$0x1]  ;;  %v6927_v43 = vld [vmem:[#allocation3 + $0x30] sm:$0xf] }
 0x262   : > { %10226 = vmatprep.subr.bf16.mxu0 %v10734_v52 }
 0x263   : > { %10039 = vmatpush3.bf16.msra.mxu1 %v10738_v23  ;;  %v5008_v23 = vshll.u32 %v4952_v59, 16 }
 0x264   : > { %10219 = vmatmul.mubr.bf16.gmra.mrb[12].mxu0 %v9114_v41  ;;  %10040 = vmatprep.subr.bf16.mxu1 %v10740_v8  ;;  %v6945_v41 = vshll.u32 %v6920_v39, 16  ;;  %v5021_v39 = vrot.slane %v5019_v58, 4  ;;  %v10765_v58 = vld [vmem:[%s12774_s2 + $0x2f0] sm:$0xff]  }
 0x265   : > { %10227 = vmatpush3.bf16.msra.mxu0 %v10734_v52  ;;  %10238 = vmatprep.mubr.bf16.mxu0 %v10735_v53  ;;  %v12039_v52 = vld [vmem:[#allocation3] sm:$0xe]  ;;  %v4993_v53 = vrot.slane %v4991_v12, 4 }
 0x266   : > { %10228 = vmatprep.subr.bf16.mxu0 %v10737_v37  ;;  %v8947_v47 = vrot.slane %v12039_v52, 9  ;;  %v4960_v12 = vld [vmem:[#allocation3 + $0x40] sm:$0xf]  ;;  %v6932_v52 = vld [vmem:[#allocation3 + $0x44] sm:$0x1] }
 0x267   : > { %10041 = vmatpush3.bf16.msra.mxu1 %v10740_v8  ;;  %v10753_v8 = vld [vmem:[%s12774_s2 + $0x2c8] sm:$0xff]   ;;  %v4997_v46 = vor.u32 %v4996_v31, %v4993_v53  ;;  %v6929_v31 = vld [vmem:[#allocation3 + $0x38] sm:$0xf] }
 0x268   : > { %10042 = vmatprep.subr.bf16.mxu1 %v10742_v51 }
 0x269   : > { %10229 = vmatpush3.bf16.msra.mxu0 %v10737_v37  ;;  %v6956_v37 = vor.u32 %v6955_v50, %v6952_v27  ;;  %v12073_v7 = vrot.slane %v4997_v46, 4  ;;  %v6923_v27 = vld [vmem:[#allocation3 + $0x20] sm:$0xf]  ;;  %v6925_v50 = vld [vmem:[#allocation3 + $0x28] sm:$0xf]  ;;  %v7009_v46 = vshll.u32 %v6929_v31, 16 }
 0x26a   : > { %10230 = vmatprep.subr.bf16.mxu0 %v10739_v11  ;;  %v6964_v53 = vshrl.u32 %v6923_v27, 16 }
 0x26b   : > { %10043 = vmatpush3.bf16.msra.mxu1 %v10742_v51  ;;  %v4956_v51 = vld [vmem:[#allocation3 + $0x30] sm:$0xf]  ;;  %v6957_v45 = vrot.slane %v6956_v37, 4  ;;  %v5042_v37 = vshll.u32 %v4957_v17, 16 }
 0x26c   : > { %10044 = vmatprep.subr.bf16.mxu1 %v10744_v61  ;;  %v5033_v38 = vshrl.u32 %v4956_v51, 16  ;;  %v5036_v42 = vshll.u32 %v4956_v51, 16 }
 0x26d   : > { %10231 = vmatpush3.bf16.msra.mxu0 %v10739_v11  ;;  %v10751_v11 = vld [vmem:[#allocation3 + $0x30] ss:$8 sps:$4 sm:$0xff]  }
 0x26e   : > { %10232 = vmatprep.subr.bf16.mxu0 %v10741_v35  ;;  %v5035_v0 = vrot.slane %v5033_v38, 4  ;;  %v10768_v38 = vld [vmem:[%s12774_s2 + $0x140] sm:$0xff]  }
 0x26f   : > { %10045 = vmatpush3.bf16.msra.mxu1 %v10744_v61  ;;  %v7037_v61 = vshll.u32 %v12032_v57, 16 }
 0x270   : > { %10054 = vmatprep.subr.bf16.mxu1 %v10747_v33 }
 0x271   : > { %10233 = vmatpush3.bf16.msra.mxu0 %v10741_v35  ;;  %v4951_v35 = vld [vmem:[#allocation3 + $0x1c] sm:$0x1]  ;;  %v12066_v4 = vrot.slane %v7037_v61, 5  ;;  %v6967_v61 = vshll.u32 %v6923_v27, 16 }
 0x272   : > { %10234 = vmatprep.subr.bf16.mxu0 %v10743_v40  ;;  %10047 = vmatmul.mubr.bf16.vlgmr.msra.gmra.mrb[0].mxu1 %v10746_v26  ;;  %v6961_v26 = vrot.slane %v6959_v18, 5  ;;  %v10766_v18 = vld [vmem:[%s12774_s2 + $0xf8] sm:$0xff]  }
 0x273   : > { %10050 = vmatprep.mubr.bf16.mxu1 %v10748_v54  ;;  %10055 = vmatpush3.bf16.msra.mxu1 %v10747_v33  ;;  %v5010_v33 = vrot.slane %v5008_v23, 5  ;;  %v5014_v54 = vshll.u32 %v4953_v10, 16  ;;  %v5028_v23 = vshll.u32 %v12075_v28, 16  ;;  %v6928_v28 = vld [vmem:[#allocation3 + $0x34] sm:$0x1] }
 0x274   : > { %10056 = vmatprep.subr.bf16.mxu1 %v10752_v49  ;;  %v6962_v5 = vsel %vm10991_vm14, %v6957_v45, %v6961_v26  ;;  %v7006_v45 = vshrl.u32 %v6929_v31, 16  ;;  %v5044_v26 = vrot.slane %v5042_v37, 5 }
 0x275   : > { %10235 = vmatpush3.bf16.msra.mxu0 %v10743_v40  ;;  %v6947_v40 = vrot.slane %v6945_v41, 5  ;;  %v5011_v48 = vor.u32 %v5010_v33, %v5007_v15  ;;  %v5016_v34 = vrot.slane %v5014_v54, 5  ;;  %v6981_v41 = vshll.u32 %v6925_v50, 16 }
 0x276   : > { %10236 = vmatprep.subr.bf16.mxu0 %v10745_v21  ;;  %v7008_v27 = vrot.slane %v7006_v45, 4 }
 0x277   : > { %10057 = vmatpush3.bf16.msra.mxu1 %v10752_v49  ;;  %v5000_v49 = vshll.u32 %v4951_v35, 16  ;;  %v6948_v55 = vsel %vm10991_vm14, %v6943_v6, %v6947_v40  ;;  %v5012_v32 = vrot.slane %v5011_v48, 4  ;;  %v6992_v6 = vshrl.u32 %v6927_v43, 16  ;;  %v10763_v35 = vld [vmem:[%s12774_s2 + $0x2e8] sm:$0xff]  }
 0x278   : > { %10058 = vmatprep.subr.bf16.mxu1 %v10755_v3  ;;  %v6983_v40 = vrot.slane %v6981_v41, 5  ;;  %v7001_v41 = vshll.u32 %v6928_v28, 16 }
 0x279   : > { %10237 = vmatpush3.bf16.msra.mxu0 %v10745_v21  ;;  %v5022_v21 = vshll.u32 %v4954_v36, 16  ;;  %v5002_v59 = vrot.slane %v5000_v49, 5  ;;  %v5017_v10 = vsel %vm10991_vm14, %v5012_v32, %v5016_v34  ;;  %v12097_v49 = vrot.slane %v6964_v53, 4  ;;  %v12105_v34 = vld [vmem:[#allocation3 + $0xc] sm:$0x1] }
 0x27a   : > { %10246 = vmatprep.subr.bf16.mxu0 %v10750_v13  ;;  %10051 = vmatmul.mubr.bf16.gmra.mrb[4].mxu1 %v10754_v29  ;;  %v4958_v29 = vld [vmem:[#allocation3 + $0x38] sm:$0xf] }
 0x27b   : > { %10059 = vmatpush3.bf16.msra.mxu1 %v10755_v3  ;;  %10070 = vmatprep.mubr.bf16.mxu1 %v8919_v24  ;;  %v5038_v3 = vrot.slane %v5036_v42, 5  ;;  %v5024_v57 = vrot.slane %v5022_v21, 5  ;;  %v10761_v24 = vld [vmem:[%s12774_s2 + $0x2e0] sm:$0xff]   ;;  %v5003_v25 = vsel %vm10991_vm14, %v12073_v7, %v5002_v59  ;;  %v5047_v51 = vshrl.u32 %v4958_v29, 16  ;;  %v4959_v59 = vld [vmem:[#allocation3 + $0x3c] sm:$0x1] }
 0x27c   : > { %10239 = vmatmul.mubr.bf16.vlgmr.msra.gmra.mrb[8].mxu0 %v10749_v22  ;;  %10060 = vmatprep.subr.bf16.mxu1 %v10758_v20  ;;  %v5064_v22 = vshll.u32 %v4960_v12, 16  ;;  %v12095_v42 = vld [vmem:[#allocation3 + $0x24] sm:$0x1]  ;;  %v5056_v37 = vshll.u32 %v4959_v59, 16 }
 0x27d   : > { %10242 = vmatprep.mubr.bf16.mxu0 %v10751_v11  ;;  %10247 = vmatpush3.bf16.msra.mxu0 %v10750_v13  ;;  %v9167_v13 = vcombine.low %v6948_v55, %v6962_v5  ;;  %v5039_v2 = vor.u32 %v5038_v3, %v5035_v0  ;;  %v5050_v11 = vshll.u32 %v4958_v29, 16  ;;  %v5025_v19 = vor.u32 %v5024_v57, %v5021_v39  ;;  %v4961_v55 = vld [vmem:[#allocation3 + $0x44] sm:$0x1]  ;;  %v6931_v0 = vld [vmem:[#allocation3 + $0x40] sm:$0xf] }
 0x27e   : > { %10248 = vmatprep.subr.bf16.mxu0 %v10753_v8  ;;  %v5066_v36 = vrot.slane %v5064_v22, 5  ;;  %v8920_v3 = vcombine.low %v5003_v25, %v5017_v10  ;;  %v5030_v5 = vrot.slane %v5028_v23, 5  ;;  %v6973_v7 = vshll.u32 %v12095_v42, 16  ;;  %v5434_v29 = vld [vmem:[#allocation3 + $0x8] sm:$0xe]  ;;  %v10770_v42 = vld [vmem:[%s12774_s2 + $0x150] sm:$0xff]  }
 0x27f   : > { %10061 = vmatpush3.bf16.msra.mxu1 %v10758_v20  ;;  %v5061_v20 = vshrl.u32 %v4960_v12, 16  ;;  %v5040_v15 = vrot.slane %v5039_v2, 4  ;;  %v5052_v54 = vrot.slane %v5050_v11, 5  ;;  %v5026_v21 = vrot.slane %v5025_v19, 4  ;;  %v10769_v25 = vld [vmem:[%s12774_s2 + $0x148] sm:$0xff]  }
 0x280   : > { %10062 = vmatprep.subr.bf16.mxu1 %v10760_v14  ;;  %v5070_v57 = vshll.u32 %v4961_v55, 16  ;;  %v7020_v32 = vshrl.u32 %v6931_v0, 16  ;;  %v7023_v2 = vshll.u32 %v6931_v0, 16  ;;  %v8948_v19 = vrot.slane %v5434_v29, 9 }
 0x281   : > { %10249 = vmatpush3.bf16.msra.mxu0 %v10753_v8  ;;  %v6978_v8 = vshrl.u32 %v6925_v50, 16  ;;  %v5063_v33 = vrot.slane %v5061_v20, 4  ;;  %v7011_v50 = vrot.slane %v7009_v46, 5  ;;  %v5058_v46 = vrot.slane %v5056_v37, 5 }
 0x282   : > { %10250 = vmatprep.subr.bf16.mxu0 %v10757_v44  ;;  %v7022_v10 = vrot.slane %v7020_v32, 4  ;;  %v5290_v32 = vld [vmem:[#allocation3 + $0x8] sm:$0xf] }
 0x283   : > { %10063 = vmatpush3.bf16.msra.mxu1 %v10760_v14  ;;  %v6995_v14 = vshll.u32 %v6927_v43, 16  ;;  %v5067_v12 = vor.u32 %v5066_v36, %v5063_v33  ;;  %v5031_v43 = vsel %vm10991_vm14, %v5026_v21, %v5030_v5  ;;  %v6975_v21 = vrot.slane %v6973_v7, 5 }
 0x284   : > { %10243 = vmatmul.mubr.bf16.gmra.mrb[12].mxu0 %v10756_v1  ;;  %10064 = vmatprep.subr.bf16.mxu1 %v10762_v63  ;;  %v6969_v1 = vrot.slane %v6967_v61, 5  ;;  %v5466_v61 = vrot.slane %v12105_v34, 5 }
 0x285   : > { %10251 = vmatpush3.bf16.msra.mxu0 %v10757_v44  ;;  %10262 = vmatprep.mubr.bf16.mxu0 %v9167_v13  ;;  %v6980_v44 = vrot.slane %v6978_v8, 4  ;;  %v6997_v48 = vrot.slane %v6995_v14, 5  ;;  %v5045_v13 = vsel %vm10991_vm14, %v5040_v15, %v5044_v26  ;;  %v6930_v8 = vld [vmem:[#allocation3 + $0x3c] sm:$0x1]  ;;  %v5068_v53 = vrot.slane %v5067_v12, 4 }
 0x286   : > { %10252 = vmatprep.subr.bf16.mxu0 %v10759_v30  ;;  %v6970_v20 = vor.u32 %v6969_v1, %v12097_v49  ;;  %v8921_v23 = vcombine.low %v5031_v43, %v5045_v13  ;;  %v5072_v14 = vrot.slane %v5070_v57, 5  ;;  %v7025_v15 = vrot.slane %v7023_v2, 5  ;;  %v5288_v57 = vld [vmem:[#allocation3] sm:$0xf]  ;;  %v10774_v43 = vld [vmem:[%s12774_s2 + $0x170] sm:$0xff]  }
 0x287   : > { %10065 = vmatpush3.bf16.msra.mxu1 %v10762_v63  ;;  %v5049_v63 = vrot.slane %v5047_v51, 4  ;;  %v6984_v17 = vor.u32 %v6983_v40, %v6980_v44  ;;  %v10767_v51 = vld [vmem:[%s12774_s2 + $0x2f8] sm:$0xff]   ;;  %v7015_v36 = vshll.u32 %v6930_v8, 16  ;;  %v5463_v44 = vsel %vm12115_vm9, %v8947_v47, %v5462_v56  ;;  %v12166_v8 = vld [vmem:[#allocation3 + $0x2c] sm:$0x1] }
 0x288   : > { %10066 = vmatprep.subr.bf16.mxu1 %v10764_v16  ;;  %v6971_v40 = vrot.slane %v6970_v20, 4  ;;  %v5073_v26 = vsel %vm10991_vm14, %v5068_v53, %v5072_v14  ;;  %v7003_v49 = vrot.slane %v7001_v41, 5  ;;  %v5305_v2 = vshrl.u32 %v5288_v57, 16  ;;  %v5438_v41 = vld [vmem:[#allocation3 + $0x28] sm:$0xe]  ;;  %v10775_v53 = vld [vmem:[%s12774_s2 + $0x178] sm:$0xff]  }
 0x289   : > { %10253 = vmatpush3.bf16.msra.mxu0 %v10759_v30  ;;  %v6994_v30 = vrot.slane %v6992_v6, 4  ;;  %v5053_v39 = vor.u32 %v5052_v54, %v5049_v63  ;;  %v6985_v11 = vrot.slane %v6984_v17, 4  ;;  %v5467_v63 = vsel %vm12115_vm9, %v8948_v19, %v5466_v61  ;;  %v10772_v17 = vld [vmem:[%s12774_s2 + $0x160] sm:$0xff]  }
 0x28a   : > { %10254 = vmatprep.subr.bf16.mxu0 %v10761_v24  ;;  %v8971_v0 = vcombine.low %v5463_v44, %v5467_v63  ;;  %v5308_v20 = vshll.u32 %v5288_v57, 16  ;;  %v5307_v37 = vrot.slane %v5305_v2, 4  ;;  %v5437_v14 = vld [vmem:[#allocation3 + $0x20] sm:$0xe]  ;;  %v5314_v63 = vshll.u32 %v12044_v62, 16 }
 0x28b   : > { %10067 = vmatpush3.bf16.msra.mxu1 %v10764_v16  ;;  %v6926_v16 = vld [vmem:[#allocation3 + $0x2c] sm:$0x1]  ;;  %v5054_v6 = vrot.slane %v5053_v39, 4  ;;  %v10776_v44 = vld [vmem:[%s12774_s2 + $0x100] sm:$0xff]   ;;  %v5298_v57 = vld [vmem:[#allocation3 + $0x28] sm:$0xf] }
 0x28c   : > { %10068 = vmatprep.subr.bf16.mxu1 %v10766_v18  ;;  %v6987_v22 = vshll.u32 %v6926_v16, 16  ;;  %v10773_v39 = vld [vmem:[%s12774_s2 + $0x168] sm:$0xff]  }
 0x28d   : > { %10255 = vmatpush3.bf16.msra.mxu0 %v10761_v24  ;;  %v6998_v24 = vor.u32 %v6997_v48, %v6994_v30  ;;  %v5059_v56 = vsel %vm10991_vm14, %v5054_v6, %v5058_v46  ;;  %v10771_v30 = vld [vmem:[%s12774_s2 + $0x158] sm:$0xff]   ;;  %v6976_v48 = vsel %vm10991_vm14, %v6971_v40, %v6975_v21  ;;  %v12174_v6 = vld [vmem:[#allocation3 + $0x24] sm:$0x1] }
 0x28e   : > { %10256 = vmatprep.subr.bf16.mxu0 %v10763_v35  ;;  %v6989_v45 = vrot.slane %v6987_v22, 5  ;;  %v8922_v1 = vcombine.low %v5059_v56, %v5073_v26  ;;  %v12164_v22 = vld [vmem:[#allocation3 + $0x14] sm:$0x1]  ;;  %v5478_v40 = vrot.slane %v12174_v6, 5  ;;  %v10777_v56 = vld [vmem:[%s12774_s2 + $0x108] sm:$0xff]  }
 0x28f   : > { %10069 = vmatpush3.bf16.msra.mxu1 %v10766_v18  ;;  %v7012_v18 = vor.u32 %v7011_v50, %v7008_v27  ;;  %v6999_v33 = vrot.slane %v6998_v24, 4  ;;  %v5435_v24 = vld [vmem:[#allocation3 + $0x10] sm:$0xe]  ;;  %v5470_v61 = vrot.slane %v12164_v22, 5  ;;  %v12186_v26 = vld [vmem:[#allocation3 + $0x34] sm:$0x1] }
 0x290   : > { %10078 = vmatprep.subr.bf16.mxu1 %v10768_v38  ;;  %v6990_v47 = vsel %vm10991_vm14, %v6985_v11, %v6989_v45  ;;  %v5436_v11 = vld [vmem:[#allocation3 + $0x18] sm:$0xe]  ;;  %v8949_v19 = vrot.slane %v5435_v24, 9  ;;  %v5375_v24 = vshrl.u32 %v5298_v57, 16 }
 0x291   : > { %10257 = vmatpush3.bf16.msra.mxu0 %v10763_v35  ;;  %v6934_v35 = vld [vmem:[#allocation3 + $0x4c] sm:$0x1]  ;;  %v7013_v55 = vrot.slane %v7012_v18, 4  ;;  %v9168_v5 = vcombine.low %v6976_v48, %v6990_v47  ;;  %v5310_v18 = vrot.slane %v5308_v20, 5  ;;  %v5296_v20 = vld [vmem:[#allocation3 + $0x20] sm:$0xf] }
 0x292   : > { %10258 = vmatprep.subr.bf16.mxu0 %v10765_v58  ;;  %10071 = vmatmul.mubr.bf16.vlgmr.msra.gmra.mrb[0].mxu1 %v8920_v3  ;;  %v7043_v54 = vshll.u32 %v6934_v35, 16  ;;  %v7029_v3 = vshll.u32 %v6932_v52, 16  ;;  %v8952_v35 = vrot.slane %v5438_v41, 9  ;;  %v5471_v45 = vsel %vm12115_vm9, %v8949_v19, %v5470_v61 }
 0x293   : > { %10074 = vmatprep.mubr.bf16.mxu1 %v8921_v23  ;;  %10079 = vmatpush3.bf16.msra.mxu1 %v10768_v38  ;;  %v7040_v38 = vor.u32 %v12066_v4, %v12056_v60  ;;  %v7026_v60 = vor.u32 %v7025_v15, %v7022_v10  ;;  %v7004_v4 = vsel %vm10991_vm14, %v6999_v33, %v7003_v49  ;;  %v5322_v23 = vshll.u32 %v5290_v32, 16  ;;  %v5439_v49 = vld [vmem:[#allocation3 + $0x30] sm:$0xe] }
 0x294   : > { %10080 = vmatprep.subr.bf16.mxu1 %v10769_v25  ;;  %v7045_v13 = vrot.slane %v7043_v54, 5  ;;  %v7031_v27 = vrot.slane %v7029_v3, 5  ;;  %v5482_v10 = vrot.slane %v12166_v8, 5  ;;  %v5377_v61 = vrot.slane %v5375_v24, 4 }
 0x295   : > { %10259 = vmatpush3.bf16.msra.mxu0 %v10765_v58  ;;  %v7017_v58 = vrot.slane %v7015_v36, 5  ;;  %v7027_v28 = vrot.slane %v7026_v60, 4  ;;  %v7041_v12 = vrot.slane %v7040_v38, 4  ;;  %v5324_v33 = vrot.slane %v5322_v23, 5  ;;  %v12196_v60 = vld [vmem:[#allocation3 + $0x3c] sm:$0x1] }
 0x296   : > { %10260 = vmatprep.subr.bf16.mxu0 %v10767_v51  ;;  %v8950_v36 = vrot.slane %v5436_v11, 9  ;;  %v8951_v38 = vrot.slane %v5437_v14, 9  ;;  %v5483_v46 = vsel %vm12115_vm9, %v8952_v35, %v5482_v10  ;;  %v5364_v11 = vshll.u32 %v5296_v20, 16  ;;  %v5300_v35 = vld [vmem:[#allocation3 + $0x30] sm:$0xf] }
 0x297   : > { %10081 = vmatpush3.bf16.msra.mxu1 %v10769_v25  ;;  %v7018_v16 = vsel %vm10991_vm14, %v7013_v55, %v7017_v58  ;;  %v7032_v50 = vsel %vm10991_vm14, %v7027_v28, %v7031_v27  ;;  %v7046_v59 = vsel %vm10991_vm14, %v7041_v12, %v7045_v13  ;;  %v5319_v25 = vshrl.u32 %v5290_v32, 16  ;;  %v5294_v32 = vld [vmem:[#allocation3 + $0x18] sm:$0xf] }
 0x298   : > { %10082 = vmatprep.subr.bf16.mxu1 %v10770_v42  ;;  %v9169_v7 = vcombine.low %v7004_v4, %v7018_v16  ;;  %v9170_v29 = vcombine.low %v7032_v50, %v7046_v59  ;;  %v5311_v55 = vor.u32 %v5310_v18, %v5307_v37  ;;  %v5479_v47 = vsel %vm12115_vm9, %v8951_v38, %v5478_v40  ;;  %v5440_v4 = vld [vmem:[#allocation3 + $0x38] sm:$0xe]  ;;  %v10781_v37 = vld [vmem:[%s12774_s2 + $0x128] sm:$0xff]  }
 0x299   : > { %10261 = vmatpush3.bf16.msra.mxu0 %v10767_v51  ;;  %v12171_v51 = vld [vmem:[#allocation3 + $0x1c] sm:$0x1]  ;;  %v5321_v15 = vrot.slane %v5319_v25, 4  ;;  %v5328_v58 = vshll.u32 %v12105_v34, 16  ;;  %v8973_v62 = vcombine.low %v5479_v47, %v5483_v46  ;;  %v5490_v16 = vrot.slane %v12196_v60, 5 }
 0x29a   : > { %10075 = vmatmul.mubr.bf16.gmra.mrb[4].mxu1 %v8922_v1  ;;  %v8953_v1 = vrot.slane %v5439_v49, 9  ;;  %v5312_v48 = vrot.slane %v5311_v55, 4  ;;  %v10779_v50 = vld [vmem:[%s12774_s2 + $0x118] sm:$0xff]   ;;  %v5378_v25 = vshll.u32 %v5298_v57, 16  ;;  %v5347_v23 = vshrl.u32 %v5294_v32, 16 }
 0x29b   : > { %10083 = vmatpush3.bf16.msra.mxu1 %v10770_v42  ;;  %10094 = vmatprep.mubr.bf16.mxu1 %v8971_v0  ;;  %v5474_v42 = vrot.slane %v12171_v51, 5  ;;  %v5325_v52 = vor.u32 %v5324_v33, %v5321_v15  ;;  %v5316_v0 = vrot.slane %v5314_v63, 5  ;;  %v5330_v28 = vrot.slane %v5328_v58, 5  ;;  %v5769_v33 = vld [vmem:[#allocation3 + $0x10] sm:$0xf] }
 0x29c   : > { %10263 = vmatmul.mubr.bf16.vlgmr.msra.gmra.mrb[8].mxu0 %v9168_v5  ;;  %10084 = vmatprep.subr.bf16.mxu1 %v10771_v30  ;;  %v8954_v5 = vrot.slane %v5440_v4, 9  ;;  %v5350_v41 = vshll.u32 %v5294_v32, 16  ;;  %v5380_v14 = vrot.slane %v5378_v25, 5  ;;  %v5349_v10 = vrot.slane %v5347_v23, 4  ;;  %v5302_v38 = vld [vmem:[#allocation3 + $0x38] sm:$0xf] }
 0x29d   : > { %10266 = vmatprep.mubr.bf16.mxu0 %v9169_v7  ;;  %v5475_v54 = vsel %vm12115_vm9, %v8950_v36, %v5474_v42  ;;  %v5326_v3 = vrot.slane %v5325_v52, 4  ;;  %v10778_v7 = vld [vmem:[%s12774_s2 + $0x110] sm:$0xff]   ;;  %v5317_v12 = vsel %vm10991_vm14, %v5312_v48, %v5316_v0  ;;  %v5392_v46 = vshll.u32 %v5300_v35, 16  ;;  %v5767_v49 = vld [vmem:[#allocation3 + $0x8] sm:$0xf]  ;;  %v10783_v4 = vld [vmem:[%s12774_s2 + $0x138] sm:$0xff]  }
 0x29e   : > { %v8972_v21 = vcombine.low %v5471_v45, %v5475_v54  ;;  %v5352_v15 = vrot.slane %v5350_v41, 5  ;;  %v10782_v36 = vld [vmem:[%s12774_s2 + $0x130] sm:$0xff]   ;;  %v5389_v45 = vshrl.u32 %v5300_v35, 16  ;;  %v5381_v55 = vor.u32 %v5380_v14, %v5377_v61  ;;  %v12243_v23 = vld [vmem:[#allocation3 + $0xc] sm:$0x1] }
 0x29f   : > { %10085 = vmatpush3.bf16.msra.mxu1 %v10771_v30  ;;  %v5486_v30 = vrot.slane %v12186_v26, 5  ;;  %v5331_v13 = vsel %vm10991_vm14, %v5326_v3, %v5330_v28  ;;  %v5798_v63 = vshrl.u32 %v5769_v33, 16  ;;  %v5801_v52 = vshll.u32 %v5769_v33, 16  ;;  %v10786_v33 = vld [vmem:[%s12774_s2 + $0x190] sm:$0xff]  }
 0x2a0   : > { %10086 = vmatprep.subr.bf16.mxu1 %v10772_v17  ;;  %v8983_v59 = vcombine.low %v5317_v12, %v5331_v13  ;;  %v5342_v54 = vshll.u32 %v12164_v22, 16  ;;  %v5403_v47 = vshrl.u32 %v5302_v38, 16  ;;  %v5356_v0 = vshll.u32 %v12171_v51, 16 }
 0x2a1   : > { %v5487_v34 = vsel %vm12115_vm9, %v8953_v1, %v5486_v30  ;;  %v5784_v1 = vshrl.u32 %v5767_v49, 16  ;;  %v5787_v30 = vshll.u32 %v5767_v49, 16  ;;  %v5391_v3 = vrot.slane %v5389_v45, 4 }
 0x2a2   : > { %v5370_v22 = vshll.u32 %v12174_v6, 16  ;;  %v5803_v28 = vrot.slane %v5801_v52, 5  ;;  %v5405_v13 = vrot.slane %v5403_v47, 4  ;;  %v5398_v24 = vshll.u32 %v12186_v26, 16  ;;  %v5773_v52 = vld [vmem:[#allocation3 + $0x20] sm:$0xf] }
 0x2a3   : > { %10087 = vmatpush3.bf16.msra.mxu1 %v10772_v17  ;;  %v5491_v17 = vsel %vm12115_vm9, %v8954_v5, %v5490_v16  ;;  %v5394_v5 = vrot.slane %v5392_v46, 5  ;;  %v5382_v16 = vrot.slane %v5381_v55, 4  ;;  %v5786_v51 = vrot.slane %v5784_v1, 4  ;;  %v10787_v55 = vld [vmem:[%s12774_s2 + $0x198] sm:$0xff]  }
 0x2a4   : > { %10267 = vmatmul.mubr.bf16.gmra.mrb[12].mxu0 %v9170_v29  ;;  %10088 = vmatprep.subr.bf16.mxu1 %v10773_v39  ;;  %v8974_v27 = vcombine.low %v5487_v34, %v5491_v17  ;;  %v10780_v29 = vld [vmem:[%s12774_s2 + $0x120] sm:$0xff]   ;;  %v5344_v34 = vrot.slane %v5342_v54, 5  ;;  %v5372_v32 = vrot.slane %v5370_v22, 5  ;;  %v5412_v14 = vshll.u32 %v12196_v60, 16  ;;  %v5777_v54 = vld [vmem:[#allocation3 + $0x30] sm:$0xf] }
 0x2a5   : > { %v5395_v57 = vor.u32 %v5394_v5, %v5391_v3  ;;  %v5793_v26 = vshll.u32 %v12243_v23, 16  ;;  %v5771_v47 = vld [vmem:[#allocation3 + $0x18] sm:$0xf]  ;;  %v5857_v1 = vshll.u32 %v5777_v54, 16 }
 0x2a7   : > { %10089 = vmatpush3.bf16.msra.mxu1 %v10773_v39  ;;  %v5292_v39 = vld [vmem:[#allocation3 + $0x10] sm:$0xf]  ;;  %v5396_v61 = vrot.slane %v5395_v57, 4  ;;  %v5795_v60 = vrot.slane %v5793_v26, 5 }
 0x2a8   : > { %10090 = vmatprep.subr.bf16.mxu1 %v10774_v43  ;;  %v5333_v2 = vshrl.u32 %v5292_v39, 16 }
 0x2aa   : > { %v5335_v18 = vrot.slane %v5333_v2, 4 }
 0x2ab   : > { %10091 = vmatpush3.bf16.msra.mxu1 %v10774_v43  ;;  %v5336_v43 = vshll.u32 %v5292_v39, 16  ;;  %v5358_v39 = vrot.slane %v5356_v0, 5  ;;  %v10789_v0 = vld [vmem:[%s12774_s2 + $0x1a8] sm:$0xff]  }
 0x2ac   : > { %10092 = vmatprep.subr.bf16.mxu1 %v10775_v53 }
 0x2ad   : > { %v5338_v19 = vrot.slane %v5336_v43, 5 }
 0x2af   : > { %10093 = vmatpush3.bf16.msra.mxu1 %v10775_v53  ;;  %v5361_v53 = vshrl.u32 %v5296_v20, 16  ;;  %v5339_v40 = vor.u32 %v5338_v19, %v5335_v18 }
 0x2b0   : > { %10102 = vmatprep.subr.bf16.mxu1 %v10776_v44 }
 0x2b1   : > { %v5363_v42 = vrot.slane %v5361_v53, 4  ;;  %v5340_v48 = vrot.slane %v5339_v40, 4  ;;  %v10785_v53 = vld [vmem:[%s12774_s2 + $0x188] sm:$0xff]  }
 0x2b2   : > { %10095 = vmatmul.mubr.bf16.vlgmr.msra.gmra.mrb[8].mxu1 %v8972_v21  ;;  %v5353_v21 = vor.u32 %v5352_v15, %v5349_v10  ;;  %v5400_v10 = vrot.slane %v5398_v24, 5  ;;  %v12283_v24 = vld [vmem:[#allocation3 + $0x2c] sm:$0x1] }
 0x2b3   : > { %10098 = vmatprep.mubr.bf16.mxu1 %v8973_v62  ;;  %10103 = vmatpush3.bf16.msra.mxu1 %v10776_v44  ;;  %v5366_v44 = vrot.slane %v5364_v11, 5  ;;  %v5384_v62 = vshll.u32 %v12166_v8, 16  ;;  %v10784_v8 = vld [vmem:[%s12774_s2 + $0x180] sm:$0xff]   ;;  %v5345_v6 = vsel %vm10991_vm14, %v5340_v48, %v5344_v34  ;;  %v5815_v48 = vshll.u32 %v5771_v47, 16 }
 0x2b4   : > { %10104 = vmatprep.subr.bf16.mxu1 %v10777_v56  ;;  %v5354_v12 = vrot.slane %v5353_v21, 4  ;;  %v10788_v21 = vld [vmem:[%s12774_s2 + $0x1a0] sm:$0xff]   ;;  %v5849_v26 = vshll.u32 %v12283_v24, 16 }
 0x2b5   : > { %v5367_v58 = vor.u32 %v5366_v44, %v5363_v42  ;;  %v5401_v44 = vsel %vm10991_vm14, %v5396_v61, %v5400_v10  ;;  %v5781_v34 = vld [vmem:[#allocation3 + $0x40] sm:$0xf] }
 0x2b6   : > { %v5359_v20 = vsel %vm10991_vm14, %v5354_v12, %v5358_v39  ;;  %v10790_v12 = vld [vmem:[%s12774_s2 + $0x1b0] sm:$0xff]   ;;  %v5882_v39 = vshrl.u32 %v5781_v34, 16  ;;  %v5885_v57 = vshll.u32 %v5781_v34, 16 }
 0x2b7   : > { %10105 = vmatpush3.bf16.msra.mxu1 %v10777_v56  ;;  %v5406_v56 = vshll.u32 %v5302_v38, 16  ;;  %v8984_v41 = vcombine.low %v5345_v6, %v5359_v20  ;;  %v5414_v38 = vrot.slane %v5412_v14, 5  ;;  %v12278_v6 = vld [vmem:[#allocation3 + $0x34] sm:$0x1] }
 0x2b8   : > { %10106 = vmatprep.subr.bf16.mxu1 %v10778_v7  ;;  %v5884_v61 = vrot.slane %v5882_v39, 4  ;;  %v5887_v14 = vrot.slane %v5885_v57, 5  ;;  %v10798_v39 = vld [vmem:[%s12774_s2 + $0x1f0] sm:$0xff]   ;;  %v6052_v57 = vld [vmem:[#allocation3 + $0x20] sm:$0xe] }
 0x2b9   : > { %v5408_v17 = vrot.slane %v5406_v56, 5  ;;  %v5826_v56 = vshrl.u32 %v5773_v52, 16 }
 0x2ba   : > { %10099 = vmatmul.mubr.bf16.gmra.mrb[12].mxu1 %v8974_v27  ;;  %v5368_v27 = vrot.slane %v5367_v58, 4  ;;  %v5775_v58 = vld [vmem:[#allocation3 + $0x28] sm:$0xf] }
 0x2bb   : > { %10107 = vmatpush3.bf16.msra.mxu1 %v10778_v7  ;;  %10118 = vmatprep.mubr.bf16.mxu1 %v8983_v59  ;;  %v5800_v7 = vrot.slane %v5798_v63, 4  ;;  %v5789_v59 = vrot.slane %v5787_v30, 5  ;;  %v5409_v25 = vor.u32 %v5408_v17, %v5405_v13  ;;  %v5812_v30 = vshrl.u32 %v5771_v47, 16  ;;  %v6050_v47 = vld [vmem:[#allocation3 + $0x10] sm:$0xe] }
 0x2bc   : > { %10108 = vmatprep.subr.bf16.mxu1 %v10779_v50  ;;  %v5840_v3 = vshrl.u32 %v5775_v58, 16  ;;  %v5843_v5 = vshll.u32 %v5775_v58, 16  ;;  %v5828_v22 = vrot.slane %v5826_v56, 4  ;;  %v5817_v17 = vrot.slane %v5815_v48, 5  ;;  %v10793_v58 = vld [vmem:[%s12774_s2 + $0x1c8] sm:$0xff]  }
 0x2bd   : > { %v5804_v43 = vor.u32 %v5803_v28, %v5800_v7  ;;  %v5790_v11 = vor.u32 %v5789_v59, %v5786_v51  ;;  %v5410_v15 = vrot.slane %v5409_v25, 4  ;;  %v5859_v28 = vrot.slane %v5857_v1, 5  ;;  %v5779_v51 = vld [vmem:[#allocation3 + $0x38] sm:$0xf]  ;;  %v6049_v48 = vld [vmem:[#allocation3 + $0x8] sm:$0xe] }
 0x2be   : > { %v5814_v13 = vrot.slane %v5812_v30, 4  ;;  %v5868_v25 = vshrl.u32 %v5779_v51, 16 }
 0x2bf   : > { %10109 = vmatpush3.bf16.msra.mxu1 %v10779_v50  ;;  %v5386_v50 = vrot.slane %v5384_v62, 5  ;;  %v5805_v35 = vrot.slane %v5804_v43, 4  ;;  %v5415_v45 = vsel %vm10991_vm14, %v5410_v15, %v5414_v38  ;;  %v5854_v62 = vshrl.u32 %v5777_v54, 16 }
 0x2c0   : > { %10110 = vmatprep.subr.bf16.mxu1 %v10780_v29  ;;  %v8986_v46 = vcombine.low %v5401_v44, %v5415_v45  ;;  %v5818_v43 = vor.u32 %v5817_v17, %v5814_v13 }
 0x2c1   : > { %v5387_v2 = vsel %vm10991_vm14, %v5382_v16, %v5386_v50  ;;  %v5856_v7 = vrot.slane %v5854_v62, 4  ;;  %v5845_v50 = vrot.slane %v5843_v5, 5 }
 0x2c2   : > { %v5819_v10 = vrot.slane %v5818_v43, 4  ;;  %v10799_v43 = vld [vmem:[%s12774_s2 + $0x1f8] sm:$0xff]  }
 0x2c3   : > { %10111 = vmatpush3.bf16.msra.mxu1 %v10780_v29  ;;  %v12236_v29 = vld [vmem:[#allocation3 + $0x14] sm:$0x1] }
 0x2c4   : > { %10112 = vmatprep.subr.bf16.mxu1 %v10781_v37  ;;  %v5807_v18 = vshll.u32 %v12236_v29, 16 }
 0x2c6   : > { %v5809_v42 = vrot.slane %v5807_v18, 5 }
 0x2c7   : > { %10113 = vmatpush3.bf16.msra.mxu1 %v10781_v37  ;;  %v5373_v37 = vsel %vm10991_vm14, %v5368_v27, %v5372_v32  ;;  %v5842_v27 = vrot.slane %v5840_v3, 4  ;;  %v12280_v32 = vld [vmem:[#allocation3 + $0x1c] sm:$0x1]  ;;  %v6079_v3 = vrot.slane %v12236_v29, 5 }
 0x2c8   : > { %10114 = vmatprep.subr.bf16.mxu1 %v10782_v36  ;;  %v8985_v19 = vcombine.low %v5373_v37, %v5387_v2  ;;  %v5810_v40 = vsel %vm10991_vm14, %v5805_v35, %v5809_v42  ;;  %v5860_v2 = vor.u32 %v5859_v28, %v5856_v7  ;;  %v10791_v37 = vld [vmem:[%s12774_s2 + $0x1b8] sm:$0xff]   ;;  %v5821_v18 = vshll.u32 %v12280_v32, 16  ;;  %v10792_v42 = vld [vmem:[%s12774_s2 + $0x1c0] sm:$0xff]  }
 0x2c9   : > { %v9023_v7 = vrot.slane %v6049_v48, 9  ;;  %v6075_v28 = vrot.slane %v12243_v23, 5  ;;  %v10795_v23 = vld [vmem:[%s12774_s2 + $0x1d8] sm:$0xff]   ;;  %v10804_v48 = vld [vmem:[%s12774_s2 + $0x360] sm:$0xff]  }
 0x2ca   : > { %v5861_v35 = vrot.slane %v5860_v2, 4  ;;  %v6054_v2 = vld [vmem:[#allocation3 + $0x30] sm:$0xe] }
 0x2cb   : > { %10115 = vmatpush3.bf16.msra.mxu1 %v10782_v36  ;;  %v5791_v36 = vrot.slane %v5790_v11, 4  ;;  %v5863_v11 = vshll.u32 %v12278_v6, 16 }
 0x2cc   : > { %10116 = vmatprep.subr.bf16.mxu1 %v10783_v4 }
 0x2cd   : > { %v5796_v49 = vsel %vm10991_vm14, %v5791_v36, %v5795_v60  ;;  %v5865_v38 = vrot.slane %v5863_v11, 5  ;;  %v12294_v60 = vld [vmem:[#allocation3 + $0x44] sm:$0x1]  ;;  %v6095_v11 = vrot.slane %v12278_v6, 5 }
 0x2ce   : > { %v9011_v63 = vcombine.low %v5796_v49, %v5810_v40  ;;  %v5823_v40 = vrot.slane %v5821_v18, 5  ;;  %v5851_v49 = vrot.slane %v5849_v26, 5  ;;  %v6091_v26 = vrot.slane %v12283_v24, 5  ;;  %v10801_v24 = vld [vmem:[%s12774_s2 + $0x348] sm:$0xff]  }
 0x2cf   : > { %10117 = vmatpush3.bf16.msra.mxu1 %v10783_v4  ;;  %v5829_v4 = vshll.u32 %v5773_v52, 16 }
 0x2d0   : > { %10126 = vmatprep.subr.bf16.mxu1 %v10784_v8  ;;  %v5824_v52 = vsel %vm10991_vm14, %v5819_v10, %v5823_v40  ;;  %v6056_v10 = vld [vmem:[#allocation3 + $0x40] sm:$0xe]  ;;  %v6103_v40 = vrot.slane %v12294_v60, 5 }
 0x2d1   : > { %v5831_v16 = vrot.slane %v5829_v4, 5 }
 0x2d2   : > { %10119 = vmatmul.mubr.bf16.vlgmr.msra.gmra.mrb[8].mxu1 %v8984_v41  ;;  %v5871_v41 = vshll.u32 %v5779_v51, 16  ;;  %v10796_v51 = vld [vmem:[%s12774_s2 + $0x1e0] sm:$0xff]  }
 0x2d3   : > { %10122 = vmatprep.mubr.bf16.mxu1 %v8985_v19  ;;  %10127 = vmatpush3.bf16.msra.mxu1 %v10784_v8  ;;  %v12276_v8 = vld [vmem:[#allocation3 + $0x24] sm:$0x1]  ;;  %v5832_v59 = vor.u32 %v5831_v16, %v5828_v22  ;;  %v10794_v16 = vld [vmem:[%s12774_s2 + $0x1d0] sm:$0xff]  }
 0x2d4   : > { %10128 = vmatprep.subr.bf16.mxu1 %v10785_v53  ;;  %v5835_v20 = vshll.u32 %v12276_v8, 16  ;;  %v5873_v36 = vrot.slane %v5871_v41, 5  ;;  %v6087_v41 = vrot.slane %v12276_v8, 5 }
 0x2d5   : > { %v5833_v19 = vrot.slane %v5832_v59, 4  ;;  %v10797_v59 = vld [vmem:[%s12774_s2 + $0x1e8] sm:$0xff]  }
 0x2d6   : > { %v5837_v15 = vrot.slane %v5835_v20, 5  ;;  %v6051_v20 = vld [vmem:[#allocation3 + $0x18] sm:$0xe] }
 0x2d7   : > { %10129 = vmatpush3.bf16.msra.mxu1 %v10785_v53  ;;  %v5846_v53 = vor.u32 %v5845_v50, %v5842_v27  ;;  %v6076_v27 = vsel %vm12115_vm9, %v9023_v7, %v6075_v28  ;;  %v9025_v18 = vrot.slane %v6051_v20, 9  ;;  %v7410_v7 = vld [vmem:[#allocation3 + $0x20] sm:$0xe] }
 0x2d8   : > { %10130 = vmatprep.subr.bf16.mxu1 %v10786_v33  ;;  %v5838_v45 = vsel %vm10991_vm14, %v5833_v19, %v5837_v15  ;;  %v6083_v19 = vrot.slane %v12280_v32, 5  ;;  %v12352_v32 = vld [vmem:[#allocation3 + $0x14] sm:$0x1]  ;;  %v7408_v15 = vld [vmem:[#allocation3 + $0x10] sm:$0xe] }
 0x2d9   : > { %v5847_v44 = vrot.slane %v5846_v53, 4  ;;  %v9012_v56 = vcombine.low %v5824_v52, %v5838_v45  ;;  %v9028_v53 = vrot.slane %v6054_v2, 9  ;;  %v12360_v45 = vld [vmem:[#allocation3 + $0xc] sm:$0x1] }
 0x2da   : > { %10123 = vmatmul.mubr.bf16.gmra.mrb[12].mxu1 %v8986_v46  ;;  %v5888_v46 = vor.u32 %v5887_v14, %v5884_v61  ;;  %v10800_v61 = vld [vmem:[%s12774_s2 + $0x340] sm:$0xff]   ;;  %v6084_v6 = vsel %vm12115_vm9, %v9025_v18, %v6083_v19 }
 0x2db   : > { %10131 = vmatpush3.bf16.msra.mxu1 %v10786_v33  ;;  %10142 = vmatprep.mubr.bf16.mxu1 %v9011_v63  ;;  %v5870_v33 = vrot.slane %v5868_v25, 4  ;;  %v12300_v63 = vld [vmem:[#allocation3 + $0x3c] sm:$0x1]  ;;  %v5852_v4 = vsel %vm10991_vm14, %v5847_v44, %v5851_v49  ;;  %v9026_v25 = vrot.slane %v6052_v57, 9  ;;  %v6096_v8 = vsel %vm12115_vm9, %v9028_v53, %v6095_v11  ;;  %v7411_v57 = vld [vmem:[#allocation3 + $0x28] sm:$0xe] }
 0x2dc   : > { %10132 = vmatprep.subr.bf16.mxu1 %v10787_v55  ;;  %v5877_v1 = vshll.u32 %v12300_v63, 16  ;;  %v5889_v30 = vrot.slane %v5888_v46, 4  ;;  %v7407_v46 = vld [vmem:[#allocation3 + $0x8] sm:$0xe]  ;;  %v9204_v49 = vrot.slane %v7408_v15, 9  ;;  %v10808_v53 = vld [vmem:[%s12774_s2 + $0x300] sm:$0xff]  }
 0x2dd   : > { %v5874_v54 = vor.u32 %v5873_v36, %v5870_v33  ;;  %v9207_v11 = vrot.slane %v7411_v57, 9 }
 0x2de   : > { %v5879_v34 = vrot.slane %v5877_v1, 5  ;;  %v10803_v1 = vld [vmem:[%s12774_s2 + $0x358] sm:$0xff]  }
 0x2df   : > { %10133 = vmatpush3.bf16.msra.mxu1 %v10787_v55  ;;  %v5866_v55 = vsel %vm10991_vm14, %v5861_v35, %v5865_v38  ;;  %v5875_v5 = vrot.slane %v5874_v54, 4  ;;  %v6088_v35 = vsel %vm12115_vm9, %v9026_v25, %v6087_v41  ;;  %v9030_v38 = vrot.slane %v6056_v10, 9 }
 0x2e0   : > { %10134 = vmatprep.subr.bf16.mxu1 %v10788_v21  ;;  %v9013_v62 = vcombine.low %v5852_v4, %v5866_v55  ;;  %v9048_v33 = vcombine.low %v6084_v6, %v6088_v35  ;;  %v7437_v55 = vrot.slane %v12352_v32, 5  ;;  %v6099_v54 = vrot.slane %v12300_v63, 5  ;;  %v12410_v35 = vld [vmem:[#allocation3 + $0x44] sm:$0x1] }
 0x2e1   : > { %v5880_v29 = vsel %vm10991_vm14, %v5875_v5, %v5879_v34  ;;  %v10806_v5 = vld [vmem:[%s12774_s2 + $0x370] sm:$0xff]  }
 0x2e2   : > { %v7438_v4 = vsel %vm12115_vm9, %v9204_v49, %v7437_v55  ;;  %v7461_v49 = vrot.slane %v12410_v35, 5  ;;  %v7288_v55 = vshll.u32 %v12360_v45, 16 }
 0x2e3   : > { %10135 = vmatpush3.bf16.msra.mxu1 %v10788_v21  ;;  %v5891_v21 = vshll.u32 %v12294_v60, 16  ;;  %v7433_v60 = vrot.slane %v12360_v45, 5 }
 0x2e4   : > { %10136 = vmatprep.subr.bf16.mxu1 %v10789_v0 }
 0x2e5   : > { %v5893_v22 = vrot.slane %v5891_v21, 5  ;;  %v10802_v21 = vld [vmem:[%s12774_s2 + $0x350] sm:$0xff]  }
 0x2e7   : > { %10137 = vmatpush3.bf16.msra.mxu1 %v10789_v0  ;;  %v9024_v0 = vrot.slane %v6050_v47, 9  ;;  %v9203_v47 = vrot.slane %v7407_v46, 9 }
 0x2e8   : > { %10138 = vmatprep.subr.bf16.mxu1 %v10790_v12 }
 0x2e9   : > { %v6080_v13 = vsel %vm12115_vm9, %v9024_v0, %v6079_v3  ;;  %v7434_v63 = vsel %vm12115_vm9, %v9203_v47, %v7433_v60  ;;  %v10805_v0 = vld [vmem:[%s12774_s2 + $0x368] sm:$0xff]   ;;  %v7264_v3 = vld [vmem:[#allocation3 + $0x10] sm:$0xf] }
 0x2ea   : > { %v9047_v50 = vcombine.low %v6076_v27, %v6080_v13  ;;  %v7293_v28 = vshrl.u32 %v7264_v3, 16  ;;  %v7296_v34 = vshll.u32 %v7264_v3, 16  ;;  %v12392_v13 = vld [vmem:[#allocation3 + $0x34] sm:$0x1]  ;;  %v7409_v27 = vld [vmem:[#allocation3 + $0x18] sm:$0xe] }
 0x2eb   : > { %10139 = vmatpush3.bf16.msra.mxu1 %v10790_v12  ;;  %v5894_v12 = vsel %vm10991_vm14, %v5889_v30, %v5893_v22  ;;  %v9227_v30 = vcombine.low %v7434_v63, %v7438_v4  ;;  %v7262_v22 = vld [vmem:[#allocation3 + $0x8] sm:$0xf]  ;;  %v9205_v41 = vrot.slane %v7409_v27, 9  ;;  %v10810_v47 = vld [vmem:[%s12774_s2 + $0x310] sm:$0xff]   ;;  %v7290_v4 = vrot.slane %v7288_v55, 5  ;;  %v10812_v3 = vld [vmem:[%s12774_s2 + $0x320] sm:$0xff]  }
 0x2ec   : > { %10140 = vmatprep.subr.bf16.mxu1 %v10791_v37  ;;  %v9014_v17 = vcombine.low %v5880_v29, %v5894_v12  ;;  %v12390_v12 = vld [vmem:[#allocation3 + $0x1c] sm:$0x1]  ;;  %v7412_v29 = vld [vmem:[#allocation3 + $0x30] sm:$0xe]  ;;  %v7295_v20 = vrot.slane %v7293_v28, 4  ;;  %v7298_v25 = vrot.slane %v7296_v34, 5 }
 0x2ed   : > { %v9208_v2 = vrot.slane %v7412_v29, 9  ;;  %v7270_v28 = vld [vmem:[#allocation3 + $0x28] sm:$0xf] }
 0x2ee   : > { %v7299_v10 = vor.u32 %v7298_v25, %v7295_v20  ;;  %v7276_v20 = vld [vmem:[#allocation3 + $0x40] sm:$0xf] }
 0x2ef   : > { %10141 = vmatpush3.bf16.msra.mxu1 %v10791_v37  ;;  %v6053_v37 = vld [vmem:[#allocation3 + $0x28] sm:$0xe] }
 0x2f0   : > { %10150 = vmatprep.subr.bf16.mxu1 %v10792_v42  ;;  %v9027_v14 = vrot.slane %v6053_v37, 9  ;;  %v7441_v37 = vrot.slane %v12390_v12, 5 }
 0x2f2   : > { %10143 = vmatmul.mubr.bf16.vlgmr.msra.gmra.mrb[8].mxu1 %v9012_v56  ;;  %v6092_v36 = vsel %vm12115_vm9, %v9027_v14, %v6091_v26  ;;  %v6104_v56 = vsel %vm12115_vm9, %v9030_v38, %v6103_v40  ;;  %v7442_v6 = vsel %vm12115_vm9, %v9205_v41, %v7441_v37  ;;  %v7302_v38 = vshll.u32 %v12352_v32, 16  ;;  %v7738_v37 = vld [vmem:[#allocation3 + $0x10] sm:$0xf] }
 0x2f3   : > { %10146 = vmatprep.mubr.bf16.mxu1 %v9013_v62  ;;  %10151 = vmatpush3.bf16.msra.mxu1 %v10792_v42  ;;  %v6055_v42 = vld [vmem:[#allocation3 + $0x38] sm:$0xe]  ;;  %v9049_v44 = vcombine.low %v6092_v36, %v6096_v8  ;;  %v7414_v8 = vld [vmem:[#allocation3 + $0x40] sm:$0xe]  ;;  %v10809_v36 = vld [vmem:[%s12774_s2 + $0x308] sm:$0xff]  }
 0x2f4   : > { %10152 = vmatprep.subr.bf16.mxu1 %v10793_v58  ;;  %v9029_v52 = vrot.slane %v6055_v42, 9  ;;  %v7413_v42 = vld [vmem:[#allocation3 + $0x38] sm:$0xe]  ;;  %v9210_v46 = vrot.slane %v7414_v8, 9  ;;  %v7304_v32 = vrot.slane %v7302_v38, 5 }
 0x2f5   : > { %v7740_v8 = vld [vmem:[#allocation3 + $0x18] sm:$0xf] }
 0x2f6   : > { %v10815_v38 = vld [vmem:[%s12774_s2 + $0x338] sm:$0xff]   ;;  %v7772_v55 = vshll.u32 %v7740_v8, 16 }
 0x2f7   : > { %10153 = vmatpush3.bf16.msra.mxu1 %v10793_v58  ;;  %v6100_v58 = vsel %vm12115_vm9, %v9029_v52, %v6099_v54  ;;  %v7300_v52 = vrot.slane %v7299_v10, 4  ;;  %v9209_v54 = vrot.slane %v7413_v42, 9 }
 0x2f8   : > { %10154 = vmatprep.subr.bf16.mxu1 %v10794_v16  ;;  %v9050_v62 = vcombine.low %v6100_v58, %v6104_v56  ;;  %v7462_v56 = vsel %vm12115_vm9, %v9210_v46, %v7461_v49  ;;  %v7358_v46 = vshll.u32 %v12392_v13, 16  ;;  %v7769_v49 = vshrl.u32 %v7740_v8, 16 }
 0x2f9   : > { %v7305_v45 = vsel %vm10991_vm14, %v7300_v52, %v7304_v32  ;;  %v7316_v52 = vshll.u32 %v12390_v12, 16 }
 0x2fa   : > { %10147 = vmatmul.mubr.bf16.gmra.mrb[12].mxu1 %v9014_v17  ;;  %v10807_v17 = vld [vmem:[%s12774_s2 + $0x378] sm:$0xff]   ;;  %v7360_v12 = vrot.slane %v7358_v46, 5 }
 0x2fb   : > { %10155 = vmatpush3.bf16.msra.mxu1 %v10794_v16  ;;  %10166 = vmatprep.mubr.bf16.mxu1 %v9047_v50  ;;  %v12388_v16 = vld [vmem:[#allocation3 + $0x24] sm:$0x1]  ;;  %v7282_v50 = vshll.u32 %v7262_v22, 16  ;;  %v7748_v46 = vld [vmem:[#allocation3 + $0x38] sm:$0xf] }
 0x2fc   : > { %10156 = vmatprep.subr.bf16.mxu1 %v10795_v23 }
 0x2ff   : > { %10157 = vmatpush3.bf16.msra.mxu1 %v10795_v23  ;;  %v7279_v23 = vshrl.u32 %v7262_v22, 16 }
 0x300   : > { %10158 = vmatprep.subr.bf16.mxu1 %v10796_v51 }
 0x301   : > { %v7281_v19 = vrot.slane %v7279_v23, 4  ;;  %v10813_v23 = vld [vmem:[%s12774_s2 + $0x328] sm:$0xff]  }
 0x303   : > { %10159 = vmatpush3.bf16.msra.mxu1 %v10796_v51  ;;  %v9206_v51 = vrot.slane %v7410_v7, 9 }
 0x304   : > { %10160 = vmatprep.subr.bf16.mxu1 %v10797_v59 }
 0x307   : > { %10161 = vmatpush3.bf16.msra.mxu1 %v10797_v59  ;;  %v7445_v59 = vrot.slane %v12388_v16, 5 }
 0x308   : > { %10162 = vmatprep.subr.bf16.mxu1 %v10798_v39 }
 0x309   : > { %v7446_v14 = vsel %vm12115_vm9, %v9206_v51, %v7445_v59  ;;  %v7338_v51 = vshll.u32 %v7270_v28, 16 }
 0x30a   : > { %v9228_v15 = vcombine.low %v7442_v6, %v7446_v14  ;;  %v7377_v14 = vshrl.u32 %v7276_v20, 16  ;;  %v7755_v6 = vshrl.u32 %v7738_v37, 16 }
 0x30b   : > { %10163 = vmatpush3.bf16.msra.mxu1 %v10798_v39  ;;  %v12398_v39 = vld [vmem:[#allocation3 + $0x2c] sm:$0x1] }
 0x30c   : > { %10164 = vmatprep.subr.bf16.mxu1 %v10799_v43  ;;  %v7449_v18 = vrot.slane %v12398_v39, 5  ;;  %v7757_v32 = vrot.slane %v7755_v6, 4 }
 0x30f   : > { %10165 = vmatpush3.bf16.msra.mxu1 %v10799_v43  ;;  %v7453_v43 = vrot.slane %v12392_v13, 5  ;;  %v10816_v13 = vld [vmem:[%s12774_s2 + $0x380] sm:$0xff]  }
 0x310   : > { %10270 = vmatprep.subr.bf16.mxu1 %v10800_v61 }
 0x311   : > { %v7454_v26 = vsel %vm12115_vm9, %v9208_v2, %v7453_v43 }
 0x312   : > { %10167 = vmatmul.mubr.bf16.vlgmr.msra.gmra.mrb[8].mxu1 %v9048_v33  ;;  %v7450_v33 = vsel %vm12115_vm9, %v9207_v11, %v7449_v18  ;;  %v7340_v18 = vrot.slane %v7338_v51, 5 }
 0x313   : > { %10170 = vmatprep.mubr.bf16.mxu1 %v9049_v44  ;;  %10271 = vmatpush3.bf16.msra.mxu1 %v10800_v61  ;;  %v7284_v61 = vrot.slane %v7282_v50, 5  ;;  %v9229_v40 = vcombine.low %v7450_v33, %v7454_v26  ;;  %v7335_v50 = vshrl.u32 %v7270_v28, 16  ;;  %v7380_v26 = vshll.u32 %v7276_v20, 16 }
 0x314   : > { %10272 = vmatprep.subr.bf16.mxu1 %v10801_v24 }
 0x315   : > { %v7285_v44 = vor.u32 %v7284_v61, %v7281_v19  ;;  %v7337_v11 = vrot.slane %v7335_v50, 4  ;;  %v7274_v19 = vld [vmem:[#allocation3 + $0x38] sm:$0xf]  ;;  %v10817_v50 = vld [vmem:[%s12774_s2 + $0x388] sm:$0xff]  }
 0x316   : > { %v7363_v42 = vshrl.u32 %v7274_v19, 16 }
 0x317   : > { %10273 = vmatpush3.bf16.msra.mxu1 %v10801_v24  ;;  %v12419_v24 = vld [vmem:[#allocation3 + $0x3c] sm:$0x1]  ;;  %v7286_v60 = vrot.slane %v7285_v44, 4  ;;  %v7366_v44 = vshll.u32 %v7274_v19, 16  ;;  %v7744_v19 = vld [vmem:[#allocation3 + $0x28] sm:$0xf] }
 0x318   : > { %10274 = vmatprep.subr.bf16.mxu1 %v10802_v21 }
 0x319   : > { %v7291_v63 = vsel %vm10991_vm14, %v7286_v60, %v7290_v4  ;;  %v7344_v60 = vshll.u32 %v12398_v39, 16 }
 0x31a   : > { %10171 = vmatmul.mubr.bf16.gmra.mrb[12].mxu1 %v9050_v62 }
 0x31b   : > { %10275 = vmatpush3.bf16.msra.mxu1 %v10802_v21  ;;  %10286 = vmatprep.mubr.bf16.mxu1 %v9227_v30  ;;  %v7457_v21 = vrot.slane %v12419_v24, 5  ;;  %v9239_v30 = vcombine.low %v7291_v63, %v7305_v45 }
 0x31c   : > { %10276 = vmatprep.subr.bf16.mxu1 %v10803_v1 }
 0x31d   : > { %v7458_v58 = vsel %vm12115_vm9, %v9209_v54, %v7457_v21  ;;  %v7379_v21 = vrot.slane %v7377_v14, 4 }
 0x31e   : > { %v9230_v62 = vcombine.low %v7458_v58, %v7462_v56  ;;  %v7365_v58 = vrot.slane %v7363_v42, 4 }
 0x31f   : > { %10277 = vmatpush3.bf16.msra.mxu1 %v10803_v1  ;;  %v10811_v1 = vld [vmem:[%s12774_s2 + $0x318] sm:$0xff]  }
 0x320   : > { %10278 = vmatprep.subr.bf16.mxu1 %v10804_v48 }
 0x323   : > { %10279 = vmatpush3.bf16.msra.mxu1 %v10804_v48  ;;  %v7268_v48 = vld [vmem:[#allocation3 + $0x20] sm:$0xf] }
 0x324   : > { %10280 = vmatprep.subr.bf16.mxu1 %v10805_v0  ;;  %v7321_v22 = vshrl.u32 %v7268_v48, 16  ;;  %v7324_v7 = vshll.u32 %v7268_v48, 16  ;;  %v7318_v48 = vrot.slane %v7316_v52, 5 }
 0x326   : > { %v7323_v59 = vrot.slane %v7321_v22, 4  ;;  %v7326_v57 = vrot.slane %v7324_v7, 5 }
 0x327   : > { %10281 = vmatpush3.bf16.msra.mxu1 %v10805_v0  ;;  %v7272_v0 = vld [vmem:[#allocation3 + $0x30] sm:$0xf] }
 0x328   : > { %10282 = vmatprep.subr.bf16.mxu1 %v10806_v5  ;;  %v7349_v34 = vshrl.u32 %v7272_v0, 16  ;;  %v7352_v29 = vshll.u32 %v7272_v0, 16  ;;  %v7327_v61 = vor.u32 %v7326_v57, %v7323_v59 }
 0x32a   : > { %v7351_v2 = vrot.slane %v7349_v34, 4  ;;  %v7354_v43 = vrot.slane %v7352_v29, 5  ;;  %v7328_v54 = vrot.slane %v7327_v61, 4  ;;  %v7386_v29 = vshll.u32 %v12410_v35, 16 }
 0x32b   : > { %10283 = vmatpush3.bf16.msra.mxu1 %v10806_v5  ;;  %v7266_v5 = vld [vmem:[#allocation3 + $0x18] sm:$0xf] }
 0x32c   : > { %10284 = vmatprep.subr.bf16.mxu1 %v10807_v17  ;;  %v7310_v27 = vshll.u32 %v7266_v5, 16  ;;  %v7355_v10 = vor.u32 %v7354_v43, %v7351_v2  ;;  %v7372_v2 = vshll.u32 %v12419_v24, 16 }
 0x32e   : > { %v7312_v41 = vrot.slane %v7310_v27, 5  ;;  %v7374_v61 = vrot.slane %v7372_v2, 5 }
 0x32f   : > { %10285 = vmatpush3.bf16.msra.mxu1 %v10807_v17  ;;  %v7307_v17 = vshrl.u32 %v7266_v5, 16  ;;  %v7346_v5 = vrot.slane %v7344_v60, 5  ;;  %v7752_v60 = vld [vmem:[#allocation3 + $0x48] sm:$0xf] }
 0x330   : > { %10294 = vmatprep.subr.bf16.mxu1 %v10808_v53 }
 0x331   : > { %v7309_v25 = vrot.slane %v7307_v17, 4  ;;  %v12467_v17 = vld [vmem:[#allocation3 + $0x1c] sm:$0x1] }
 0x332   : > { %10287 = vmatmul.mubr.bf16.vlgmr.msra.gmra.mrb[16].mxu1 %v9228_v15  ;;  %v7758_v15 = vshll.u32 %v7738_v37, 16  ;;  %v7778_v20 = vshll.u32 %v12467_v17, 16  ;;  %v7742_v37 = vld [vmem:[#allocation3 + $0x20] sm:$0xf] }
 0x333   : > { %10290 = vmatprep.mubr.bf16.mxu1 %v9229_v40  ;;  %10295 = vmatpush3.bf16.msra.mxu1 %v10808_v53  ;;  %v10814_v53 = vld [vmem:[%s12774_s2 + $0x330] sm:$0xff]   ;;  %v7313_v33 = vor.u32 %v7312_v41, %v7309_v25  ;;  %v7341_v40 = vor.u32 %v7340_v18, %v7337_v11  ;;  %v7388_v41 = vrot.slane %v7386_v29, 5  ;;  %v7783_v8 = vshrl.u32 %v7742_v37, 16 }
 0x334   : > { %10296 = vmatprep.subr.bf16.mxu1 %v10809_v36  ;;  %v7760_v56 = vrot.slane %v7758_v15, 5  ;;  %v7797_v15 = vshrl.u32 %v7744_v19, 16 }
 0x335   : > { %v7314_v4 = vrot.slane %v7313_v33, 4  ;;  %v7342_v63 = vrot.slane %v7341_v40, 4  ;;  %v7800_v33 = vshll.u32 %v7744_v19, 16  ;;  %v7746_v40 = vld [vmem:[#allocation3 + $0x30] sm:$0xf] }
 0x336   : > { %v7761_v7 = vor.u32 %v7760_v56, %v7757_v32  ;;  %v7811_v32 = vshrl.u32 %v7746_v40, 16  ;;  %v7814_v56 = vshll.u32 %v7746_v40, 16  ;;  %v12529_v19 = vld [vmem:[#allocation3 + $0x4c] sm:$0x1] }
 0x337   : > { %10297 = vmatpush3.bf16.msra.mxu1 %v10809_v36  ;;  %v7330_v36 = vshll.u32 %v12388_v16, 16  ;;  %v7356_v16 = vrot.slane %v7355_v10, 4  ;;  %v7319_v28 = vsel %vm10991_vm14, %v7314_v4, %v7318_v48  ;;  %v7786_v10 = vshll.u32 %v7742_v37, 16  ;;  %v12501_v48 = vld [vmem:[#allocation3 + $0x3c] sm:$0x1] }
 0x338   : > { %10298 = vmatprep.subr.bf16.mxu1 %v10810_v47  ;;  %v7762_v35 = vrot.slane %v7761_v7, 4  ;;  %v7825_v4 = vshrl.u32 %v7748_v46, 16  ;;  %v7816_v7 = vrot.slane %v7814_v56, 5  ;;  %v7834_v2 = vshll.u32 %v12501_v48, 16 }
 0x339   : > { %v7332_v45 = vrot.slane %v7330_v36, 5  ;;  %v7361_v22 = vsel %vm10991_vm14, %v7356_v16, %v7360_v12  ;;  %v7788_v52 = vrot.slane %v7786_v10, 5  ;;  %v10820_v16 = vld [vmem:[%s12774_s2 + $0x3a0] sm:$0xff]   ;;  %v7862_v10 = vshll.u32 %v12529_v19, 16 }
 0x33a   : > { %10291 = vmatmul.mubr.bf16.gmra.mrb[20].mxu1 %v9230_v62  ;;  %v7368_v62 = vrot.slane %v7366_v44, 5  ;;  %v10819_v44 = vld [vmem:[%s12774_s2 + $0x398] sm:$0xff]  }
 0x33b   : > { %10299 = vmatpush3.bf16.msra.mxu1 %v10810_v47  ;;  %10310 = vmatprep.mubr.bf16.mxu1 %v9239_v30  ;;  %v7382_v47 = vrot.slane %v7380_v26, 5  ;;  %v7774_v30 = vrot.slane %v7772_v55, 5  ;;  %v7333_v39 = vsel %vm10991_vm14, %v7328_v54, %v7332_v45  ;;  %v7780_v26 = vrot.slane %v7778_v20, 5  ;;  %v10822_v20 = vld [vmem:[%s12774_s2 + $0x3b0] sm:$0xff]  }
 0x33c   : > { %10300 = vmatprep.subr.bf16.mxu1 %v10811_v1  ;;  %v7369_v34 = vor.u32 %v7368_v62, %v7365_v58  ;;  %v9240_v27 = vcombine.low %v7319_v28, %v7333_v39  ;;  %v7785_v55 = vrot.slane %v7783_v8, 4  ;;  %v7799_v54 = vrot.slane %v7797_v15, 4  ;;  %v12496_v58 = vld [vmem:[#allocation3 + $0x2c] sm:$0x1] }
 0x33d   : > { %v7383_v0 = vor.u32 %v7382_v47, %v7379_v21  ;;  %v7802_v21 = vrot.slane %v7800_v33, 5  ;;  %v7750_v47 = vld [vmem:[#allocation3 + $0x40] sm:$0xf]  ;;  %v7828_v45 = vshll.u32 %v7748_v46, 16  ;;  %v7853_v39 = vshrl.u32 %v7752_v60, 16 }
 0x33e   : > { %v7370_v25 = vrot.slane %v7369_v34, 4  ;;  %v7789_v62 = vor.u32 %v7788_v52, %v7785_v55  ;;  %v7842_v12 = vshll.u32 %v7750_v47, 16  ;;  %v7827_v28 = vrot.slane %v7825_v4, 4  ;;  %v8021_v4 = vld [vmem:[#allocation3 + $0x18] sm:$0xe] }
 0x33f   : > { %10301 = vmatpush3.bf16.msra.mxu1 %v10811_v1  ;;  %v7771_v1 = vrot.slane %v7769_v49, 4  ;;  %v7384_v43 = vrot.slane %v7383_v0, 4  ;;  %v12491_v49 = vld [vmem:[#allocation3 + $0x24] sm:$0x1]  ;;  %v7856_v0 = vshll.u32 %v7752_v60, 16  ;;  %v7830_v34 = vrot.slane %v7828_v45, 5 }
 0x340   : > { %10302 = vmatprep.subr.bf16.mxu1 %v10812_v3  ;;  %v7375_v6 = vsel %vm10991_vm14, %v7370_v25, %v7374_v61  ;;  %v7806_v29 = vshll.u32 %v12496_v58, 16  ;;  %v8020_v61 = vld [vmem:[#allocation3 + $0x10] sm:$0xe]  ;;  %v7864_v56 = vrot.slane %v7862_v10, 5 }
 0x341   : > { %v7775_v59 = vor.u32 %v7774_v30, %v7771_v1  ;;  %v7389_v24 = vsel %vm10991_vm14, %v7384_v43, %v7388_v41  ;;  %v7792_v1 = vshll.u32 %v12491_v49, 16  ;;  %v7803_v30 = vor.u32 %v7802_v21, %v7799_v54 }
 0x342   : > { %v9242_v36 = vcombine.low %v7375_v6, %v7389_v24  ;;  %v7855_v43 = vrot.slane %v7853_v39, 4  ;;  %v7831_v37 = vor.u32 %v7830_v34, %v7827_v28  ;;  %v9279_v52 = vrot.slane %v8020_v61, 9 }
 0x343   : > { %10303 = vmatpush3.bf16.msra.mxu1 %v10812_v3  ;;  %v12460_v3 = vld [vmem:[#allocation3 + $0x14] sm:$0x1]  ;;  %v7776_v18 = vrot.slane %v7775_v59, 4  ;;  %v7844_v59 = vrot.slane %v7842_v12, 5  ;;  %v12524_v25 = vrot.slane %v7792_v1, 5  ;;  %v9280_v34 = vrot.slane %v8021_v4, 9 }
 0x344   : > { %10304 = vmatprep.subr.bf16.mxu1 %v10813_v23  ;;  %v7764_v51 = vshll.u32 %v12460_v3, 16  ;;  %v7832_v46 = vrot.slane %v7831_v37, 4  ;;  %v8046_v45 = vrot.slane %v12460_v3, 5 }
 0x345   : > { %v7781_v42 = vsel %vm10991_vm14, %v7776_v18, %v7780_v26  ;;  %v12527_v18 = vrot.slane %v7806_v29, 5  ;;  %v8050_v29 = vrot.slane %v12467_v17, 5 }
 0x346   : > { %v7766_v11 = vrot.slane %v7764_v51, 5 }
 0x347   : > { %10305 = vmatpush3.bf16.msra.mxu1 %v10813_v23  ;;  %v7347_v23 = vsel %vm10991_vm14, %v7342_v63, %v7346_v5  ;;  %v7839_v63 = vshrl.u32 %v7750_v47, 16  ;;  %v10821_v5 = vld [vmem:[%s12774_s2 + $0x3a8] sm:$0xff]   ;;  %v8051_v9 = vsel %vm12115_vm9, %v9280_v34, %v8050_v29 }
 0x348   : > { %10306 = vmatprep.subr.bf16.mxu1 %v10814_v53  ;;  %v9241_v57 = vcombine.low %v7347_v23, %v7361_v22  ;;  %v7767_v14 = vsel %vm10991_vm14, %v7762_v35, %v7766_v11  ;;  %v7813_v22 = vrot.slane %v7811_v32, 4  ;;  %v12510_v23 = vrot.slane %v7789_v62, 4 }
 0x349   : > { %v7841_v51 = vrot.slane %v7839_v63, 4  ;;  %v7858_v35 = vrot.slane %v7856_v0, 5 }
 0x34a   : > { %v7817_v41 = vor.u32 %v7816_v7, %v7813_v22 }
 0x34b   : > { %10307 = vmatpush3.bf16.msra.mxu1 %v10814_v53  ;;  %v10818_v53 = vld [vmem:[%s12774_s2 + $0x390] sm:$0xff]   ;;  %v7845_v8 = vor.u32 %v7844_v59, %v7841_v51 }
 0x34c   : > { %10308 = vmatprep.subr.bf16.mxu1 %v10815_v38  ;;  %v7818_v40 = vrot.slane %v7817_v41, 4 }
 0x34d   : > { %v7846_v32 = vrot.slane %v7845_v8, 4  ;;  %v10825_v8 = vld [vmem:[%s12774_s2 + $0x3c8] sm:$0xff]  }
 0x34f   : > { %10309 = vmatpush3.bf16.msra.mxu1 %v10815_v38  ;;  %v9267_v38 = vcombine.low %v7767_v14, %v7781_v42  ;;  %v7795_v14 = vsel %vm10991_vm14, %v12510_v23, %v12524_v25  ;;  %v7859_v42 = vor.u32 %v7858_v35, %v7855_v43 }
 0x350   : > { %10318 = vmatprep.subr.bf16.mxu1 %v10816_v13 }
 0x351   : > { %v7860_v1 = vrot.slane %v7859_v42, 4 }
 0x352   : > { %10311 = vmatmul.mubr.bf16.vlgmr.msra.gmra.mrb[16].mxu1 %v9240_v27  ;;  %v12508_v27 = vld [vmem:[#allocation3 + $0x44] sm:$0x1] }
 0x353   : > { %10314 = vmatprep.mubr.bf16.mxu1 %v9241_v57  ;;  %10319 = vmatpush3.bf16.msra.mxu1 %v10816_v13  ;;  %v12498_v13 = vld [vmem:[#allocation3 + $0x34] sm:$0x1]  ;;  %v12518_v57 = vrot.slane %v7803_v30, 4  ;;  %v7865_v37 = vsel %vm10991_vm14, %v7860_v1, %v7864_v56 }
 0x354   : > { %10320 = vmatprep.subr.bf16.mxu1 %v10817_v50 }
 0x355   : > { %v7809_v33 = vsel %vm10991_vm14, %v12518_v57, %v12527_v18 }
 0x357   : > { %10321 = vmatpush3.bf16.msra.mxu1 %v10817_v50  ;;  %v7820_v50 = vshll.u32 %v12498_v13, 16 }
 0x358   : > { %10322 = vmatprep.subr.bf16.mxu1 %v10818_v53 }
 0x359   : > { %v12537_v26 = vrot.slane %v7820_v50, 5 }
 0x35a   : > { %10315 = vmatmul.mubr.bf16.gmra.mrb[20].mxu1 %v9242_v36  ;;  %v7836_v36 = vrot.slane %v7834_v2, 5  ;;  %v12576_v2 = vsel %vm12115_vm9, %v9279_v52, %v8046_v45 }
 0x35b   : > { %10323 = vmatpush3.bf16.msra.mxu1 %v10818_v53  ;;  %10334 = vmatprep.mubr.bf16.mxu1 %v9267_v38  ;;  %v7848_v53 = vshll.u32 %v12508_v27, 16  ;;  %v10823_v38 = vld [vmem:[%s12774_s2 + $0x3b8] sm:$0xff]   ;;  %v7823_v3 = vsel %vm10991_vm14, %v7818_v40, %v12537_v26  ;;  %v9303_v42 = vcombine.low %v12576_v2, %v8051_v9 }
 0x35c   : > { %10324 = vmatprep.subr.bf16.mxu1 %v10819_v44  ;;  %v7837_v57 = vsel %vm10991_vm14, %v7832_v46, %v7836_v36 }
 0x35d   : > { %v12551_v55 = vrot.slane %v7848_v53, 5  ;;  %v9269_v26 = vcombine.low %v7823_v3, %v7837_v57 }
 0x35f   : > { %10325 = vmatpush3.bf16.msra.mxu1 %v10819_v44  ;;  %v7851_v41 = vsel %vm10991_vm14, %v7846_v32, %v12551_v55 }
 0x360   : > { %10326 = vmatprep.subr.bf16.mxu1 %v10820_v16 }
 0x363   : > { %10327 = vmatpush3.bf16.msra.mxu1 %v10820_v16 }
 0x364   : > { %10328 = vmatprep.subr.bf16.mxu1 %v10821_v5 }
 0x365   : > { %v10072_v11 = vpop.f32.mrb[0].mxu1 }
 0x366   : > { %5230 = vst.msk [vmem:[%s12516_s6 + $0x10] sm:$0xff] %vm1017_vm5, %v10072_v11  ;;  %v5189_v24 = vpop.f32.mrb[1].mxu1  ;;  %v5260_v54 = vmul.f32 %v10072_v11, %v10072_v11  ;;  %v5239_v62 = vsel %vm1017_vm5, %v10072_v11, 0.0 }
 0x367   : > { %5228 = vst.msk [vmem:[%s12516_s6] sm:$0xff] %vm1017_vm5, %v5189_v24  ;;  %v5258_v6 = vmul.f32 %v5189_v24, %v5189_v24  ;;  %v10073_v15 = vpop.f32.mrb[2].mxu1  ;;  %10329 = vmatpush3.bf16.msra.mxu1 %v10821_v5  ;;  %v5236_v21 = vsel %vm1017_vm5, %v5189_v24, 0.0  ;;  %v10824_v5 = vld [vmem:[%s12774_s2 + $0x3c0] sm:$0xff]   ;;  %v9268_v24 = vcombine.low %v7795_v14, %v7809_v33  ;;  %v9270_v33 = vcombine.low %v7851_v41, %v7865_v37 }
 0x368   : > { %5231 = vst.msk [vmem:[%s12516_s6 + $0x18] sm:$0xff] %vm1017_vm5, %v10073_v15  ;;  %v5192_v44 = vpop.f32.mrb[3].mxu1  ;;  %10330 = vmatprep.subr.bf16.mxu1 %v10822_v20  ;;  %v5261_v30 = vmul.f32 %v10073_v15, %v10073_v15  ;;  %v5269_v22 = vsel %vm1017_vm5, %v5260_v54, 0.0  ;;  %v5241_v7 = vsel %vm1017_vm5, %v10073_v15, 0.0 }
 0x369   : > { %5229 = vst.msk [vmem:[%s12516_s6 + $0x8] sm:$0xff] %vm1017_vm5, %v5192_v44  ;;  %v5237_v47 = vsel %vm1017_vm5, %v5192_v44, 0.0  ;;  %v5259_v60 = vmul.f32 %v5192_v44, %v5192_v44  ;;  %v5266_v63 = vsel %vm1017_vm5, %v5258_v6, 0.0 }
 0x36a   : > { %v5238_v16 = vadd.f32 %v5237_v47, %v5236_v21  ;;  %v5271_v53 = vsel %vm1017_vm5, %v5261_v30, 0.0  ;;  %v10826_v47 = vld [vmem:[%s12774_s2 + $0x3d0] sm:$0xff]  }
 0x36b   : > { %v5267_v12 = vsel %vm1017_vm5, %v5259_v60, 0.0  ;;  %10331 = vmatpush3.bf16.msra.mxu1 %v10822_v20 }
 0x36c   : > { %v5240_v39 = vadd.f32 %v5239_v62, %v5238_v16  ;;  %v5268_v0 = vadd.f32 %v5267_v12, %v5266_v63  ;;  %10332 = vmatprep.subr.bf16.mxu1 %v10823_v38 }
 0x36d   : > { %v10076_v28 = vpop.f32.mrb[4].mxu1 }
 0x36e   : > { %v5270_v50 = vadd.f32 %v5269_v22, %v5268_v0  ;;  %5234 = vst.msk [vmem:[%s12516_s6 + $0x30] sm:$0xff] %vm1017_vm5, %v10076_v28  ;;  %v5205_v51 = vpop.f32.mrb[5].mxu1  ;;  %v5242_v59 = vadd.f32 %v5241_v7, %v5240_v39  ;;  %v5247_v14 = vsel %vm1017_vm5, %v10076_v28, 0.0  ;;  %v5264_v63 = vmul.f32 %v10076_v28, %v10076_v28  ;;  %v10827_v28 = vld [vmem:[%s12774_s2 + $0x3d8] sm:$0xff]  }
 0x36f   : > { %v10264_v43 = vpop.f32.mrb[8].mxu0  ;;  %5232 = vst.msk [vmem:[%s12516_s6 + $0x20] sm:$0xff] %vm1017_vm5, %v5205_v51  ;;  %v5243_v35 = vsel %vm1017_vm5, %v5205_v51, 0.0  ;;  %v5262_v17 = vmul.f32 %v5205_v51, %v5205_v51  ;;  %v10077_v20 = vpop.f32.mrb[6].mxu1  ;;  %10333 = vmatpush3.bf16.msra.mxu1 %v10823_v38 }
 0x370   : > { %9181 = vst.msk [vmem:[%s12516_s6 + $0x90] sm:$0xff] %vm1017_vm5, %v10264_v43  ;;  %v7162_v11 = vpop.f32.mrb[9].mxu0  ;;  %v5244_v18 = vadd.f32 %v5243_v35, %v5242_v59  ;;  %5235 = vst.msk [vmem:[%s12516_s6 + $0x38] sm:$0xff] %vm1017_vm5, %v10077_v20  ;;  %v5208_v61 = vpop.f32.mrb[7].mxu1  ;;  %10342 = vmatprep.subr.bf16.mxu1 %v10824_v5  ;;  %v5272_v15 = vadd.f32 %v5271_v53, %v5270_v50  ;;  %v7234_v23 = vmul.f32 %v10264_v43, %v10264_v43 }
 0x371   : > { %9179 = vst.msk [vmem:[%s12516_s6 + $0x80] sm:$0xff] %vm1017_vm5, %v7162_v11  ;;  %v7232_v10 = vmul.f32 %v7162_v11, %v7162_v11  ;;  %v10265_v6 = vpop.f32.mrb[10].mxu0  ;;  %v5273_v36 = vsel %vm1017_vm5, %v5262_v17, 0.0  ;;  %5233 = vst.msk [vmem:[%s12516_s6 + $0x28] sm:$0xff] %vm1017_vm5, %v5208_v61  ;;  %v7210_v44 = vsel %vm1017_vm5, %v7162_v11, 0.0  ;;  %v7213_v55 = vsel %vm1017_vm5, %v10264_v43, 0.0 }
 0x372   : > { %9182 = vst.msk [vmem:[%s12516_s6 + $0x98] sm:$0xff] %vm1017_vm5, %v10265_v6  ;;  %v7165_v25 = vpop.f32.mrb[11].mxu0  ;;  %10335 = vmatmul.mubr.bf16.vlgmr.msra.gmra.mrb[16].mxu1 %v9268_v24  ;;  %v5274_v46 = vadd.f32 %v5273_v36, %v5272_v15  ;;  %v7235_v52 = vmul.f32 %v10265_v6, %v10265_v6  ;;  %v5245_v21 = vsel %vm1017_vm5, %v5208_v61, 0.0  ;;  %v5263_v56 = vmul.f32 %v5208_v61, %v5208_v61  ;;  %v10828_v24 = vld [vmem:[%s12774_s2 + $0x3e0] sm:$0xff]  }
 0x373   : > { %9180 = vst.msk [vmem:[%s12516_s6 + $0x88] sm:$0xff] %vm1017_vm5, %v7165_v25  ;;  %v7211_v38 = vsel %vm1017_vm5, %v7165_v25, 0.0  ;;  %v7233_v40 = vmul.f32 %v7165_v25, %v7165_v25  ;;  %10338 = vmatprep.mubr.bf16.mxu1 %v9269_v26  ;;  %10343 = vmatpush3.bf16.msra.mxu1 %v10824_v5  ;;  %v7240_v60 = vsel %vm1017_vm5, %v7232_v10, 0.0  ;;  %v5246_v32 = vadd.f32 %v5245_v21, %v5244_v18 }
 0x374   : > { %v7212_v54 = vadd.f32 %v7211_v38, %v7210_v44  ;;  %10344 = vmatprep.subr.bf16.mxu1 %v10825_v8  ;;  %v7243_v4 = vsel %vm1017_vm5, %v7234_v23, 0.0  ;;  %v7215_v12 = vsel %vm1017_vm5, %v10265_v6, 0.0  ;;  %v5265_v30 = vmul.f32 %v10077_v20, %v10077_v20 }
 0x375   : > { %v7241_v16 = vsel %vm1017_vm5, %v7233_v40, 0.0  ;;  %v5248_v39 = vadd.f32 %v5247_v14, %v5246_v32  ;;  %v5275_v0 = vsel %vm1017_vm5, %v5263_v56, 0.0  ;;  %v7245_v5 = vsel %vm1017_vm5, %v7235_v52, 0.0  ;;  %v10829_v14 = vld [vmem:[%s12774_s2 + $0x3e8] sm:$0xff]   ;;  %v10830_v40 = vld [vmem:[%s12774_s2 + $0x3f0] sm:$0xff]   ;;  %v10831_v52 = vld [vmem:[%s12774_s2 + $0x3f8] sm:$0xff]  }
 0x376   : > { %v7214_v45 = vadd.f32 %v7213_v55, %v7212_v54  ;;  %v7242_v62 = vadd.f32 %v7241_v16, %v7240_v60  ;;  %v5249_v22 = vsel %vm1017_vm5, %v10077_v20, 0.0  ;;  %v5276_v59 = vadd.f32 %v5275_v0, %v5274_v46  ;;  %v8023_v46 = vld [vmem:[#allocation3 + $0x28] sm:$0xe]  ;;  %v8024_v55 = vld [vmem:[#allocation3 + $0x30] sm:$0xe] }
 0x377   : > { %v10268_v1 = vpop.f32.mrb[12].mxu0  ;;  %10345 = vmatpush3.bf16.msra.mxu1 %v10825_v8  ;;  %v12634_v51 = vadd.f32 %v5249_v22, %v5248_v39  ;;  %v5277_v2 = vsel %vm1017_vm5, %v5264_v63, 0.0  ;;  %v5279_v20 = vsel %vm1017_vm5, %v5265_v30, 0.0  ;;  %v8022_v54 = vld [vmem:[#allocation3 + $0x20] sm:$0xe]  ;;  %v9282_v21 = vrot.slane %v8023_v46, 9 }
 0x378   : > { %v7244_v3 = vadd.f32 %v7243_v4, %v7242_v62  ;;  %9185 = vst.msk [vmem:[%s12516_s6 + $0xb0] sm:$0xff] %vm1017_vm5, %v10268_v1  ;;  %v7178_v7 = vpop.f32.mrb[13].mxu0  ;;  %v7216_v34 = vadd.f32 %v7215_v12, %v7214_v45  ;;  %10346 = vmatprep.subr.bf16.mxu1 %v10826_v47  ;;  %v5278_v37 = vadd.f32 %v5277_v2, %v5276_v59  ;;  %v7221_v10 = vsel %vm1017_vm5, %v10268_v1, 0.0  ;;  %v8025_v60 = vld [vmem:[#allocation3 + $0x38] sm:$0xe] }
 0x379   : > { %9183 = vst.msk [vmem:[%s12516_s6 + $0xa0] sm:$0xff] %vm1017_vm5, %v7178_v7  ;;  %v7217_v29 = vsel %vm1017_vm5, %v7178_v7, 0.0  ;;  %v7236_v50 = vmul.f32 %v7178_v7, %v7178_v7  ;;  %v10269_v57 = vpop.f32.mrb[14].mxu0  ;;  %v7238_v53 = vmul.f32 %v10268_v1, %v10268_v1  ;;  %v9283_v16 = vrot.slane %v8024_v55, 9  ;;  %v8026_v12 = vld [vmem:[#allocation3 + $0x40] sm:$0xe] }
 0x37a   : > { %v7218_v43 = vadd.f32 %v7217_v29, %v7216_v34  ;;  %v7246_v35 = vadd.f32 %v7245_v5, %v7244_v3  ;;  %9186 = vst.msk [vmem:[%s12516_s6 + $0xb8] sm:$0xff] %vm1017_vm5, %v10269_v57  ;;  %v7181_v17 = vpop.f32.mrb[15].mxu0  ;;  %10339 = vmatmul.mubr.bf16.gmra.mrb[20].mxu1 %v9270_v33  ;;  %v12647_v26 = vadd.f32 %v5279_v20, %v5278_v37  ;;  %v7223_v25 = vsel %vm1017_vm5, %v10269_v57, 0.0 }
 0x37b   : > { %v7247_v41 = vsel %vm1017_vm5, %v7236_v50, 0.0  ;;  %9184 = vst.msk [vmem:[%s12516_s6 + $0xa8] sm:$0xff] %vm1017_vm5, %v7181_v17  ;;  %10347 = vmatpush3.bf16.msra.mxu1 %v10826_v47  ;;  %10358 = vmatprep.mubr.bf16.mxu1 %v9303_v42  ;;  %v7219_v18 = vsel %vm1017_vm5, %v7181_v17, 0.0  ;;  %v7237_v61 = vmul.f32 %v7181_v17, %v7181_v17  ;;  %v7239_v6 = vmul.f32 %v10269_v57, %v10269_v57 }
 0x37c   : > { %v7248_v11 = vadd.f32 %v7247_v41, %v7246_v35  ;;  %10348 = vmatprep.subr.bf16.mxu1 %v10827_v28  ;;  %v7220_v8 = vadd.f32 %v7219_v18, %v7218_v43  ;;  %v7251_v23 = vsel %vm1017_vm5, %v7238_v53, 0.0  ;;  %v8058_v47 = vrot.slane %v12496_v58, 5  ;;  %v8027_v58 = vld [vmem:[#allocation3 + $0x48] sm:$0xe] }
 0x37d   : > { %v7249_v15 = vsel %vm1017_vm5, %v7237_v61, 0.0  ;;  %v7253_v44 = vsel %vm1017_vm5, %v7239_v6, 0.0  ;;  %v8062_v32 = vrot.slane %v12498_v13, 5  ;;  %v9281_v56 = vrot.slane %v8022_v54, 9 }
 0x37e   : > { %v7222_v36 = vadd.f32 %v7221_v10, %v7220_v8  ;;  %v7250_v9 = vadd.f32 %v7249_v15, %v7248_v11  ;;  %v8054_v4 = vrot.slane %v12491_v49, 5  ;;  %v9284_v45 = vrot.slane %v8025_v60, 9 }
 0x37f   : > { %10349 = vmatpush3.bf16.msra.mxu1 %v10827_v28  ;;  %v8066_v62 = vrot.slane %v12501_v48, 5  ;;  %v8059_v63 = vsel %vm12115_vm9, %v9282_v21, %v8058_v47  ;;  %v8063_v1 = vsel %vm12115_vm9, %v9283_v16, %v8062_v32  ;;  %v9285_v39 = vrot.slane %v8026_v12, 9 }
 0x380   : > { %10350 = vmatprep.subr.bf16.mxu1 %v10828_v24  ;;  %v12656_v33 = vadd.f32 %v7223_v25, %v7222_v36  ;;  %v7252_v42 = vadd.f32 %v7251_v23, %v7250_v9  ;;  %v8055_v13 = vsel %vm12115_vm9, %v9281_v56, %v8054_v4  ;;  %v8070_v0 = vrot.slane %v12508_v27, 5 }
 0x381   : > { %v9304_v30 = vcombine.low %v8055_v13, %v8059_v63  ;;  %v8067_v49 = vsel %vm12115_vm9, %v9284_v45, %v8066_v62  ;;  %v9286_v5 = vrot.slane %v8027_v58, 9  ;;  %v8074_v3 = vrot.slane %v12529_v19, 5 }
 0x382   : > { %v12659_v38 = vadd.f32 %v7253_v44, %v7252_v42  ;;  %v9305_v48 = vcombine.low %v8063_v1, %v8067_v49  ;;  %v8071_v22 = vsel %vm12115_vm9, %v9285_v39, %v8070_v0  ;;  %v5281_v25 = vrot.slane %v12647_v26, 4 }
 0x383   : > { %10351 = vmatpush3.bf16.msra.mxu1 %v10828_v24  ;;  %v8075_v7 = vsel %vm12115_vm9, %v9286_v5, %v8074_v3  ;;  %v5251_v24 = vrot.slane %v12634_v51, 4 }
 0x384   : > { %10352 = vmatprep.subr.bf16.mxu1 %v10829_v14  ;;  %v9306_v34 = vcombine.low %v8071_v22, %v8075_v7  ;;  %v7255_v47 = vrot.slane %v12659_v38, 4  ;;  %v5282_v45 = vadd.f32 %v5281_v25, %v12647_v26 }
 0x385   : > { %v5252_v21 = vadd.f32 %v5251_v24, %v12634_v51 }
 0x386   : > { %v7256_v13 = vadd.f32 %v7255_v47, %v12659_v38 }
 0x387   : > { %10353 = vmatpush3.bf16.msra.mxu1 %v10829_v14  ;;  %v7225_v14 = vrot.slane %v12656_v33, 4  ;;  %v5253_v51 = vrot.slane %v5252_v21, 2 }
 0x388   : > { %10354 = vmatprep.subr.bf16.mxu1 %v10830_v40  ;;  %v7257_v22 = vrot.slane %v7256_v13, 2 }
 0x389   : > { %v7226_v62 = vadd.f32 %v7225_v14, %v12656_v33  ;;  %v5254_v26 = vadd.f32 %v5253_v51, %v5252_v21 }
 0x38b   : > { %10355 = vmatpush3.bf16.msra.mxu1 %v10830_v40  ;;  %v7227_v0 = vrot.slane %v7226_v62, 2 }
 0x38c   : > { %10356 = vmatprep.subr.bf16.mxu1 %v10831_v52 }
 0x38f   : > { %10357 = vmatpush3.bf16.msra.mxu1 %v10831_v52 }
 0x392   : > { %10359 = vmatmul.mubr.bf16.vlgmr.msra.gmra.mrb[16].mxu1 %v9304_v30 }
 0x393   : > { %10362 = vmatprep.mubr.bf16.mxu1 %v9305_v48  ;;  %v5283_v48 = vrot.slane %v5282_v45, 2 }
 0x39a   : > { %10363 = vmatmul.mubr.bf16.gmra.mrb[20].mxu1 %v9306_v34  ;;  %v5284_v34 = vadd.f32 %v5283_v48, %v5282_v45 }
 0x3e5   : > { %v10168_v28 = vpop.f32.mrb[8].mxu1 }
 0x3e6   : > { %9061 = vst.msk [vmem:[%s12516_s6 + $0x50] sm:$0xff] %vm1017_vm5, %v10168_v28  ;;  %v6220_v29 = vpop.f32.mrb[9].mxu1  ;;  %v6292_v59 = vmul.f32 %v10168_v28, %v10168_v28  ;;  %v6271_v35 = vsel %vm1017_vm5, %v10168_v28, 0.0  ;;  %v7228_v28 = vadd.f32 %v7227_v0, %v7226_v62 }
 0x3e7   : > { %9059 = vst.msk [vmem:[%s12516_s6 + $0x40] sm:$0xff] %vm1017_vm5, %v6220_v29  ;;  %v6290_v27 = vmul.f32 %v6220_v29, %v6220_v29  ;;  %v10169_v50 = vpop.f32.mrb[10].mxu1  ;;  %v6268_v57 = vsel %vm1017_vm5, %v6220_v29, 0.0 }
 0x3e8   : > { %9062 = vst.msk [vmem:[%s12516_s6 + $0x58] sm:$0xff] %vm1017_vm5, %v10169_v50  ;;  %v6223_v19 = vpop.f32.mrb[11].mxu1  ;;  %v6293_v20 = vmul.f32 %v10169_v50, %v10169_v50  ;;  %v6301_v11 = vsel %vm1017_vm5, %v6292_v59, 0.0  ;;  %v6273_v18 = vsel %vm1017_vm5, %v10169_v50, 0.0  ;;  %v5255_v50 = vrot.slane %v5254_v26, 1 }
 0x3e9   : > { %9060 = vst.msk [vmem:[%s12516_s6 + $0x48] sm:$0xff] %vm1017_vm5, %v6223_v19  ;;  %v6269_v31 = vsel %vm1017_vm5, %v6223_v19, 0.0  ;;  %v6291_v2 = vmul.f32 %v6223_v19, %v6223_v19  ;;  %v6298_v17 = vsel %vm1017_vm5, %v6290_v27, 0.0  ;;  %v7258_v19 = vadd.f32 %v7257_v22, %v7256_v13 }
 0x3ea   : > { %v6270_v43 = vadd.f32 %v6269_v31, %v6268_v57  ;;  %v6303_v15 = vsel %vm1017_vm5, %v6293_v20, 0.0  ;;  %v5285_v57 = vrot.slane %v5284_v34, 1  ;;  %v7229_v31 = vrot.slane %v7228_v28, 1 }
 0x3eb   : > { %v6299_v41 = vsel %vm1017_vm5, %v6291_v2, 0.0 }
 0x3ec   : > { %v6272_v37 = vadd.f32 %v6271_v35, %v6270_v43  ;;  %v6300_v53 = vadd.f32 %v6299_v41, %v6298_v17  ;;  %v5256_v35 = vadd.f32 %v5255_v50, %v5254_v26  ;;  %v7259_v17 = vrot.slane %v7258_v19, 1 }
 0x3ed   : > { %v10172_v61 = vpop.f32.mrb[12].mxu1 }
 0x3ee   : > { %v6302_v8 = vadd.f32 %v6301_v11, %v6300_v53  ;;  %9065 = vst.msk [vmem:[%s12516_s6 + $0x70] sm:$0xff] %vm1017_vm5, %v10172_v61  ;;  %v6236_v10 = vpop.f32.mrb[13].mxu1  ;;  %v6274_v6 = vadd.f32 %v6273_v18, %v6272_v37  ;;  %v6296_v46 = vmul.f32 %v10172_v61, %v10172_v61  ;;  %v6279_v32 = vsel %vm1017_vm5, %v10172_v61, 0.0 }
 0x3ef   : > { %9063 = vst.msk [vmem:[%s12516_s6 + $0x60] sm:$0xff] %vm1017_vm5, %v6236_v10  ;;  %v6275_v36 = vsel %vm1017_vm5, %v6236_v10, 0.0  ;;  %v6294_v9 = vmul.f32 %v6236_v10, %v6236_v10  ;;  %v10173_v23 = vpop.f32.mrb[14].mxu1  ;;  %v5286_v37 = vadd.f32 %v5285_v57, %v5284_v34  ;;  %v7230_v53 = vadd.f32 %v7229_v31, %v7228_v28 }
 0x3f0   : > { %v6276_v42 = vadd.f32 %v6275_v36, %v6274_v6  ;;  %v6304_v44 = vadd.f32 %v6303_v15, %v6302_v8  ;;  %9066 = vst.msk [vmem:[%s12516_s6 + $0x78] sm:$0xff] %vm1017_vm5, %v10173_v23  ;;  %v6239_v40 = vpop.f32.mrb[15].mxu1  ;;  %v6297_v56 = vmul.f32 %v10173_v23, %v10173_v23  ;;  %v6309_v1 = vsel %vm1017_vm5, %v6296_v46, 0.0 }
 0x3f1   : > { %v6305_v55 = vsel %vm1017_vm5, %v6294_v9, 0.0  ;;  %9064 = vst.msk [vmem:[%s12516_s6 + $0x68] sm:$0xff] %vm1017_vm5, %v6239_v40  ;;  %v6277_v52 = vsel %vm1017_vm5, %v6239_v40, 0.0  ;;  %v6295_v54 = vmul.f32 %v6239_v40, %v6239_v40  ;;  %v6281_v58 = vsel %vm1017_vm5, %v10173_v23, 0.0 }
 0x3f2   : > { %v6306_v60 = vadd.f32 %v6305_v55, %v6304_v44  ;;  %v6278_v16 = vadd.f32 %v6277_v52, %v6276_v42  ;;  %v6311_v39 = vsel %vm1017_vm5, %v6297_v56, 0.0  ;;  %v7260_v61 = vadd.f32 %v7259_v17, %v7258_v19 }
 0x3f3   : > { %v6307_v4 = vsel %vm1017_vm5, %v6295_v54, 0.0 }
 0x3f4   : > { %v6280_v63 = vadd.f32 %v6279_v32, %v6278_v16  ;;  %v6308_v12 = vadd.f32 %v6307_v4, %v6306_v60 }
 0x3f6   : > { %v6282_v30 = vadd.f32 %v6281_v58, %v6280_v63  ;;  %v6310_v49 = vadd.f32 %v6309_v1, %v6308_v12 }
 0x3f8   : > { %v6283_v5 = vrot.slane %v6282_v30, 4  ;;  %v6312_v3 = vadd.f32 %v6311_v39, %v6310_v49 }
 0x3fa   : > { %v6284_v33 = vadd.f32 %v6283_v5, %v6282_v30  ;;  %v6313_v7 = vrot.slane %v6312_v3, 4 }
 0x3fc   : > { %v6285_v29 = vrot.slane %v6284_v33, 2  ;;  %v6314_v27 = vadd.f32 %v6313_v7, %v6312_v3 }
 0x3fe   : > { %v6286_v59 = vadd.f32 %v6285_v29, %v6284_v33  ;;  %v6315_v38 = vrot.slane %v6314_v27, 2 }
 0x400   : > { %v6287_v2 = vrot.slane %v6286_v59, 1  ;;  %v6316_v43 = vadd.f32 %v6315_v38, %v6314_v27 }
 0x402   : > { %v6288_v20 = vadd.f32 %v6287_v2, %v6286_v59  ;;  %v6317_v41 = vrot.slane %v6316_v43, 1 }
 0x404   : > { %v6289_v11 = vadd.f32 %v6288_v20, %v5256_v35  ;;  %v6318_v18 = vadd.f32 %v6317_v41, %v6316_v43 }
 0x406   : > { %v6319_v24 = vadd.f32 %v6318_v18, %v5286_v37  ;;  %v12725_v8 = vadd.f32 %v7230_v53, %v6289_v11 }
 0x408   : > { %v12727_v10 = vadd.f32 %v7260_v61, %v6319_v24 }
 0x465   : > { %v10360_v6 = vpop.f32.mrb[16].mxu1 }
 0x466   : > { %9317 = vst.msk [vmem:[%s12516_s6 + $0xd0] sm:$0xff] %vm1017_vm5, %v10360_v6  ;;  %v8191_v15 = vpop.f32.mrb[17].mxu1  ;;  %v8263_v25 = vmul.f32 %v10360_v6, %v10360_v6  ;;  %v8242_v46 = vsel %vm1017_vm5, %v10360_v6, 0.0 }
 0x467   : > { %9315 = vst.msk [vmem:[%s12516_s6 + $0xc0] sm:$0xff] %vm1017_vm5, %v8191_v15  ;;  %v8261_v36 = vmul.f32 %v8191_v15, %v8191_v15  ;;  %v10361_v9 = vpop.f32.mrb[18].mxu1  ;;  %v8239_v14 = vsel %vm1017_vm5, %v8191_v15, 0.0 }
 0x468   : > { %9318 = vst.msk [vmem:[%s12516_s6 + $0xd8] sm:$0xff] %vm1017_vm5, %v10361_v9  ;;  %v8194_v23 = vpop.f32.mrb[19].mxu1  ;;  %v8264_v52 = vmul.f32 %v10361_v9, %v10361_v9  ;;  %v8272_v60 = vsel %vm1017_vm5, %v8263_v25, 0.0  ;;  %v8244_v16 = vsel %vm1017_vm5, %v10361_v9, 0.0 }
 0x469   : > { %9316 = vst.msk [vmem:[%s12516_s6 + $0xc8] sm:$0xff] %vm1017_vm5, %v8194_v23  ;;  %v8240_v42 = vsel %vm1017_vm5, %v8194_v23, 0.0  ;;  %v8262_v44 = vmul.f32 %v8194_v23, %v8194_v23  ;;  %v8269_v55 = vsel %vm1017_vm5, %v8261_v36, 0.0 }
 0x46a   : > { %v8241_v40 = vadd.f32 %v8240_v42, %v8239_v14  ;;  %v8274_v62 = vsel %vm1017_vm5, %v8264_v52, 0.0 }
 0x46b   : > { %v8270_v54 = vsel %vm1017_vm5, %v8262_v44, 0.0 }
 0x46c   : > { %v8243_v21 = vadd.f32 %v8242_v46, %v8241_v40  ;;  %v8271_v47 = vadd.f32 %v8270_v54, %v8269_v55 }
 0x46d   : > { %v10364_v32 = vpop.f32.mrb[20].mxu1 }
 0x46e   : > { %v8273_v56 = vadd.f32 %v8272_v60, %v8271_v47  ;;  %9321 = vst.msk [vmem:[%s12516_s6 + $0xf0] sm:$0xff] %vm1017_vm5, %v10364_v32  ;;  %v8207_v4 = vpop.f32.mrb[21].mxu1  ;;  %v8245_v45 = vadd.f32 %v8244_v16, %v8243_v21  ;;  %v8267_v30 = vmul.f32 %v10364_v32, %v10364_v32  ;;  %v8250_v3 = vsel %vm1017_vm5, %v10364_v32, 0.0 }
 0x46f   : > { %9319 = vst.msk [vmem:[%s12516_s6 + $0xe0] sm:$0xff] %vm1017_vm5, %v8207_v4  ;;  %v8246_v63 = vsel %vm1017_vm5, %v8207_v4, 0.0  ;;  %v8265_v12 = vmul.f32 %v8207_v4, %v8207_v4  ;;  %v10365_v1 = vpop.f32.mrb[22].mxu1 }
 0x470   : > { %v8247_v58 = vadd.f32 %v8246_v63, %v8245_v45  ;;  %v8275_v51 = vadd.f32 %v8274_v62, %v8273_v56  ;;  %9322 = vst.msk [vmem:[%s12516_s6 + $0xf8] sm:$0xff] %vm1017_vm5, %v10365_v1  ;;  %v8210_v13 = vpop.f32.mrb[23].mxu1  ;;  %v8268_v26 = vmul.f32 %v10365_v1, %v10365_v1  ;;  %v8280_v34 = vsel %vm1017_vm5, %v8267_v30, 0.0 }
 0x471   : > { %v8276_v49 = vsel %vm1017_vm5, %v8265_v12, 0.0  ;;  %9320 = vst.msk [vmem:[%s12516_s6 + $0xe8] sm:$0xff] %vm1017_vm5, %v8210_v13  ;;  %v8248_v39 = vsel %vm1017_vm5, %v8210_v13, 0.0  ;;  %v8266_v48 = vmul.f32 %v8210_v13, %v8210_v13  ;;  %v8252_v28 = vsel %vm1017_vm5, %v10365_v1, 0.0  ;;  %s208_s6 = scalar_lea.vmem %s12776_s4, %s8388_s29 }
 0x472   : > { %v8277_v0 = vadd.f32 %v8276_v49, %v8275_v51  ;;  %v8249_v5 = vadd.f32 %v8248_v39, %v8247_v58  ;;  %v8282_v50 = vsel %vm1017_vm5, %v8268_v26, 0.0 }
 0x473   : > { %v8278_v22 = vsel %vm1017_vm5, %v8266_v48, 0.0 }
 0x474   : > { %v8251_v33 = vadd.f32 %v8250_v3, %v8249_v5  ;;  %v8279_v7 = vadd.f32 %v8278_v22, %v8277_v0 }
 0x476   : > { %v8253_v29 = vadd.f32 %v8252_v28, %v8251_v33  ;;  %v8281_v27 = vadd.f32 %v8280_v34, %v8279_v7 }
 0x478   : > { %v8254_v19 = vrot.slane %v8253_v29, 4  ;;  %v8283_v59 = vadd.f32 %v8282_v50, %v8281_v27 }
 0x47a   : > { %v8255_v38 = vadd.f32 %v8254_v19, %v8253_v29  ;;  %v8284_v57 = vrot.slane %v8283_v59, 4 }
 0x47c   : > { %v8256_v31 = vrot.slane %v8255_v38, 2  ;;  %v8285_v2 = vadd.f32 %v8284_v57, %v8283_v59 }
 0x47e   : > { %v8257_v43 = vadd.f32 %v8256_v31, %v8255_v38  ;;  %v8286_v35 = vrot.slane %v8285_v2, 2 }
 0x480   : > { %v8258_v17 = vrot.slane %v8257_v43, 1  ;;  %v8287_v20 = vadd.f32 %v8286_v35, %v8285_v2 }
 0x482   : > { %v8259_v41 = vadd.f32 %v8258_v17, %v8257_v43  ;;  %v8288_v37 = vrot.slane %v8287_v20, 1 }
 0x484   : > { %v8260_v53 = vadd.f32 %v8259_v41, %v12725_v8  ;;  %v8289_v11 = vadd.f32 %v8288_v37, %v8287_v20 }
 0x486   : > { %v8290_v18 = vadd.f32 %v8289_v11, %v12727_v10  ;;  %8292 = vst.msk [vmem:[%s208_s6] sm:$0x1] %vm356_vm3, %v8260_v53 }
 0x488   : > { %8293 = vst.msk [vmem:[%s208_s6 + $0x1] sm:$0x1] %vm356_vm3, %v8290_v18 }
 0x489 PF: > { %s15_s15 = sadd.s32 1, %s10838_s15  }
 0x48a   : > { %p12_p4 = scmp.ge.s32.totalorder %s15_s15, 4  }
 0x48c   :  { %14 = sbr.rel (!%p12_p4) target bundleno = 1 (0x1), region = 119 }

</bundles_post_ra>
